<compile_context>
chip_gen: v7x
topology: tpu7x:2x2x1
jax: 0.10.0
libtpu: 0.0.40
codegen_flags: <defaults>
</compile_context>

<pallas_src>
import math
import numpy as np
import jax
import jax.numpy as jnp
from jax.experimental import pallas as pl
from jax.experimental.pallas import tpu as pltpu

jax.config.update("jax_default_matmul_precision", "highest")

# ---------------- small, shape-consistent config ----------------
B, S, E, H, V = 2, 8, 32, 4, 128       # batch, seq, embed, heads, vocab
HD = E // H                            # head dim
BS = B * S
HE = H * E                             # 128-lane (h, g, d) working layout
MAX_SEQ = 16

THR = 0.5
TAU_MEM = 10.0
TAU_SYN = 5.0
A_SYN = math.exp(-1.0 / TAU_SYN)
A_MEM = math.exp(-1.0 / TAU_MEM)
LN_EPS = 1e-5
NORM_EPS = 1e-12                       # F.normalize eps
SCALE = 1.0 / math.sqrt(HD)


# ---------------- constant layout matrices (0/1 selection & pooling) ----------------
def _layout_constants():
    e = np.arange(E)
    c = np.arange(HE)
    eh, ed = e // HD, e % HD
    ch, cg, cd = c // E, (c % E) // HD, c % HD
    # replicate head-h block of q across all g positions: col (h,g,d) <- row (h,d)
    rq = ((eh[:, None] == ch[None, :]) & (ed[:, None] == cd[None, :])).astype(np.float32)
    # replicate head-g block of k / v across all h positions: col (h,g,d) <- row (g,d)
    rk = ((eh[:, None] == cg[None, :]) & (ed[:, None] == cd[None, :])).astype(np.float32)
    # sum over d inside each (h, g) sub-block (broadcast back over d)
    pool_d = (c[:, None] // HD == c[None, :] // HD).astype(np.float32)
    # sum over g inside each h block (take the d==0 representative of each g)
    pool_g = ((cd[:, None] == 0) & (ch[:, None] == ch[None, :])).astype(np.float32)
    # pool over g back to the natural (h, d) layout
    p2 = ((ch[:, None] == eh[None, :]) & (cd[:, None] == ed[None, :])).astype(np.float32)
    # row gather implementing the permute(0,2,1,3).view(B,S,E) "scramble":
    # zsel[m*BS + r] = z[H*r + m]   (z is the per-batch (H, S, HD) flatten)
    rows = np.arange(H * BS)
    m_of, rd_of = rows // BS, rows % BS
    cols = np.arange(B * H * S)
    sel = (cols[None, :] == (H * rd_of + m_of)[:, None]).astype(np.float32)
    names = ("rq", "rk", "pool_d", "pool_g", "p2", "sel")
    return {n: jnp.asarray(a) for n, a in zip(names, (rq, rk, pool_d, pool_g, p2, sel))}


# ---------------- the fused kernel: token ids -> logits ----------------
def fused_qa_kernel(ids_ref, tok_ref, pos_ref, wqkv_ref, bqkv_ref,
                    wo_ref, bo_ref, gamma_ref, beta_ref, wp_ref, bp_ref,
                    rq_ref, rk_ref, pd_ref, pg_ref, p2_ref, sel_ref,
                    logits_ref):
    f32 = jnp.float32
    dot = lambda a, b: jnp.dot(a, b, preferred_element_type=f32)

    # ---- token + position embeddings (one-hot gather on the MXU) ----
    ids = ids_ref[...]                                               # (BS, 1) int32
    onehot = (jax.lax.broadcasted_iota(jnp.int32, (BS, V), 1) == ids).astype(f32)
    tok = dot(onehot, tok_ref[...])                                  # (BS, E)
    pos = jnp.concatenate([pos_ref[0:S, :]] * B, axis=0)             # (BS, E)
    x = tok + pos

    # ---- fused Q|K|V projection ----
    qkv = dot(x, wqkv_ref[...]) + bqkv_ref[...]                      # (BS, 3E)
    q = qkv[:, 0:E]
    k = qkv[:, E:2 * E]
    v = qkv[:, 2 * E:3 * E]

    # ---- spiking dynamics: integrate_spikes on q, then k, then v (zero-init buffers) ----
    syn = q
    mem = q
    sq = (mem >= THR).astype(f32)
    mem = mem - sq * THR
    syn = syn * A_SYN + k
    mem = mem * A_MEM + syn
    sk = (mem >= THR).astype(f32)
    mem = mem - sk * THR
    syn = syn * A_SYN + v
    mem = mem * A_MEM + syn
    sv = (mem >= THR).astype(f32)

    # ---- head-axis attention, vectorized in a 128-lane (h, g, d) layout ----
    qrep = dot(sq, rq_ref[...])                                      # q spikes at (h, *, d)
    krep = dot(sk, rk_ref[...])                                      # k spikes at (*, g, d)
    vrep = dot(sv, rk_ref[...])                                      # v spikes at (*, g, d)
    # F.normalize(dim=-1, eps=1e-12): spikes are exactly 0/1 so sum(x*x) == sum(x)
    qden = jnp.maximum(jnp.sqrt(dot(qrep, pd_ref[...])), NORM_EPS)
    kden = jnp.maximum(jnp.sqrt(dot(krep, pd_ref[...])), NORM_EPS)
    qn = qrep / qden
    kn = krep / kden
    scores = dot(qn * kn, pd_ref[...]) * SCALE                       # (BS, 128), const over d
    # scores lie in [0, 1/sqrt(HD)] so exp() needs no max-subtraction (same math as softmax)
    ex = jnp.exp(scores)
    den = dot(ex, pg_ref[...])                                       # sum over g per head block
    ctx = dot((ex / den) * vrep, p2_ref[...])                        # (BS, E): ctx[b*S+s, h*HD+d]

    # ---- torch: context.permute(0,2,1,3).contiguous().view(B,S,E) ----
    # per batch: (S, H, HD) -> (H, S, HD) flatten, done with static slices + one row-gather matmul
    z = jnp.concatenate(
        [ctx[b * S:(b + 1) * S, h * HD:(h + 1) * HD]
         for b in range(B) for h in range(H)], axis=0)               # (B*H*S, HD)
    zsel = dot(sel_ref[...], z)                                      # zsel[m*BS + r] = z[H*r + m]
    y = jnp.concatenate([zsel[m * BS:(m + 1) * BS, :] for m in range(H)], axis=1)  # (BS, E)

    # ---- output Linear + LayerNorm + vocab projection (lane-dense V=128 store) ----
    o = dot(y, wo_ref[...]) + bo_ref[...]
    mu = jnp.mean(o, axis=-1, keepdims=True)
    cen = o - mu
    var = jnp.mean(cen * cen, axis=-1, keepdims=True)
    ln = cen * jax.lax.rsqrt(var + LN_EPS) * gamma_ref[...] + beta_ref[...]
    logits_ref[...] = dot(ln, wp_ref[...]) + bp_ref[...]


# ---------------- wrapper ----------------
_VMEM = pl.BlockSpec(memory_space=pltpu.MemorySpace.VMEM)   # whole array, resident in VMEM


@jax.jit
def forward(question_ids, p, consts):
    ids2d = question_ids.reshape(BS, 1).astype(jnp.int32)
    wqkv = jnp.concatenate([p["wq"], p["wk"], p["wv"]], axis=1)      # (E, 3E)
    bqkv = jnp.concatenate([p["bq"], p["bk"], p["bv"]], axis=1)      # (1, 3E)
    logits = pl.pallas_call(
        fused_qa_kernel,
        out_shape=jax.ShapeDtypeStruct((BS, V), jnp.float32),
        in_specs=[_VMEM] * 17,
        out_specs=_VMEM,
    )(ids2d, p["tok_emb"], p["pos_emb"], wqkv, bqkv,
      p["wo"], p["bo"], p["gamma"], p["beta"], p["wp"], p["bp"],
      consts["rq"], consts["rk"], consts["pool_d"], consts["pool_g"],
      consts["p2"], consts["sel"])
    return logits.reshape(B, S, V)


# ---------------- parameters (deterministic, synthetic) ----------------
def init_params(key):
    ks = jax.random.split(key, 12)
    s = 0.3
    return {
        "tok_emb": jax.random.normal(ks[0], (V, E), jnp.float32) * s,
        "pos_emb": jax.random.normal(ks[1], (MAX_SEQ, E), jnp.float32) * s,
        # linear weights stored as (in, out), i.e. torch W.T
        "wq": jax.random.normal(ks[2], (E, E), jnp.float32) * s,
        "wk": jax.random.normal(ks[3], (E, E), jnp.float32) * s,
        "wv": jax.random.normal(ks[4], (E, E), jnp.float32) * s,
        "bq": jax.random.normal(ks[5], (1, E), jnp.float32) * s,
        "bk": jax.random.normal(ks[6], (1, E), jnp.float32) * s,
        "bv": jax.random.normal(ks[7], (1, E), jnp.float32) * s,
        "wo": jax.random.normal(ks[8], (E, E), jnp.float32) * s,
        "bo": jax.random.normal(ks[9], (1, E), jnp.float32) * s,
        "gamma": jnp.ones((1, E), jnp.float32),
        "beta": jnp.zeros((1, E), jnp.float32),
        "wp": jax.random.normal(ks[10], (E, V), jnp.float32) * s,
        "bp": jax.random.normal(ks[11], (1, V), jnp.float32) * s,
    }


# ---------------- pure-JAX reference (mirrors the torch module exactly) ----------------
def reference_forward(question_ids, p):
    pos_ids = jnp.arange(S)
    emb = p["tok_emb"][question_ids] + p["pos_emb"][pos_ids][None, :, :]
    q = (emb @ p["wq"] + p["bq"][0]).reshape(B, S, H, HD)
    k = (emb @ p["wk"] + p["bk"][0]).reshape(B, S, H, HD)
    v = (emb @ p["wv"] + p["bv"][0]).reshape(B, S, H, HD)
    syn = q
    mem = q
    sq = (mem >= THR).astype(jnp.float32); mem = mem - sq * THR
    syn = syn * A_SYN + k; mem = mem * A_MEM + syn
    sk = (mem >= THR).astype(jnp.float32); mem = mem - sk * THR
    syn = syn * A_SYN + v; mem = mem * A_MEM + syn
    sv = (mem >= THR).astype(jnp.float32)

    def l2n(x):
        n = jnp.sqrt(jnp.sum(x * x, axis=-1, keepdims=True))
        return x / jnp.maximum(n, NORM_EPS)

    qn, kn = l2n(sq), l2n(sk)
    scores = jnp.einsum("bshd,bsgd->bshg", qn, kn) * SCALE
    probs = jax.nn.softmax(scores, axis=-1)
    ctx = jnp.einsum("bshg,bsgd->bshd", probs, sv)
    ctx = jnp.transpose(ctx, (0, 2, 1, 3)).reshape(B, S, E)
    out = ctx @ p["wo"] + p["bo"][0]
    mean = out.mean(-1, keepdims=True)
    var = jnp.mean((out - mean) ** 2, axis=-1, keepdims=True)
    ln = (out - mean) * jax.lax.rsqrt(var + LN_EPS) * p["gamma"][0] + p["beta"][0]
    return ln @ p["wp"] + p["bp"][0]


if __name__ == "__main__":
    key = jax.random.PRNGKey(0)
    pkey, ikey = jax.random.split(key)
    params = init_params(pkey)
    consts = _layout_constants()
    question_ids = jax.random.randint(ikey, (B, S), 0, V)

    logits = jax.block_until_ready(forward(question_ids, params, consts))
    ref = jax.block_until_ready(reference_forward(question_ids, params))

    assert logits.shape == (B, S, V)
    max_err = float(jnp.max(jnp.abs(logits - ref)))
    assert bool(jnp.allclose(logits, ref, atol=1e-3, rtol=1e-3)), max_err
    print("KERNEL_OK")
</pallas_src>

<mosaic_0001>
module attributes {stable_mosaic.version = 11 : i64} {
  func.func @fused_qa_kernel(%arg0: memref<16x1xi32, #tpu.memory_space<vmem>>, %arg1: memref<128x32xf32, #tpu.memory_space<vmem>>, %arg2: memref<16x32xf32, #tpu.memory_space<vmem>>, %arg3: memref<32x96xf32, #tpu.memory_space<vmem>>, %arg4: memref<1x96xf32, #tpu.memory_space<vmem>>, %arg5: memref<32x32xf32, #tpu.memory_space<vmem>>, %arg6: memref<1x32xf32, #tpu.memory_space<vmem>>, %arg7: memref<1x32xf32, #tpu.memory_space<vmem>>, %arg8: memref<1x32xf32, #tpu.memory_space<vmem>>, %arg9: memref<32x128xf32, #tpu.memory_space<vmem>>, %arg10: memref<1x128xf32, #tpu.memory_space<vmem>>, %arg11: memref<32x128xf32, #tpu.memory_space<vmem>>, %arg12: memref<32x128xf32, #tpu.memory_space<vmem>>, %arg13: memref<128x128xf32, #tpu.memory_space<vmem>>, %arg14: memref<128x128xf32, #tpu.memory_space<vmem>>, %arg15: memref<128x32xf32, #tpu.memory_space<vmem>>, %arg16: memref<64x64xf32, #tpu.memory_space<vmem>>, %arg17: memref<16x128xf32, #tpu.memory_space<vmem>>) attributes {dimension_semantics = [], scalar_prefetch = 0 : i64, scratch_operands = 0 : i64, tpu.core_type = #tpu.core_type<tc>} {
    %c0 = arith.constant 0 : index
    %c0_0 = arith.constant 0 : index
    %0 = vector.load %arg0[%c0, %c0_0] : memref<16x1xi32, #tpu.memory_space<vmem>>, vector<16x1xi32>
    %1 = tpu.iota {dimensions = array<i32: 1>} : vector<16x128xi32>
    %2 = vector.broadcast %0 : vector<16x1xi32> to vector<16x128xi32>
    %3 = arith.cmpi eq, %1, %2 : vector<16x128xi32>
    %4 = arith.extui %3 : vector<16x128xi1> to vector<16x128xi32>
    %5 = arith.sitofp %4 : vector<16x128xi32> to vector<16x128xf32>
    %c0_1 = arith.constant 0 : index
    %c0_2 = arith.constant 0 : index
    %6 = vector.load %arg1[%c0_1, %c0_2] : memref<128x32xf32, #tpu.memory_space<vmem>>, vector<128x32xf32>
    %cst = arith.constant dense<0.000000e+00> : vector<16x32xf32>
    %7 = tpu.matmul %5, %6, %cst {dimension_numbers = #tpu.dot_dimension_numbers<[1], [0], [0], [1], [0, 0, 1, 1], [], []>, precision = #tpu.contract_precision<fp32>} : vector<16x128xf32>, vector<128x32xf32>, vector<16x32xf32> -> vector<16x32xf32>
    %c0_3 = arith.constant 0 : index
    %c0_4 = arith.constant 0 : index
    %8 = vector.load %arg2[%c0_3, %c0_4] : memref<16x32xf32, #tpu.memory_space<vmem>>, vector<8x32xf32>
    %9 = tpu.concatenate %8, %8 in 0 : vector<8x32xf32>, vector<8x32xf32> -> vector<16x32xf32>
    %10 = arith.addf %7, %9 : vector<16x32xf32>
    %c0_5 = arith.constant 0 : index
    %c0_6 = arith.constant 0 : index
    %11 = vector.load %arg3[%c0_5, %c0_6] : memref<32x96xf32, #tpu.memory_space<vmem>>, vector<32x96xf32>
    %cst_7 = arith.constant dense<0.000000e+00> : vector<16x96xf32>
    %12 = tpu.matmul %10, %11, %cst_7 {dimension_numbers = #tpu.dot_dimension_numbers<[1], [0], [0], [1], [0, 0, 1, 1], [], []>, precision = #tpu.contract_precision<fp32>} : vector<16x32xf32>, vector<32x96xf32>, vector<16x96xf32> -> vector<16x96xf32>
    %c0_8 = arith.constant 0 : index
    %c0_9 = arith.constant 0 : index
    %13 = vector.load %arg4[%c0_8, %c0_9] : memref<1x96xf32, #tpu.memory_space<vmem>>, vector<1x96xf32>
    %14 = vector.broadcast %13 : vector<1x96xf32> to vector<16x96xf32>
    %15 = arith.addf %12, %14 : vector<16x96xf32>
    %16 = vector.extract_strided_slice %15 {offsets = [0, 0], sizes = [16, 32], strides = [1, 1]} : vector<16x96xf32> to vector<16x32xf32>
    %17 = vector.extract_strided_slice %15 {offsets = [0, 32], sizes = [16, 32], strides = [1, 1]} : vector<16x96xf32> to vector<16x32xf32>
    %18 = vector.extract_strided_slice %15 {offsets = [0, 64], sizes = [16, 32], strides = [1, 1]} : vector<16x96xf32> to vector<16x32xf32>
    %cst_10 = arith.constant 5.000000e-01 : f32
    %19 = vector.broadcast %cst_10 : f32 to vector<16x32xf32>
    %20 = arith.cmpf oge, %16, %19 : vector<16x32xf32>
    %21 = arith.extui %20 : vector<16x32xi1> to vector<16x32xi32>
    %22 = arith.sitofp %21 : vector<16x32xi32> to vector<16x32xf32>
    %cst_11 = arith.constant 5.000000e-01 : f32
    %23 = vector.broadcast %cst_11 : f32 to vector<16x32xf32>
    %24 = arith.mulf %22, %23 : vector<16x32xf32>
    %25 = arith.subf %16, %24 : vector<16x32xf32>
    %cst_12 = arith.constant 0.818730771 : f32
    %26 = vector.broadcast %cst_12 : f32 to vector<16x32xf32>
    %27 = arith.mulf %16, %26 : vector<16x32xf32>
    %28 = arith.addf %27, %17 : vector<16x32xf32>
    %cst_13 = arith.constant 0.904837429 : f32
    %29 = vector.broadcast %cst_13 : f32 to vector<16x32xf32>
    %30 = arith.mulf %25, %29 : vector<16x32xf32>
    %31 = arith.addf %30, %28 : vector<16x32xf32>
    %cst_14 = arith.constant 5.000000e-01 : f32
    %32 = vector.broadcast %cst_14 : f32 to vector<16x32xf32>
    %33 = arith.cmpf oge, %31, %32 : vector<16x32xf32>
    %34 = arith.extui %33 : vector<16x32xi1> to vector<16x32xi32>
    %35 = arith.sitofp %34 : vector<16x32xi32> to vector<16x32xf32>
    %cst_15 = arith.constant 5.000000e-01 : f32
    %36 = vector.broadcast %cst_15 : f32 to vector<16x32xf32>
    %37 = arith.mulf %35, %36 : vector<16x32xf32>
    %38 = arith.subf %31, %37 : vector<16x32xf32>
    %cst_16 = arith.constant 0.818730771 : f32
    %39 = vector.broadcast %cst_16 : f32 to vector<16x32xf32>
    %40 = arith.mulf %28, %39 : vector<16x32xf32>
    %41 = arith.addf %40, %18 : vector<16x32xf32>
    %cst_17 = arith.constant 0.904837429 : f32
    %42 = vector.broadcast %cst_17 : f32 to vector<16x32xf32>
    %43 = arith.mulf %38, %42 : vector<16x32xf32>
    %44 = arith.addf %43, %41 : vector<16x32xf32>
    %cst_18 = arith.constant 5.000000e-01 : f32
    %45 = vector.broadcast %cst_18 : f32 to vector<16x32xf32>
    %46 = arith.cmpf oge, %44, %45 : vector<16x32xf32>
    %47 = arith.extui %46 : vector<16x32xi1> to vector<16x32xi32>
    %48 = arith.sitofp %47 : vector<16x32xi32> to vector<16x32xf32>
    %c0_19 = arith.constant 0 : index
    %c0_20 = arith.constant 0 : index
    %49 = vector.load %arg11[%c0_19, %c0_20] : memref<32x128xf32, #tpu.memory_space<vmem>>, vector<32x128xf32>
    %cst_21 = arith.constant dense<0.000000e+00> : vector<16x128xf32>
    %50 = tpu.matmul %22, %49, %cst_21 {dimension_numbers = #tpu.dot_dimension_numbers<[1], [0], [0], [1], [0, 0, 1, 1], [], []>, precision = #tpu.contract_precision<fp32>} : vector<16x32xf32>, vector<32x128xf32>, vector<16x128xf32> -> vector<16x128xf32>
    %c0_22 = arith.constant 0 : index
    %c0_23 = arith.constant 0 : index
    %51 = vector.load %arg12[%c0_22, %c0_23] : memref<32x128xf32, #tpu.memory_space<vmem>>, vector<32x128xf32>
    %cst_24 = arith.constant dense<0.000000e+00> : vector<16x128xf32>
    %52 = tpu.matmul %35, %51, %cst_24 {dimension_numbers = #tpu.dot_dimension_numbers<[1], [0], [0], [1], [0, 0, 1, 1], [], []>, precision = #tpu.contract_precision<fp32>} : vector<16x32xf32>, vector<32x128xf32>, vector<16x128xf32> -> vector<16x128xf32>
    %c0_25 = arith.constant 0 : index
    %c0_26 = arith.constant 0 : index
    %53 = vector.load %arg12[%c0_25, %c0_26] : memref<32x128xf32, #tpu.memory_space<vmem>>, vector<32x128xf32>
    %cst_27 = arith.constant dense<0.000000e+00> : vector<16x128xf32>
    %54 = tpu.matmul %48, %53, %cst_27 {dimension_numbers = #tpu.dot_dimension_numbers<[1], [0], [0], [1], [0, 0, 1, 1], [], []>, precision = #tpu.contract_precision<fp32>} : vector<16x32xf32>, vector<32x128xf32>, vector<16x128xf32> -> vector<16x128xf32>
    %c0_28 = arith.constant 0 : index
    %c0_29 = arith.constant 0 : index
    %55 = vector.load %arg13[%c0_28, %c0_29] : memref<128x128xf32, #tpu.memory_space<vmem>>, vector<128x128xf32>
    %cst_30 = arith.constant dense<0.000000e+00> : vector<16x128xf32>
    %56 = tpu.matmul %50, %55, %cst_30 {dimension_numbers = #tpu.dot_dimension_numbers<[1], [0], [0], [1], [0, 0, 1, 1], [], []>, precision = #tpu.contract_precision<fp32>} : vector<16x128xf32>, vector<128x128xf32>, vector<16x128xf32> -> vector<16x128xf32>
    %57 = math.sqrt %56 : vector<16x128xf32>
    %cst_31 = arith.constant 9.99999996E-13 : f32
    %58 = vector.broadcast %cst_31 : f32 to vector<16x128xf32>
    %59 = arith.maximumf %57, %58 : vector<16x128xf32>
    %c0_32 = arith.constant 0 : index
    %c0_33 = arith.constant 0 : index
    %60 = vector.load %arg13[%c0_32, %c0_33] : memref<128x128xf32, #tpu.memory_space<vmem>>, vector<128x128xf32>
    %cst_34 = arith.constant dense<0.000000e+00> : vector<16x128xf32>
    %61 = tpu.matmul %52, %60, %cst_34 {dimension_numbers = #tpu.dot_dimension_numbers<[1], [0], [0], [1], [0, 0, 1, 1], [], []>, precision = #tpu.contract_precision<fp32>} : vector<16x128xf32>, vector<128x128xf32>, vector<16x128xf32> -> vector<16x128xf32>
    %62 = math.sqrt %61 : vector<16x128xf32>
    %cst_35 = arith.constant 9.99999996E-13 : f32
    %63 = vector.broadcast %cst_35 : f32 to vector<16x128xf32>
    %64 = arith.maximumf %62, %63 : vector<16x128xf32>
    %65 = arith.divf %50, %59 : vector<16x128xf32>
    %66 = arith.divf %52, %64 : vector<16x128xf32>
    %67 = arith.mulf %65, %66 : vector<16x128xf32>
    %c0_36 = arith.constant 0 : index
    %c0_37 = arith.constant 0 : index
    %68 = vector.load %arg13[%c0_36, %c0_37] : memref<128x128xf32, #tpu.memory_space<vmem>>, vector<128x128xf32>
    %cst_38 = arith.constant dense<0.000000e+00> : vector<16x128xf32>
    %69 = tpu.matmul %67, %68, %cst_38 {dimension_numbers = #tpu.dot_dimension_numbers<[1], [0], [0], [1], [0, 0, 1, 1], [], []>, precision = #tpu.contract_precision<fp32>} : vector<16x128xf32>, vector<128x128xf32>, vector<16x128xf32> -> vector<16x128xf32>
    %cst_39 = arith.constant 0.353553385 : f32
    %70 = vector.broadcast %cst_39 : f32 to vector<16x128xf32>
    %71 = arith.mulf %69, %70 : vector<16x128xf32>
    %72 = math.exp %71 : vector<16x128xf32>
    %c0_40 = arith.constant 0 : index
    %c0_41 = arith.constant 0 : index
    %73 = vector.load %arg14[%c0_40, %c0_41] : memref<128x128xf32, #tpu.memory_space<vmem>>, vector<128x128xf32>
    %cst_42 = arith.constant dense<0.000000e+00> : vector<16x128xf32>
    %74 = tpu.matmul %72, %73, %cst_42 {dimension_numbers = #tpu.dot_dimension_numbers<[1], [0], [0], [1], [0, 0, 1, 1], [], []>, precision = #tpu.contract_precision<fp32>} : vector<16x128xf32>, vector<128x128xf32>, vector<16x128xf32> -> vector<16x128xf32>
    %75 = arith.divf %72, %74 : vector<16x128xf32>
    %76 = arith.mulf %75, %54 : vector<16x128xf32>
    %c0_43 = arith.constant 0 : index
    %c0_44 = arith.constant 0 : index
    %77 = vector.load %arg15[%c0_43, %c0_44] : memref<128x32xf32, #tpu.memory_space<vmem>>, vector<128x32xf32>
    %cst_45 = arith.constant dense<0.000000e+00> : vector<16x32xf32>
    %78 = tpu.matmul %76, %77, %cst_45 {dimension_numbers = #tpu.dot_dimension_numbers<[1], [0], [0], [1], [0, 0, 1, 1], [], []>, precision = #tpu.contract_precision<fp32>} : vector<16x128xf32>, vector<128x32xf32>, vector<16x32xf32> -> vector<16x32xf32>
    %79 = vector.extract_strided_slice %78 {offsets = [0, 0], sizes = [8, 8], strides = [1, 1]} : vector<16x32xf32> to vector<8x8xf32>
    %80 = vector.extract_strided_slice %78 {offsets = [0, 8], sizes = [8, 8], strides = [1, 1]} : vector<16x32xf32> to vector<8x8xf32>
    %81 = vector.extract_strided_slice %78 {offsets = [0, 16], sizes = [8, 8], strides = [1, 1]} : vector<16x32xf32> to vector<8x8xf32>
    %82 = vector.extract_strided_slice %78 {offsets = [0, 24], sizes = [8, 8], strides = [1, 1]} : vector<16x32xf32> to vector<8x8xf32>
    %83 = vector.extract_strided_slice %78 {offsets = [8, 0], sizes = [8, 8], strides = [1, 1]} : vector<16x32xf32> to vector<8x8xf32>
    %84 = vector.extract_strided_slice %78 {offsets = [8, 8], sizes = [8, 8], strides = [1, 1]} : vector<16x32xf32> to vector<8x8xf32>
    %85 = vector.extract_strided_slice %78 {offsets = [8, 16], sizes = [8, 8], strides = [1, 1]} : vector<16x32xf32> to vector<8x8xf32>
    %86 = vector.extract_strided_slice %78 {offsets = [8, 24], sizes = [8, 8], strides = [1, 1]} : vector<16x32xf32> to vector<8x8xf32>
    %87 = tpu.concatenate %79, %80, %81, %82, %83, %84, %85, %86 in 0 : vector<8x8xf32>, vector<8x8xf32>, vector<8x8xf32>, vector<8x8xf32>, vector<8x8xf32>, vector<8x8xf32>, vector<8x8xf32>, vector<8x8xf32> -> vector<64x8xf32>
    %c0_46 = arith.constant 0 : index
    %c0_47 = arith.constant 0 : index
    %88 = vector.load %arg16[%c0_46, %c0_47] : memref<64x64xf32, #tpu.memory_space<vmem>>, vector<64x64xf32>
    %cst_48 = arith.constant dense<0.000000e+00> : vector<64x8xf32>
    %89 = tpu.matmul %88, %87, %cst_48 {dimension_numbers = #tpu.dot_dimension_numbers<[1], [0], [0], [1], [0, 0, 1, 1], [], []>, precision = #tpu.contract_precision<fp32>} : vector<64x64xf32>, vector<64x8xf32>, vector<64x8xf32> -> vector<64x8xf32>
    %90 = vector.extract_strided_slice %89 {offsets = [0, 0], sizes = [16, 8], strides = [1, 1]} : vector<64x8xf32> to vector<16x8xf32>
    %91 = vector.extract_strided_slice %89 {offsets = [16, 0], sizes = [16, 8], strides = [1, 1]} : vector<64x8xf32> to vector<16x8xf32>
    %92 = vector.extract_strided_slice %89 {offsets = [32, 0], sizes = [16, 8], strides = [1, 1]} : vector<64x8xf32> to vector<16x8xf32>
    %93 = vector.extract_strided_slice %89 {offsets = [48, 0], sizes = [16, 8], strides = [1, 1]} : vector<64x8xf32> to vector<16x8xf32>
    %94 = tpu.concatenate %90, %91, %92, %93 in 1 : vector<16x8xf32>, vector<16x8xf32>, vector<16x8xf32>, vector<16x8xf32> -> vector<16x32xf32>
    %c0_49 = arith.constant 0 : index
    %c0_50 = arith.constant 0 : index
    %95 = vector.load %arg5[%c0_49, %c0_50] : memref<32x32xf32, #tpu.memory_space<vmem>>, vector<32x32xf32>
    %cst_51 = arith.constant dense<0.000000e+00> : vector<16x32xf32>
    %96 = tpu.matmul %94, %95, %cst_51 {dimension_numbers = #tpu.dot_dimension_numbers<[1], [0], [0], [1], [0, 0, 1, 1], [], []>, precision = #tpu.contract_precision<fp32>} : vector<16x32xf32>, vector<32x32xf32>, vector<16x32xf32> -> vector<16x32xf32>
    %c0_52 = arith.constant 0 : index
    %c0_53 = arith.constant 0 : index
    %97 = vector.load %arg6[%c0_52, %c0_53] : memref<1x32xf32, #tpu.memory_space<vmem>>, vector<1x32xf32>
    %98 = vector.broadcast %97 : vector<1x32xf32> to vector<16x32xf32>
    %99 = arith.addf %96, %98 : vector<16x32xf32>
    %cst_54 = arith.constant dense<0.000000e+00> : vector<16xf32>
    %100 = vector.multi_reduction <add>, %99, %cst_54 [1] : vector<16x32xf32> to vector<16xf32>
    %101 = vector.shape_cast %100 : vector<16xf32> to vector<16x1xf32>
    %cst_55 = arith.constant 3.200000e+01 : f32
    %102 = vector.broadcast %cst_55 : f32 to vector<16x1xf32>
    %103 = arith.divf %101, %102 : vector<16x1xf32>
    %104 = vector.broadcast %103 : vector<16x1xf32> to vector<16x32xf32>
    %105 = arith.subf %99, %104 : vector<16x32xf32>
    %106 = arith.mulf %105, %105 : vector<16x32xf32>
    %cst_56 = arith.constant dense<0.000000e+00> : vector<16xf32>
    %107 = vector.multi_reduction <add>, %106, %cst_56 [1] : vector<16x32xf32> to vector<16xf32>
    %108 = vector.shape_cast %107 : vector<16xf32> to vector<16x1xf32>
    %cst_57 = arith.constant 3.200000e+01 : f32
    %109 = vector.broadcast %cst_57 : f32 to vector<16x1xf32>
    %110 = arith.divf %108, %109 : vector<16x1xf32>
    %cst_58 = arith.constant 9.99999974E-6 : f32
    %111 = vector.broadcast %cst_58 : f32 to vector<16x1xf32>
    %112 = arith.addf %110, %111 : vector<16x1xf32>
    %113 = math.rsqrt %112 : vector<16x1xf32>
    %114 = vector.broadcast %113 : vector<16x1xf32> to vector<16x32xf32>
    %115 = arith.mulf %105, %114 : vector<16x32xf32>
    %c0_59 = arith.constant 0 : index
    %c0_60 = arith.constant 0 : index
    %116 = vector.load %arg7[%c0_59, %c0_60] : memref<1x32xf32, #tpu.memory_space<vmem>>, vector<1x32xf32>
    %117 = vector.broadcast %116 : vector<1x32xf32> to vector<16x32xf32>
    %118 = arith.mulf %115, %117 : vector<16x32xf32>
    %c0_61 = arith.constant 0 : index
    %c0_62 = arith.constant 0 : index
    %119 = vector.load %arg8[%c0_61, %c0_62] : memref<1x32xf32, #tpu.memory_space<vmem>>, vector<1x32xf32>
    %120 = vector.broadcast %119 : vector<1x32xf32> to vector<16x32xf32>
    %121 = arith.addf %118, %120 : vector<16x32xf32>
    %c0_63 = arith.constant 0 : index
    %c0_64 = arith.constant 0 : index
    %122 = vector.load %arg9[%c0_63, %c0_64] : memref<32x128xf32, #tpu.memory_space<vmem>>, vector<32x128xf32>
    %cst_65 = arith.constant dense<0.000000e+00> : vector<16x128xf32>
    %123 = tpu.matmul %121, %122, %cst_65 {dimension_numbers = #tpu.dot_dimension_numbers<[1], [0], [0], [1], [0, 0, 1, 1], [], []>, precision = #tpu.contract_precision<fp32>} : vector<16x32xf32>, vector<32x128xf32>, vector<16x128xf32> -> vector<16x128xf32>
    %c0_66 = arith.constant 0 : index
    %c0_67 = arith.constant 0 : index
    %124 = vector.load %arg10[%c0_66, %c0_67] : memref<1x128xf32, #tpu.memory_space<vmem>>, vector<1x128xf32>
    %125 = vector.broadcast %124 : vector<1x128xf32> to vector<16x128xf32>
    %126 = arith.addf %123, %125 : vector<16x128xf32>
    %c0_68 = arith.constant 0 : index
    %c0_69 = arith.constant 0 : index
    %127 = vector.load %arg17[%c0_68, %c0_69] : memref<16x128xf32, #tpu.memory_space<vmem>>, vector<16x128xf32>
    tpu.vector_store %arg17[%c0_68, %c0_69], %126 {strides = array<i32>} : memref<16x128xf32, #tpu.memory_space<vmem>>, vector<16x128xf32>,
    return
  }
}

</mosaic_0001>

<bundles_post_ra>
// kernel: forward.1
= control target key start
LH: loop header
LB: loop body
LE: loop exit
PB: predicated region body
PF: predicated region fallthrough
CT: control target
= control target key end

     0   :  { %s15902_s0 = inlined_call_operand.vmem [shape: s32[16,1], index: 0, kind: input, shape index: {}]   ;;  %s15903_s1 = inlined_call_operand.vmem [shape: f32[128,32], index: 1, kind: input, shape index: {}]   ;;  %s15904_s2 = inlined_call_operand.hbm [shape: f32[16,32], index: 2, kind: input, shape index: {}]   ;;  %s15905_s3 = inlined_call_operand.vmem [shape: f32[32,96], index: 3, kind: input, shape index: {}]   ;;  %s15906_s4 = inlined_call_operand.vmem [shape: f32[1,96], index: 4, kind: input, shape index: {}]   ;;  %s15907_s5 = inlined_call_operand.vmem [shape: f32[32,32], index: 5, kind: input, shape index: {}]   ;;  %s15908_s6 = inlined_call_operand.vmem [shape: f32[1,32], index: 6, kind: input, shape index: {}]   ;;  %s15909_s7 = inlined_call_operand.vmem [shape: f32[1,32], index: 7, kind: input, shape index: {}]   ;;  %s15910_s8 = inlined_call_operand.hbm [shape: f32[1,32], index: 8, kind: input, shape index: {}]   ;;  %s15911_s9 = inlined_call_operand.vmem [shape: f32[32,128], index: 9, kind: input, shape index: {}]   ;;  %s15912_s10 = inlined_call_operand.hbm [shape: f32[1,128], index: 10, kind: input, shape index: {}]   ;;  %s15913_s11 = inlined_call_operand.vmem [shape: f32[32,128], index: 11, kind: input, shape index: {}]   ;;  %s15914_s12 = inlined_call_operand.vmem [shape: f32[32,128], index: 12, kind: input, shape index: {}]   ;;  %s15915_s13 = inlined_call_operand.vmem [shape: f32[128,128], index: 13, kind: input, shape index: {}]   ;;  %s15916_s14 = inlined_call_operand.vmem [shape: f32[128,128], index: 14, kind: input, shape index: {}]   ;;  %s15917_s15 = inlined_call_operand.vmem [shape: f32[128,32], index: 15, kind: input, shape index: {}]   ;;  %s15918_s16 = inlined_call_operand.vmem [shape: f32[64,64], index: 16, kind: input, shape index: {}]   ;;  %s15919_s17 = inlined_call_operand.hbm [shape: f32[16,128], index: 17, kind: output, shape index: {}]  }
   0x1   :  { %15951 = sst [smem:[#allocation12_spill]] %s15902_s0 }
   0x2   :  { %15952 = sst [smem:[#allocation13_spill]] %s15903_s1 }
   0x3   :  { %22 = vsyncpa [#allocation3], 0 }
   0x4   :  { %23 = vsyncpa [#allocation6], 0 }
   0x5   :  { %24 = vsyncpa [#allocation4], 0  ;;  %s13288_s24 = smov [#allocation5]   ;;  %s13289_s26 = smov [#allocation2]  }
   0x6   :  { %s57_s25 = sshll.u32 %s13288_s24, 4  ;;  %s34_s27 = sshll.u32 %s13289_s26, 4  ;;  %s58_s25 = int_to_ptr.vmem [resolvable:$true] %s57_s25  ;;  %s13394_s27 = int_to_ptr.vmem [resolvable:$true] %s34_s27 }
   0x7   :  { %s13194_s0 = scalar_lea.hbm %s15910_s8, 16 }
   0x8   :  { %p13195_p0 = scmp.ne.s32.totalorder %s15910_s8, %s13194_s0  ;;  %p13198_p1 = scmp.lt.u32.totalorder %s13194_s0, %s15910_s8 }
   0xa   :  { %p13200_p2 = pnand %p13198_p1, %p13195_p0 }
   0xc   :  { %13203 = shalt.err (!%p13200_p2)
}
   0xd   :  { %s13204_s20 = scalar_lea.vmem %s58_s25, 16  ;;  %s13208_s21 = scalar_lea.vmem %s58_s25, 32 }
   0xe   :  { %p13205_p3 = scmp.ne.s32.totalorder %s58_s25, %s13204_s20  ;;  %p13209_p4 = scmp.lt.s32.totalorder %s58_s25, %s58_s25 }
   0xf   :  { %p13210_p5 = scmp.lt.s32.totalorder %s13208_s21, %s13204_s20 }
  0x11   :  { %p13211_p6 = por %p13210_p5, %p13209_p4 }
  0x13   :  { %p13212_p7 = pnand %p13211_p6, %p13205_p3 }
  0x15   :  { %13215 = shalt.err (!%p13212_p7)
}
  0x16   :  { %60 = dma.hbm_to_vmem [thread:$0]  %s15910_s8, 16, %s58_s25, [#allocation6]  }
  0x17   :  { %s13216_s28 = scalar_lea.hbm %s15904_s2, 256 }
  0x18   :  { %p13217_p8 = scmp.ne.s32.totalorder %s15904_s2, %s13216_s28  ;;  %p13220_p9 = scmp.lt.u32.totalorder %s13216_s28, %s15904_s2 }
  0x1a   :  { %p13222_p10 = pnand %p13220_p9, %p13217_p8 }
  0x1c   :  { %13225 = shalt.err (!%p13222_p10)
}
  0x1d   :  { %s13226_s19 = scalar_lea.vmem %s13394_s27, 256  ;;  %p13231_p12 = scmp.lt.s32.totalorder %s13394_s27, %s13394_s27 }
  0x1e   :  { %p13227_p11 = scmp.ne.s32.totalorder %s13394_s27, %s13226_s19  ;;  %p13232_p13 = scmp.lt.s32.totalorder %s13226_s19, %s13226_s19 }
  0x20   :  { %p13233_p0 = por %p13232_p13, %p13231_p12 }
  0x22   :  { %p13234_p1 = pnand %p13233_p0, %p13227_p11 }
  0x24   :  { %13237 = shalt.err (!%p13234_p1)
}
  0x25   :  { %s13290_s8 = smov 128   ;;  %s13291_s25 = smov 8  }
  0x26   :  { %40 = dma.hbm_to_vmem [thread:$0]  %s15904_s2, 256, %s13394_s27, [#allocation3], %s13290_s8, %s13290_s8, %s13291_s25  }
  0x27   :  { %s13292_s21 = smov [#allocation7]   ;;  %s13238_s26 = scalar_lea.hbm %s15912_s10, 16 }
  0x28   :  { %s69_s22 = sshll.u32 %s13292_s21, 4  ;;  %p13239_p2 = scmp.ne.s32.totalorder %s15912_s10, %s13238_s26  ;;  %s70_s22 = int_to_ptr.vmem [resolvable:$true] %s69_s22 }
  0x29   :  { %p13242_p3 = scmp.lt.u32.totalorder %s13238_s26, %s15912_s10 }
  0x2b   :  { %p13244_p4 = pnand %p13242_p3, %p13239_p2 }
  0x2d   :  { %13247 = shalt.err (!%p13244_p4)
}
  0x2e   :  { %s13248_s18 = scalar_lea.vmem %s70_s22, 16  ;;  %s13252_s2 = scalar_lea.vmem %s70_s22, 32 }
  0x2f   :  { %p13249_p5 = scmp.ne.s32.totalorder %s70_s22, %s13248_s18  ;;  %p13253_p6 = scmp.lt.s32.totalorder %s70_s22, %s70_s22 }
  0x30   :  { %p13254_p7 = scmp.lt.s32.totalorder %s13252_s2, %s13248_s18 }
  0x32   :  { %p13255_p8 = por %p13254_p7, %p13253_p6 }
  0x34   :  { %p13256_p9 = pnand %p13255_p8, %p13249_p5 }
  0x36   :  { %13259 = shalt.err (!%p13256_p9)
}
  0x37   :  { %72 = dma.hbm_to_vmem [thread:$0]  %s15912_s10, 16, %s70_s22, [#allocation6]  }
  0x38   :  { %13282 = dma.done.wait [#allocation3], 256  }
  0x39   :  { %13283 = vsyncadd [#allocation3], 4294967040 }
  0x3a   :  { %13284 = dma.done.wait [#allocation6], 32  }
  0x3b   :  { %13285 = vsyncadd [#allocation6], 4294967264  ;;  %v13293_v0 = vmov 0   ;;  %s15953_s21 = sld [smem:[#allocation12_spill]]  ;;  %s15954_s26 = sld [smem:[#allocation13_spill]]  ;;  %vm822_vm2 = vcmask 261120  }
  0x3c   :  { %13165 = vset.pattern.permute.xlu0 %v13293_v0  ;;  %s13297_s30 = smov 96   ;;  %s13299_s22 = smov 120  }
  0x3d   :  { %s13300_s0 = smov 104  }
  0x41   :  { %v94_v1 = vld [vmem:[%s15953_s21] sm:$0xff]  ;;  %v111_v3 = vld [vmem:[%s15954_s26 + $0x8] sm:$0xff]  ;;  %v112_v5 = vld [vmem:[%s15954_s26 + $0x10] sm:$0xff] }
  0x42   :  { %v110_v2 = vld [vmem:[%s15954_s26] sm:$0xff]  ;;  %99 = vperm.xlu0 %13165, %v94_v1   ;;  %v113_v6 = vld [vmem:[%s15954_s26 + $0x18] sm:$0xff]  ;;  %v95_v7 = vld [vmem:[%s15953_s21 + $0x8] sm:$0xff]  ;;  %v131_v8 = vand.u32 4294901760, %v111_v3  ;;  %v134_v9 = vand.u32 4294901760, %v112_v5 }
  0x43   :  { %v128_v4 = vand.u32 4294901760, %v110_v2  ;;  %v137_v10 = vand.u32 4294901760, %v113_v6  ;;  %v114_v11 = vld [vmem:[%s15954_s26 + $0x20] sm:$0xff]  ;;  %v115_v12 = vld [vmem:[%s15954_s26 + $0x28] sm:$0xff]  ;;  %v116_v17 = vld [vmem:[%s15954_s26 + $0x30] sm:$0xff] }
  0x44   :  { %v140_v15 = vand.u32 4294901760, %v114_v11  ;;  %v143_v16 = vand.u32 4294901760, %v115_v12  ;;  %v117_v18 = vld [vmem:[%s15954_s26 + $0x38] sm:$0xff]  ;;  %v146_v20 = vand.u32 4294901760, %v116_v17  ;;  %v118_v22 = vld [vmem:[%s15954_s26 + $0x40] sm:$0xff]  ;;  %v119_v23 = vld [vmem:[%s15954_s26 + $0x48] sm:$0xff]  ;;  %v13485_v24 = vsub.f32 %v112_v5, %v134_v9 }
  0x45   :  { %v13464_v13 = vpack.c.bf16 %v131_v8, %v128_v4  ;;  %v13466_v14 = vpack.c.bf16 %v137_v10, %v134_v9  ;;  %v149_v21 = vand.u32 4294901760, %v117_v18  ;;  %v13487_v25 = vsub.f32 %v113_v6, %v137_v10  ;;  %v120_v26 = vld [vmem:[%s15954_s26 + $0x50] sm:$0xff]  ;;  %v121_v32 = vld [vmem:[%s15954_s26 + $0x58] sm:$0xff]  ;;  %v122_v39 = vld [vmem:[%s15954_s26 + $0x60] sm:$0xff] }
  0x46   :  { %102 = vperm.xlu0 %13165, %v95_v7   ;;  %v13477_v19 = vpack.c.bf16 %v143_v16, %v140_v15  ;;  %v245_v27 = vand.u32 4294901760, %v13485_v24  ;;  %v152_v30 = vand.u32 4294901760, %v118_v22  ;;  %v155_v31 = vand.u32 4294901760, %v119_v23  ;;  %v123_v44 = vld [vmem:[%s15954_s26 + $0x68] sm:$0xff]  ;;  %v124_v55 = vld [vmem:[%s15954_s26 + $0x70] sm:$0xff]  ;;  %v125_v63 = vld [vmem:[%s15954_s26 + $0x78] sm:$0xff] }
  0x47   :  { %11446 = vmatprep.subr.bf16.mxu0 %v13464_v13  ;;  %v252_v28 = vand.u32 4294901760, %v13487_v25  ;;  %v13496_v29 = vpack.c.bf16 %v149_v21, %v146_v20  ;;  %v13507_v35 = vsub.f32 %v114_v11, %v140_v15  ;;  %v158_v36 = vand.u32 4294901760, %v120_v26 }
  0x48   :  { %11448 = vmatpush3.bf16.msra.mxu0 %v13464_v13  ;;  %v246_v33 = vsub.f32 %v13485_v24, %v245_v27  ;;  %v13509_v37 = vsub.f32 %v115_v12, %v143_v16  ;;  %v161_v38 = vand.u32 4294901760, %v121_v32  ;;  %v13517_v43 = vpack.c.bf16 %v155_v31, %v152_v30 }
  0x49   :  { %11450 = vmatprep.subr.bf16.mxu0 %v13466_v14  ;;  %v253_v34 = vsub.f32 %v13487_v25, %v252_v28  ;;  %v259_v42 = vand.u32 4294901760, %v13507_v35  ;;  %v13522_v45 = vsub.f32 %v110_v2, %v128_v4  ;;  %v13524_v46 = vsub.f32 %v111_v3, %v131_v8 }
  0x4a   :  { %v247_v40 = vand.u32 4294901760, %v246_v33  ;;  %v266_v47 = vand.u32 4294901760, %v13509_v37  ;;  %v13532_v50 = vsub.f32 %v116_v17, %v146_v20  ;;  %v13534_v51 = vsub.f32 %v117_v18, %v149_v21 }
  0x4b   :  { %v254_v41 = vand.u32 4294901760, %v253_v34  ;;  %v260_v49 = vsub.f32 %v13507_v35, %v259_v42  ;;  %v164_v52 = vand.u32 4294901760, %v122_v39  ;;  %v167_v54 = vand.u32 4294901760, %v123_v44 }
  0x4c   :  { %11452 = vmatpush3.bf16.msra.mxu0 %v13466_v14  ;;  %v267_v53 = vsub.f32 %v13509_v37, %v266_v47  ;;  %v273_v57 = vand.u32 4294901760, %v13532_v50  ;;  %v280_v58 = vand.u32 4294901760, %v13534_v51  ;;  %v13546_v59 = vpack.c.bf16 %v161_v38, %v158_v36 }
  0x4d   :  { %11454 = vmatprep.subr.bf16.mxu0 %v13477_v19  ;;  %v13527_v48 = vpack.c.bf16 %v254_v41, %v247_v40  ;;  %v261_v56 = vand.u32 4294901760, %v260_v49  ;;  %v231_v60 = vand.u32 4294901760, %v13522_v45  ;;  %v238_v61 = vand.u32 4294901760, %v13524_v46 }
  0x4e   :  { %v268_v62 = vand.u32 4294901760, %v267_v53  ;;  %v274_v0 = vsub.f32 %v13532_v50, %v273_v57  ;;  %v281_v1 = vsub.f32 %v13534_v51, %v280_v58  ;;  %v13559_v2 = vsub.f32 %v118_v22, %v152_v30 }
  0x4f   :  { %v13561_v3 = vsub.f32 %v119_v23, %v155_v31  ;;  %v170_v4 = vand.u32 4294901760, %v124_v55  ;;  %v13569_v10 = vpack.c.bf16 %v167_v54, %v164_v52  ;;  %v173_v11 = vand.u32 4294901760, %v125_v63 }
  0x50   :  { %11456 = vmatpush3.bf16.msra.mxu0 %v13477_v19  ;;  %v13563_v5 = vpack.c.bf16 %v268_v62, %v261_v56  ;;  %v275_v6 = vand.u32 4294901760, %v274_v0  ;;  %v282_v7 = vand.u32 4294901760, %v281_v1  ;;  %v287_v8 = vand.u32 4294901760, %v13559_v2 }
  0x51   :  { %11458 = vmatprep.subr.bf16.mxu0 %v13496_v29  ;;  %v294_v9 = vand.u32 4294901760, %v13561_v3  ;;  %v232_v12 = vsub.f32 %v13522_v45, %v231_v60  ;;  %v239_v15 = vsub.f32 %v13524_v46, %v238_v61  ;;  %v13585_v20 = vsub.f32 %v120_v26, %v158_v36 }
  0x52   :  { %v13577_v16 = vpack.c.bf16 %v282_v7, %v275_v6  ;;  %v288_v17 = vsub.f32 %v13559_v2, %v287_v8  ;;  %v13587_v21 = vsub.f32 %v121_v32, %v161_v38  ;;  %v13592_v31 = vpack.c.bf16 %v173_v11, %v170_v4 }
  0x53   :  { %v295_v18 = vsub.f32 %v13561_v3, %v294_v9  ;;  %v15927_v30 = vand.u32 4294901760, %v13585_v20  ;;  %v233_v33 = vand.u32 4294901760, %v232_v12  ;;  %v240_v34 = vand.u32 4294901760, %v239_v15 }
  0x54   :  { %11460 = vmatpush3.bf16.msra.mxu0 %v13496_v29  ;;  %v289_v22 = vand.u32 4294901760, %v288_v17  ;;  %v15926_v40 = vand.u32 4294901760, %v13587_v21  ;;  %v13600_v32 = vsub.f32 %v122_v39, %v164_v52  ;;  %v13602_v36 = vsub.f32 %v123_v44, %v167_v54 }
  0x55   :  { %11462 = vmatprep.subr.bf16.mxu0 %v13517_v43  ;;  %v296_v23 = vand.u32 4294901760, %v295_v18  ;;  %v302_v26 = vsub.f32 %v13585_v20, %v15927_v30  ;;  %v11477_v62 = vpack.c.bf16 %v240_v34, %v233_v33  ;;  %v13617_v52 = vsub.f32 %v124_v55, %v170_v4 }
  0x56   :  { %v309_v38 = vsub.f32 %v13587_v21, %v15926_v40  ;;  %v15925_v53 = vand.u32 4294901760, %v13600_v32  ;;  %v15924_v56 = vand.u32 4294901760, %v13602_v36  ;;  %v13619_v54 = vsub.f32 %v125_v63, %v173_v11 }
  0x57   :  { %v13595_v41 = vpack.c.bf16 %v296_v23, %v289_v22  ;;  %v303_v49 = vand.u32 4294901760, %v302_v26  ;;  %v15923_v12 = vand.u32 4294901760, %v13617_v52  ;;  %v11509_v22 = vpack.c.bf16 %v13524_v46, %v13522_v45 }
  0x58   :  { %11464 = vmatpush3.bf16.msra.mxu0 %v13517_v43  ;;  %v310_v0 = vand.u32 4294901760, %v309_v38  ;;  %v316_v39 = vsub.f32 %v13600_v32, %v15925_v53  ;;  %v323_v44 = vsub.f32 %v13602_v36, %v15924_v56  ;;  %v15922_v15 = vand.u32 4294901760, %v13619_v54 }
  0x59   :  { %11466 = vmatprep.subr.bf16.mxu0 %v13546_v59  ;;  %v330_v18 = vsub.f32 %v13617_v52, %v15923_v12  ;;  %v11513_v23 = vpack.c.bf16 %v13487_v25, %v13485_v24  ;;  %v11517_v33 = vpack.c.bf16 %v13509_v37, %v13507_v35  ;;  %v11521_v34 = vpack.c.bf16 %v13534_v51, %v13532_v50 }
  0x5a   :  { %v11497_v1 = vpack.c.bf16 %v310_v0, %v303_v49  ;;  %v317_v6 = vand.u32 4294901760, %v316_v39  ;;  %v324_v7 = vand.u32 4294901760, %v323_v44  ;;  %v337_v55 = vsub.f32 %v13619_v54, %v15922_v15 }
  0x5b   :  { %v331_v63 = vand.u32 4294901760, %v330_v18  ;;  %v11525_v26 = vpack.c.bf16 %v13561_v3, %v13559_v2  ;;  %v11529_v38 = vpack.c.bf16 %v13587_v21, %v13585_v20  ;;  %v11533_v49 = vpack.c.bf16 %v13602_v36, %v13600_v32 }
  0x5c   :  { %11468 = vmatpush3.bf16.msra.mxu0 %v13546_v59  ;;  %v11501_v17 = vpack.c.bf16 %v324_v7, %v317_v6  ;;  %v338_v4 = vand.u32 4294901760, %v337_v55  ;;  %v11537_v0 = vpack.c.bf16 %v13619_v54, %v13617_v52  ;;  %v96_v39 = vlaneseq }
  0x5d   :  { %11470 = vmatprep.subr.bf16.mxu0 %v13569_v10  ;;  %v13294_v7 = vmov 0.0   ;;  %v13295_v30 = vmov 1.0   ;;  %v11581_v45 = vpack.c.bf16 %v266_v47, %v259_v42  ;;  %v11585_v24 = vpack.c.bf16 %v280_v58, %v273_v57 }
  0x5e   :  { %v11505_v11 = vpack.c.bf16 %v338_v4, %v331_v63  ;;  %v13646_v44 = vand.u32 127, %v96_v39  ;;  %v11589_v25 = vpack.c.bf16 %v294_v9, %v287_v8  ;;  %v15957_v37 = vand.u32 4294901760, %v13600_v32 }
  0x5f   :  { %v15958_v42 = vand.u32 4294901760, %v13602_v36  ;;  %v15959_v47 = vand.u32 4294901760, %v13617_v52  ;;  %v15960_v50 = vand.u32 4294901760, %v13619_v54 }
  0x60   :  { %11472 = vmatpush3.bf16.msra.mxu0 %v13569_v10 }
  0x61   :  { %11474 = vmatprep.subr.bf16.mxu0 %v13592_v31  ;;  %v11597_v46 = vpack.c.bf16 %v15958_v42, %v15957_v37  ;;  %v11601_v51 = vpack.c.bf16 %v15960_v50, %v15959_v47  ;;  %v1416_v37 = vld [vmem:[%s15913_s11 + $0x18] sm:$0xff] }
  0x64   :  { %11476 = vmatpush3.bf16.msra.mxu0 %v13592_v31 }
  0x65   :  { %11478 = vmatprep.subr.bf16.mxu0 %v11477_v62 }
  0xc1   :  { %v13648_v6 = vpop.permute.xlu0 %99 }
  0xc2   :  { %vm104_vm0 = vcmp.eq.s32.totalorder %v13646_v44, %v13648_v6 }
  0xc3   :  { %v8624_v18 = vsel %vm104_vm0, 1.0, %v13294_v7 }
  0xc4   :  { %v209_v55 = vsub.f32 %v8624_v18, %v8624_v18 }
  0xc5   :  { %v13656_v63 = vpop.permute.xlu0 %102 }
  0xc6   :  { %vm105_vm1 = vcmp.eq.s32.totalorder %v13646_v44, %v13656_v63  ;;  %v210_v4 = vand.u32 4294901760, %v209_v55 }
  0xc7   :  { %v8625_v39 = vsel %vm105_vm1, 1.0, %v13294_v7 }
  0xc8   :  { %v13664_v15 = vsub.f32 %v8625_v39, %v8625_v39  ;;  %v211_v12 = vsub.f32 %v209_v55, %v210_v4 }
  0xca   :  { %v212_v56 = vand.u32 4294901760, %v211_v12  ;;  %v220_v53 = vand.u32 4294901760, %v13664_v15 }
  0xcc   :  { %9653 = vmatprep.mubr.f32.mxu0 %v212_v56  ;;  %v221_v18 = vsub.f32 %v13664_v15, %v220_v53 }
  0xce   :  { %v222_v40 = vand.u32 4294901760, %v221_v18 }
  0xd0   :  { %9654 = vmatmul.mubr.f32.vlgmr.msra.gmra.mrb[0].mxu0 %v222_v40 }
  0xd1   :  { %11480 = vmatpush3.bf16.msra.mxu0 %v11477_v62  ;;  %9688 = vmatprep.mubr.msk.f32.mxu0 %vm104_vm0, %v13295_v30 }
  0xd2   :  { %11482 = vmatprep.subr.bf16.mxu0 %v13527_v48 }
  0xd5   :  { %11484 = vmatpush3.bf16.msra.mxu0 %v13527_v48  ;;  %v11573_v48 = vpack.c.bf16 %v238_v61, %v231_v60  ;;  %v814_v60 = vld [vmem:[%s15905_s3 + $0x18] sm:$0xff] }
  0xd6   :  { %11486 = vmatprep.subr.bf16.mxu0 %v13563_v5  ;;  %v839_v2 = vand.u32 4294901760, %v814_v60 }
  0xd9   :  { %11488 = vmatpush3.bf16.msra.mxu0 %v13563_v5  ;;  %v11577_v5 = vpack.c.bf16 %v252_v28, %v245_v27  ;;  %v15955_v27 = vand.u32 4294901760, %v13585_v20  ;;  %v15956_v28 = vand.u32 4294901760, %v13587_v21  ;;  %v941_v21 = vsub.f32 %v814_v60, %v839_v2 }
  0xda   :  { %11490 = vmatprep.subr.bf16.mxu0 %v13577_v16 }
  0xdb   :  { %v11593_v35 = vpack.c.bf16 %v15956_v28, %v15955_v27 }
  0xdd   :  { %11492 = vmatpush3.bf16.msra.mxu0 %v13577_v16 }
  0xde   :  { %11494 = vmatprep.subr.bf16.mxu0 %v13595_v41 }
  0xe1   :  { %11496 = vmatpush3.bf16.msra.mxu0 %v13595_v41  ;;  %v942_v41 = vand.u32 4294901760, %v941_v21 }
  0xe2   :  { %11498 = vmatprep.subr.bf16.mxu0 %v11497_v1 }
  0xe5   :  { %11500 = vmatpush3.bf16.msra.mxu0 %v11497_v1 }
  0xe6   :  { %11502 = vmatprep.subr.bf16.mxu0 %v11501_v17 }
  0xe9   :  { %11504 = vmatpush3.bf16.msra.mxu0 %v11501_v17  ;;  %v126_v17 = vld [vmem:[#allocation2] sm:$0xff] }
  0xea   :  { %11506 = vmatprep.subr.bf16.mxu0 %v11505_v11 }
  0xed   :  { %11508 = vmatpush3.bf16.msra.mxu0 %v11505_v11 }
  0xee   :  { %11510 = vmatprep.subr.bf16.mxu0 %v11509_v22 }
  0xf0   :  { %9689 = vmatmul.mubr.msk.f32.vlgmr.msra.gmra.mrb[0].mxu0 %vm105_vm1, %v13295_v30 }
  0xf1   :  { %11512 = vmatpush3.bf16.msra.mxu0 %v11509_v22  ;;  %9723 = vmatprep.mubr.f32.mxu0 %v209_v55 }
  0xf2   :  { %11514 = vmatprep.subr.bf16.mxu0 %v11513_v23 }
  0xf5   :  { %11516 = vmatpush3.bf16.msra.mxu0 %v11513_v23 }
  0xf6   :  { %11518 = vmatprep.subr.bf16.mxu0 %v11517_v33 }
  0xf9   :  { %11520 = vmatpush3.bf16.msra.mxu0 %v11517_v33 }
  0xfa   :  { %11522 = vmatprep.subr.bf16.mxu0 %v11521_v34 }
  0xfd   :  { %11524 = vmatpush3.bf16.msra.mxu0 %v11521_v34 }
  0xfe   :  { %11526 = vmatprep.subr.bf16.mxu0 %v11525_v26 }
 0x101   :  { %11528 = vmatpush3.bf16.msra.mxu0 %v11525_v26 }
 0x102   :  { %11530 = vmatprep.subr.bf16.mxu0 %v11529_v38 }
 0x105   :  { %11532 = vmatpush3.bf16.msra.mxu0 %v11529_v38 }
 0x106   :  { %11534 = vmatprep.subr.bf16.mxu0 %v11533_v49 }
 0x109   :  { %11536 = vmatpush3.bf16.msra.mxu0 %v11533_v49 }
 0x10a   :  { %11538 = vmatprep.subr.bf16.mxu0 %v11537_v0 }
 0x10d   :  { %11540 = vmatpush3.bf16.msra.mxu0 %v11537_v0 }
 0x10e   :  { %11542 = vmatprep.subr.bf16.mxu0 %v13464_v13 }
 0x110   :  { %9724 = vmatmul.mubr.f32.vlgmr.msra.gmra.mrb[0].mxu0 %v13664_v15 }
 0x111   :  { %11544 = vmatpush3.bf16.msra.mxu0 %v13464_v13  ;;  %9758 = vmatprep.mubr.f32.mxu0 %v210_v4 }
 0x112   :  { %11546 = vmatprep.subr.bf16.mxu0 %v13466_v14 }
 0x115   :  { %11548 = vmatpush3.bf16.msra.mxu0 %v13466_v14 }
 0x116   :  { %11550 = vmatprep.subr.bf16.mxu0 %v13477_v19 }
 0x119   :  { %11552 = vmatpush3.bf16.msra.mxu0 %v13477_v19 }
 0x11a   :  { %11554 = vmatprep.subr.bf16.mxu0 %v13496_v29 }
 0x11d   :  { %11556 = vmatpush3.bf16.msra.mxu0 %v13496_v29 }
 0x11e   :  { %11558 = vmatprep.subr.bf16.mxu0 %v13517_v43 }
 0x121   :  { %11560 = vmatpush3.bf16.msra.mxu0 %v13517_v43 }
 0x122   :  { %11562 = vmatprep.subr.bf16.mxu0 %v13546_v59 }
 0x125   :  { %11564 = vmatpush3.bf16.msra.mxu0 %v13546_v59 }
 0x126   :  { %11566 = vmatprep.subr.bf16.mxu0 %v13569_v10 }
 0x129   :  { %11568 = vmatpush3.bf16.msra.mxu0 %v13569_v10 }
 0x12a   :  { %11570 = vmatprep.subr.bf16.mxu0 %v13592_v31 }
 0x12d   :  { %11572 = vmatpush3.bf16.msra.mxu0 %v13592_v31 }
 0x12e   :  { %11574 = vmatprep.subr.bf16.mxu0 %v11573_v48 }
 0x130   :  { %9759 = vmatmul.mubr.f32.vlgmr.msra.gmra.mrb[0].mxu0 %v220_v53  ;;  %v943_v53 = vsub.f32 %v941_v21, %v942_v41 }
 0x131   :  { %11576 = vmatpush3.bf16.msra.mxu0 %v11573_v48  ;;  %9793 = vmatprep.mubr.msk.f32.mxu0 %vm104_vm0, %v13295_v30  ;;  %v1413_v48 = vld [vmem:[%s15913_s11] sm:$0xff] }
 0x132   :  { %11578 = vmatprep.subr.bf16.mxu0 %v11577_v5  ;;  %v944_v62 = vand.u32 4294901760, %v943_v53 }
 0x135   :  { %11580 = vmatpush3.bf16.msra.mxu0 %v11577_v5  ;;  %v1414_v5 = vld [vmem:[%s15913_s11 + $0x8] sm:$0xff] }
 0x136   :  { %11582 = vmatprep.subr.bf16.mxu0 %v11581_v45 }
 0x139   :  { %11584 = vmatpush3.bf16.msra.mxu0 %v11581_v45  ;;  %v1424_v45 = vand.u32 4294901760, %v1413_v48 }
 0x13a   :  { %11586 = vmatprep.subr.bf16.mxu0 %v11585_v24 }
 0x13b   :  { %v1514_v27 = vsub.f32 %v1413_v48, %v1424_v45 }
 0x13d   :  { %11588 = vmatpush3.bf16.msra.mxu0 %v11585_v24  ;;  %v1427_v24 = vand.u32 4294901760, %v1414_v5  ;;  %v1515_v47 = vand.u32 4294901760, %v1514_v27 }
 0x13e   :  { %11590 = vmatprep.subr.bf16.mxu0 %v11589_v25 }
 0x13f   :  { %v1521_v28 = vsub.f32 %v1414_v5, %v1427_v24 }
 0x141   :  { %11592 = vmatpush3.bf16.msra.mxu0 %v11589_v25  ;;  %v13801_v25 = vpack.c.bf16 %v1427_v24, %v1424_v45  ;;  %v1522_v50 = vand.u32 4294901760, %v1521_v28 }
 0x142   :  { %11594 = vmatprep.subr.bf16.mxu0 %v11593_v35 }
 0x145   :  { %11596 = vmatpush3.bf16.msra.mxu0 %v11593_v35  ;;  %v1415_v35 = vld [vmem:[%s15913_s11 + $0x10] sm:$0xff] }
 0x146   :  { %11598 = vmatprep.subr.bf16.mxu0 %v11597_v46  ;;  %v1430_v42 = vand.u32 4294901760, %v1415_v35 }
 0x149   :  { %11600 = vmatpush3.bf16.msra.mxu0 %v11597_v46  ;;  %v1433_v46 = vand.u32 4294901760, %v1416_v37 }
 0x14a   :  { %11602 = vmatprep.subr.bf16.mxu0 %v11601_v51 }
 0x14d   :  { %11604 = vmatpush3.bf16.msra.mxu0 %v11601_v51  ;;  %v13811_v51 = vpack.c.bf16 %v1433_v46, %v1430_v42 }
 0x14e   :  { %11606 = vmatprep.subr.bf16.mxu0 %v13464_v13 }
 0x150   :  { %9794 = vmatmul.mubr.msk.f32.vlgmr.msra.gmra.mrb[0].mxu0 %vm105_vm1, %v13295_v30 }
 0x151   :  { %11608 = vmatpush3.bf16.msra.mxu0 %v13464_v13  ;;  %9828 = vmatprep.mubr.msk.f32.mxu0 %vm104_vm0, %v13295_v30  ;;  %v811_v13 = vld [vmem:[%s15905_s3] sm:$0xff] }
 0x152   :  { %11610 = vmatprep.subr.bf16.mxu0 %v13466_v14 }
 0x155   :  { %11612 = vmatpush3.bf16.msra.mxu0 %v13466_v14  ;;  %v812_v14 = vld [vmem:[%s15905_s3 + $0x8] sm:$0xff] }
 0x156   :  { %11614 = vmatprep.subr.bf16.mxu0 %v13477_v19 }
 0x159   :  { %11616 = vmatpush3.bf16.msra.mxu0 %v13477_v19  ;;  %v830_v19 = vand.u32 4294901760, %v811_v13 }
 0x15a   :  { %11618 = vmatprep.subr.bf16.mxu0 %v13496_v29 }
 0x15b   :  { %v920_v57 = vsub.f32 %v811_v13, %v830_v19  ;;  %v1516_v13 = vsub.f32 %v1514_v27, %v1515_v47 }
 0x15d   :  { %11620 = vmatpush3.bf16.msra.mxu0 %v13496_v29  ;;  %v833_v29 = vand.u32 4294901760, %v812_v14  ;;  %v921_v3 = vand.u32 4294901760, %v920_v57 }
 0x15e   :  { %11622 = vmatprep.subr.bf16.mxu0 %v13517_v43 }
 0x15f   :  { %v927_v58 = vsub.f32 %v812_v14, %v833_v29  ;;  %v1523_v14 = vsub.f32 %v1521_v28, %v1522_v50 }
 0x161   :  { %11624 = vmatpush3.bf16.msra.mxu0 %v13517_v43  ;;  %v13771_v43 = vpack.c.bf16 %v833_v29, %v830_v19  ;;  %v928_v8 = vand.u32 4294901760, %v927_v58  ;;  %v11653_v54 = vpack.c.bf16 %v927_v58, %v920_v57  ;;  %v1528_v19 = vsub.f32 %v1415_v35, %v1430_v42 }
 0x162   :  { %11626 = vmatprep.subr.bf16.mxu0 %v13546_v59  ;;  %v1535_v29 = vsub.f32 %v1416_v37, %v1433_v46 }
 0x163   :  { %11638 = vmatprep.subr.bf16.mxu1 %v13771_v43  ;;  %v929_v16 = vsub.f32 %v927_v58, %v928_v8  ;;  %v11669_v12 = vpack.c.bf16 %v928_v8, %v921_v3  ;;  %v1529_v58 = vand.u32 4294901760, %v1528_v19 }
 0x164   :  { %11640 = vmatpush3.bf16.msra.mxu1 %v13771_v43 }
 0x165   :  { %11628 = vmatpush3.bf16.msra.mxu0 %v13546_v59  ;;  %v813_v59 = vld [vmem:[%s15905_s3 + $0x10] sm:$0xff] }
 0x166   :  { %11630 = vmatprep.subr.bf16.mxu0 %v13569_v10  ;;  %v836_v61 = vand.u32 4294901760, %v813_v59 }
 0x168   :  { %v13781_v9 = vpack.c.bf16 %v839_v2, %v836_v61  ;;  %v934_v20 = vsub.f32 %v813_v59, %v836_v61  ;;  %v1536_v59 = vand.u32 4294901760, %v1535_v29  ;;  %v1530_v61 = vsub.f32 %v1528_v19, %v1529_v58 }
 0x169   :  { %11632 = vmatpush3.bf16.msra.mxu0 %v13569_v10  ;;  %v922_v10 = vsub.f32 %v920_v57, %v921_v3  ;;  %v1524_v57 = vand.u32 4294901760, %v1523_v14 }
 0x16a   :  { %11634 = vmatprep.subr.bf16.mxu0 %v13592_v31  ;;  %11642 = vmatprep.subr.bf16.mxu1 %v13781_v9  ;;  %v935_v40 = vand.u32 4294901760, %v934_v20  ;;  %v11657_v1 = vpack.c.bf16 %v941_v21, %v934_v20  ;;  %v1537_v2 = vsub.f32 %v1535_v29, %v1536_v59  ;;  %v1531_v3 = vand.u32 4294901760, %v1530_v61  ;;  %v13941_v61 = vld [vmem:[%s15915_s13 + $0x8] sm:$0xff] }
 0x16b   :  { %11644 = vmatpush3.bf16.msra.mxu1 %v13781_v9  ;;  %v13819_v21 = vpack.c.bf16 %v1536_v59, %v1529_v58 }
 0x16c   :  { %v936_v36 = vsub.f32 %v934_v20, %v935_v40  ;;  %v11673_v15 = vpack.c.bf16 %v942_v41, %v935_v40  ;;  %v1538_v8 = vand.u32 4294901760, %v1537_v2  ;;  %v13817_v20 = vpack.c.bf16 %v1522_v50, %v1515_v47  ;;  %v13827_v40 = vld [vmem:[%s15914_s12 + $0x10] sm:$0xff]  ;;  %v13832_v41 = vld [vmem:[%s15914_s12 + $0x18] sm:$0xff] }
 0x16d   :  { %11636 = vmatpush3.bf16.msra.mxu0 %v13592_v31  ;;  %v930_v31 = vand.u32 4294901760, %v929_v16  ;;  %v13815_v16 = vpack.c.bf16 %v1535_v29, %v1528_v19  ;;  %v13946_v2 = vld [vmem:[%s15915_s13 + $0x10] sm:$0xff] }
 0x16e   :  { %v937_v56 = vand.u32 4294901760, %v936_v36 }
 0x170   :  { %9829 = vmatmul.mubr.msk.f32.vlgmr.msra.gmra.mrb[0].mxu0 %vm105_vm1, %v13295_v30  ;;  %v923_v30 = vand.u32 4294901760, %v922_v10  ;;  %v11649_v52 = vpack.c.bf16 %v944_v62, %v937_v56  ;;  %v11701_v10 = vpack.c.bf16 %v1521_v28, %v1514_v27  ;;  %v1968_v56 = vand.u32 4294901760, %v13827_v40 }
 0x171   :  { %v1971_v62 = vand.u32 4294901760, %v13832_v41  ;;  %vm6573_vm1 = vcmask 523264  }
 0x172   :  { %v11645_v32 = vpack.c.bf16 %v930_v31, %v923_v30  ;;  %v8632_v30 = vld [vmem:[%s15906_s4] ss:$0 sm:$0xff]  ;;  %s13296_s4 = smov 64  }
 0x173   :  { %v13923_v58 = vpack.c.bf16 %v1971_v62, %v1968_v56 }
 0x174   :  { %11646 = vmatprep.subr.bf16.mxu1 %v11645_v32 }
 0x243   :  { %v9830_v11 = vpop.f32.mrb[0].mxu0 }
 0x244   :  { %v12981_v22 = vadd.f32 %v9830_v11, %v126_v17  ;;  %v801_v23 = vpop.f32.mrb[1].mxu0 }
 0x245   :  { %v12982_v33 = vadd.f32 %v801_v23, %v126_v17  ;;  %v1952_v23 = vld [vmem:[%s15914_s12 + $0x8] sm:$0xff] }
 0x246   :  { %v827_v34 = vsel %vm822_vm2, %v12981_v22, 0 }
 0x247   :  { %v908_v26 = vand.u32 4294901760, %v827_v34  ;;  %v824_v38 = vsel %vm822_vm2, %v12982_v33, 0 }
 0x248   :  { %v898_v49 = vand.u32 4294901760, %v824_v38 }
 0x249   :  { %v909_v0 = vsub.f32 %v827_v34, %v908_v26 }
 0x24a   :  { %v899_v44 = vsub.f32 %v824_v38, %v898_v49  ;;  %v2073_v38 = vsub.f32 %v13832_v41, %v1971_v62 }
 0x24b   :  { %v910_v6 = vand.u32 4294901760, %v909_v0 }
 0x24c   :  { %v900_v55 = vand.u32 4294901760, %v899_v44 }
 0x24d   :  { %v911_v63 = vsub.f32 %v909_v0, %v910_v6 }
 0x24e   :  { %v901_v4 = vsub.f32 %v899_v44, %v900_v55 }
 0x24f   :  { %v912_v18 = vand.u32 4294901760, %v911_v63 }
 0x250   :  { %v902_v39 = vand.u32 4294901760, %v901_v4  ;;  %v2074_v4 = vand.u32 4294901760, %v2073_v38 }
 0x252   :  { %9839 = vmatprep.mubr.f32.mxu1 %v902_v39  ;;  %v2075_v5 = vsub.f32 %v2073_v38, %v2074_v4 }
 0x253   :  { %9840 = vmatmul.mubr.f32.vlgmr.msra.gmra.mrb[0].mxu1 %v912_v18 }
 0x254   :  { %11648 = vmatpush3.bf16.msra.mxu1 %v11645_v32  ;;  %9850 = vmatprep.mubr.f32.mxu1 %v898_v49  ;;  %v2076_v35 = vand.u32 4294901760, %v2075_v5 }
 0x255   :  { %11650 = vmatprep.subr.bf16.mxu1 %v11649_v52 }
 0x258   :  { %11652 = vmatpush3.bf16.msra.mxu1 %v11649_v52 }
 0x259   :  { %11654 = vmatprep.subr.bf16.mxu1 %v11653_v54 }
 0x25b   :  { %9851 = vmatmul.mubr.f32.vlgmr.msra.gmra.mrb[0].mxu1 %v908_v26 }
 0x25c   :  { %11656 = vmatpush3.bf16.msra.mxu1 %v11653_v54  ;;  %9861 = vmatprep.mubr.f32.mxu1 %v899_v44 }
 0x25d   :  { %11658 = vmatprep.subr.bf16.mxu1 %v11657_v1 }
 0x260   :  { %11660 = vmatpush3.bf16.msra.mxu1 %v11657_v1 }
 0x261   :  { %11662 = vmatprep.subr.bf16.mxu1 %v13771_v43 }
 0x263   :  { %9862 = vmatmul.mubr.f32.vlgmr.msra.gmra.mrb[0].mxu1 %v909_v0 }
 0x264   :  { %11664 = vmatpush3.bf16.msra.mxu1 %v13771_v43  ;;  %9872 = vmatprep.mubr.f32.mxu1 %v900_v55  ;;  %v1965_v55 = vand.u32 4294901760, %v1952_v23 }
 0x265   :  { %11666 = vmatprep.subr.bf16.mxu1 %v13781_v9 }
 0x266   :  { %v2059_v27 = vsub.f32 %v1952_v23, %v1965_v55 }
 0x268   :  { %11668 = vmatpush3.bf16.msra.mxu1 %v13781_v9 }
 0x269   :  { %11670 = vmatprep.subr.bf16.mxu1 %v11669_v12 }
 0x26b   :  { %9873 = vmatmul.mubr.f32.vlgmr.msra.gmra.mrb[0].mxu1 %v910_v6 }
 0x26c   :  { %11672 = vmatpush3.bf16.msra.mxu1 %v11669_v12  ;;  %9883 = vmatprep.mubr.f32.mxu1 %v898_v49 }
 0x26d   :  { %11674 = vmatprep.subr.bf16.mxu1 %v11673_v15 }
 0x270   :  { %11676 = vmatpush3.bf16.msra.mxu1 %v11673_v15  ;;  %v13858_v15 = vld [vmem:[%s15914_s12] sm:$0xff] }
 0x271   :  { %11678 = vmatprep.subr.bf16.mxu1 %v13771_v43  ;;  %v1962_v44 = vand.u32 4294901760, %v13858_v15 }
 0x273   :  { %9884 = vmatmul.mubr.f32.vlgmr.msra.gmra.mrb[0].mxu1 %v908_v26  ;;  %v2052_v45 = vsub.f32 %v13858_v15, %v1962_v44  ;;  %v13915_v29 = vpack.c.bf16 %v1965_v55, %v1962_v44  ;;  %v14010_v15 = vld [vmem:[%s15915_s13 + $0x48] sm:$0xff] }
 0x274   :  { %11680 = vmatpush3.bf16.msra.mxu1 %v13771_v43  ;;  %9894 = vmatprep.mubr.f32.mxu1 %v898_v49  ;;  %v1517_v43 = vand.u32 4294901760, %v1516_v13  ;;  %v2060_v13 = vand.u32 4294901760, %v2059_v27  ;;  %v3067_v23 = vand.u32 4294901760, %v14010_v15 }
 0x275   :  { %11682 = vmatprep.subr.bf16.mxu1 %v13781_v9  ;;  %v13884_v46 = vpack.c.bf16 %v2059_v27, %v2052_v45  ;;  %v2053_v50 = vand.u32 4294901760, %v2052_v45 }
 0x276   :  { %v11693_v60 = vpack.c.bf16 %v1524_v57, %v1517_v43  ;;  %v2061_v57 = vsub.f32 %v2059_v27, %v2060_v13 }
 0x277   :  { %v13895_v14 = vpack.c.bf16 %v2060_v13, %v2053_v50  ;;  %v2054_v43 = vsub.f32 %v2052_v45, %v2053_v50 }
 0x278   :  { %11684 = vmatpush3.bf16.msra.mxu1 %v13781_v9  ;;  %v11697_v9 = vpack.c.bf16 %v1538_v8, %v1531_v3  ;;  %v2062_v59 = vand.u32 4294901760, %v2061_v57  ;;  %v3043_v8 = vand.u32 4294901760, %v13941_v61 }
 0x279   :  { %11686 = vmatprep.subr.bf16.mxu1 %v13801_v25 }
 0x27b   :  { %9895 = vmatmul.mubr.f32.vlgmr.msra.gmra.mrb[0].mxu1 %v908_v26  ;;  %v2066_v26 = vsub.f32 %v13827_v40, %v1968_v56  ;;  %v13989_v56 = vld [vmem:[%s15915_s13 + $0x38] sm:$0xff] }
 0x27c   :  { %11688 = vmatpush3.bf16.msra.mxu1 %v13801_v25 }
 0x27d   :  { %11690 = vmatprep.subr.bf16.mxu1 %v13811_v51  ;;  %v2067_v63 = vand.u32 4294901760, %v2066_v26  ;;  %v13888_v47 = vpack.c.bf16 %v2073_v38, %v2066_v26 }
 0x27f   :  { %v2068_v48 = vsub.f32 %v2066_v26, %v2067_v63  ;;  %v13899_v19 = vpack.c.bf16 %v2074_v4, %v2067_v63 }
 0x280   :  { %11692 = vmatpush3.bf16.msra.mxu1 %v13811_v51 }
 0x281   :  { %11694 = vmatprep.subr.bf16.mxu1 %v11693_v60  ;;  %v2069_v28 = vand.u32 4294901760, %v2068_v48 }
 0x283   :  { %v13882_v42 = vpack.c.bf16 %v2076_v35, %v2069_v28 }
 0x34e   :  { %v9896_v31 = vpop.f32.mrb[0].mxu1 }
 0x34f   :  { %v13834_v32 = vadd.f32 %v9896_v31, %v8632_v30  ;;  %v1347_v36 = vpop.f32.mrb[1].mxu1 }
 0x350   :  { %v13836_v53 = vadd.f32 %v8632_v30, %v1347_v36  ;;  %v13984_v36 = vld [vmem:[%s15915_s13 + $0x30] sm:$0xff] }
 0x351   :  { %vm1358_vm3 = vcmp.ge.f32.partialorder %v13834_v32, 0.5  ;;  %v1368_v55 = vmul.f32 0.8187308, %v13834_v32 }
 0x352   :  { %v13842_v52 = vsel %vm1358_vm3, 1.0, %v13294_v7  ;;  %vm1357_vm4 = vcmp.ge.f32.partialorder %v13836_v53, 0.5  ;;  %1395 = vrot.lane.b32.xlu0 %v13836_v53, %s13296_s4  ;;  %1371 = vrot.lane.b32.xlu1 %v13836_v53, %s13297_s30  ;;  %v1367_v26 = vmul.f32 0.8187308, %v13836_v53  ;;  %vm7460_vm3 = vcmask 64512  }
 0x353   :  { %v13848_v54 = vsel %vm1357_vm4, 1.0, %v13294_v7  ;;  %v1421_v1 = vsel %vm822_vm2, %v13842_v52, 0  ;;  %v13853_v12 = vmul.f32 0.5, %v13842_v52  ;;  %vm7463_vm4 = vcmask 130048  }
 0x354   :  { %v1418_v17 = vsel %vm822_vm2, %v13848_v54, 0  ;;  %v1503_v11 = vsub.f32 %v1421_v1, %v1421_v1  ;;  %v13863_v22 = vmul.f32 0.5, %v13848_v54  ;;  %v14005_v1 = vld [vmem:[%s15915_s13 + $0x40] sm:$0xff] }
 0x355   :  { %v1493_v33 = vsub.f32 %v1418_v17, %v1418_v17  ;;  %v1366_v34 = vsub.f32 %v13834_v32, %v13853_v12 }
 0x356   :  { %1373 = vrot.lane.b32.xlu1 %v13834_v32, %s13297_s30  ;;  %v1504_v49 = vand.u32 4294901760, %v1503_v11  ;;  %v1365_v0 = vsub.f32 %v13836_v53, %v13863_v22 }
 0x357   :  { %v1494_v6 = vand.u32 4294901760, %v1493_v33  ;;  %v1380_v4 = vmul.f32 0.9048374, %v1366_v34 }
 0x358   :  { %v1505_v39 = vsub.f32 %v1503_v11, %v1504_v49  ;;  %v1379_v44 = vmul.f32 0.9048374, %v1365_v0 }
 0x359   :  { %v1495_v18 = vsub.f32 %v1493_v33, %v1494_v6 }
 0x35a   :  { %1397 = vrot.lane.b32.xlu1 %v13834_v32, %s13296_s4  ;;  %v1506_v37 = vand.u32 4294901760, %v1505_v39 }
 0x35b   :  { %v1496_v24 = vand.u32 4294901760, %v1495_v18 }
 0x35d   :  { %9905 = vmatprep.mubr.f32.mxu1 %v1496_v24 }
 0x35e   :  { %9906 = vmatmul.mubr.f32.vlgmr.msra.gmra.mrb[2].mxu1 %v1506_v37 }
 0x35f   :  { %11696 = vmatpush3.bf16.msra.mxu1 %v11693_v60  ;;  %9916 = vmatprep.mubr.msk.f32.mxu1 %vm822_vm2, %v13848_v54 }
 0x360   :  { %11698 = vmatprep.subr.bf16.mxu1 %v11697_v9 }
 0x363   :  { %11700 = vmatpush3.bf16.msra.mxu1 %v11697_v9  ;;  %v13953_v9 = vld [vmem:[%s15915_s13 + $0x18] sm:$0xff] }
 0x364   :  { %11702 = vmatprep.subr.bf16.mxu1 %v11701_v10 }
 0x366   :  { %9917 = vmatmul.mubr.msk.f32.vlgmr.msra.gmra.mrb[2].mxu1 %vm822_vm2, %v13842_v52 }
 0x367   :  { %11704 = vmatpush3.bf16.msra.mxu1 %v11701_v10  ;;  %9927 = vmatprep.mubr.f32.mxu1 %v1493_v33  ;;  %v3046_v10 = vand.u32 4294901760, %v13946_v2 }
 0x368   :  { %11706 = vmatprep.subr.bf16.mxu1 %v13815_v16 }
 0x36b   :  { %11708 = vmatpush3.bf16.msra.mxu1 %v13815_v16  ;;  %v13959_v16 = vld [vmem:[%s15915_s13 + $0x20] sm:$0xff] }
 0x36c   :  { %11710 = vmatprep.subr.bf16.mxu1 %v13801_v25  ;;  %v3052_v31 = vand.u32 4294901760, %v13959_v16 }
 0x36e   :  { %9928 = vmatmul.mubr.f32.vlgmr.msra.gmra.mrb[2].mxu1 %v1503_v11  ;;  %v3064_v11 = vand.u32 4294901760, %v14005_v1 }
 0x36f   :  { %11712 = vmatpush3.bf16.msra.mxu1 %v13801_v25  ;;  %9938 = vmatprep.mubr.f32.mxu1 %v1494_v6 }
 0x370   :  { %11714 = vmatprep.subr.bf16.mxu1 %v13811_v51  ;;  %v14028_v33 = vpack.c.bf16 %v3067_v23, %v3064_v11 }
 0x373   :  { %11716 = vmatpush3.bf16.msra.mxu1 %v13811_v51 }
 0x374   :  { %11718 = vmatprep.subr.bf16.mxu1 %v13817_v20 }
 0x376   :  { %9939 = vmatmul.mubr.f32.vlgmr.msra.gmra.mrb[2].mxu1 %v1504_v49 }
 0x377   :  { %11720 = vmatpush3.bf16.msra.mxu1 %v13817_v20  ;;  %9949 = vmatprep.mubr.msk.f32.mxu1 %vm822_vm2, %v13848_v54  ;;  %v13964_v20 = vld [vmem:[%s15915_s13 + $0x28] sm:$0xff] }
 0x378   :  { %11722 = vmatprep.subr.bf16.mxu1 %v13819_v21  ;;  %v3055_v40 = vand.u32 4294901760, %v13964_v20 }
 0x37a   :  { %v13998_v62 = vpack.c.bf16 %v3055_v40, %v3052_v31 }
 0x37b   :  { %11724 = vmatpush3.bf16.msra.mxu1 %v13819_v21  ;;  %v3049_v21 = vand.u32 4294901760, %v13953_v9 }
 0x37c   :  { %11726 = vmatprep.subr.bf16.mxu1 %v13801_v25 }
 0x37d   :  { %v13979_v41 = vpack.c.bf16 %v3049_v21, %v3046_v10 }
 0x37e   :  { %9950 = vmatmul.mubr.msk.f32.vlgmr.msra.gmra.mrb[2].mxu1 %vm822_vm2, %v13842_v52 }
 0x37f   :  { %11728 = vmatpush3.bf16.msra.mxu1 %v13801_v25  ;;  %9960 = vmatprep.mubr.msk.f32.mxu1 %vm822_vm2, %v13848_v54  ;;  %v2055_v25 = vand.u32 4294901760, %v2054_v43  ;;  %v3061_v54 = vand.u32 4294901760, %v13989_v56 }
 0x380   :  { %11730 = vmatprep.subr.bf16.mxu1 %v13811_v51 }
 0x381   :  { %v13929_v60 = vpack.c.bf16 %v2062_v59, %v2055_v25 }
 0x383   :  { %11732 = vmatpush3.bf16.msra.mxu1 %v13811_v51  ;;  %v13936_v51 = vld [vmem:[%s15915_s13] sm:$0xff] }
 0x384   :  { %11734 = vmatprep.subr.bf16.mxu1 %v13915_v29  ;;  %v3040_v3 = vand.u32 4294901760, %v13936_v51 }
 0x386   :  { %9961 = vmatmul.mubr.msk.f32.vlgmr.msra.gmra.mrb[2].mxu1 %vm822_vm2, %v13842_v52  ;;  %v13971_v30 = vpack.c.bf16 %v3043_v8, %v3040_v3  ;;  %v3058_v52 = vand.u32 4294901760, %v13984_v36 }
 0x387   :  { %11736 = vmatpush3.bf16.msra.mxu1 %v13915_v29 }
 0x388   :  { %11738 = vmatprep.subr.bf16.mxu1 %v13923_v58  ;;  %11830 = vmatprep.subr.bf16.mxu0 %v13971_v30  ;;  %v14018_v17 = vpack.c.bf16 %v3061_v54, %v3058_v52 }
 0x389   :  { %11832 = vmatpush3.bf16.msra.mxu0 %v13971_v30 }
 0x38a   :  { %11834 = vmatprep.subr.bf16.mxu0 %v13979_v41 }
 0x38b   :  { %11740 = vmatpush3.bf16.msra.mxu1 %v13923_v58 }
 0x38c   :  { %11742 = vmatprep.subr.bf16.mxu1 %v13929_v60 }
 0x38d   :  { %11836 = vmatpush3.bf16.msra.mxu0 %v13979_v41 }
 0x38e   :  { %11838 = vmatprep.subr.bf16.mxu0 %v13998_v62 }
 0x391   :  { %11840 = vmatpush3.bf16.msra.mxu0 %v13998_v62 }
 0x392   :  { %11842 = vmatprep.subr.bf16.mxu0 %v14018_v17 }
 0x395   :  { %11844 = vmatpush3.bf16.msra.mxu0 %v14018_v17 }
 0x396   :  { %11846 = vmatprep.subr.bf16.mxu0 %v14028_v33 }
 0x399   :  { %11848 = vmatpush3.bf16.msra.mxu0 %v14028_v33 }
 0x3c4   :  { %v1372_v38 = vpop.permute.xlu1 %1371  ;;  %v1396_v45 = vpop.permute.xlu0 %1395 }
 0x3c5   :  { %v1377_v49 = vadd.f32 %v1372_v38, %v1367_v26 }
 0x3c7   :  { %v1381_v6 = vadd.f32 %v1379_v44, %v1377_v49  ;;  %v1393_v48 = vmul.f32 0.8187308, %v1377_v49 }
 0x3c8   :  { %v1374_v63 = vpop.permute.xlu1 %1373 }
 0x3c9   :  { %vm1383_vm5 = vcmp.ge.f32.partialorder %v1381_v6, 0.5  ;;  %v1378_v39 = vadd.f32 %v1374_v63, %v1368_v55  ;;  %v1401_v27 = vadd.f32 %v1396_v45, %v1393_v48  ;;  %v14072_v55 = vld [vmem:[%s15915_s13 + $0x50] sm:$0xff]  ;;  %v14077_v63 = vld [vmem:[%s15915_s13 + $0x58] sm:$0xff] }
 0x3ca   :  { %v14042_v18 = vsel %vm1383_vm5, 1.0, %v13294_v7  ;;  %v3073_v48 = vand.u32 4294901760, %v14077_v63  ;;  %vm7466_vm5 = vcmask 195584  }
 0x3cb   :  { %v1389_v5 = vmul.f32 0.5, %v14042_v18  ;;  %v1382_v53 = vadd.f32 %v1380_v4, %v1378_v39  ;;  %v1956_v22 = vsel %vm822_vm2, %v14042_v18, 0  ;;  %v1394_v37 = vmul.f32 0.8187308, %v1378_v39 }
 0x3cc   :  { %v14047_v0 = vsub.f32 %v1956_v22, %v1956_v22  ;;  %v1398_v13 = vpop.permute.xlu1 %1397  ;;  %v3070_v39 = vand.u32 4294901760, %v14072_v55  ;;  %v14098_v22 = vld [vmem:[%s15915_s13 + $0x68] sm:$0xff] }
 0x3cd   :  { %v1391_v24 = vsub.f32 %v1381_v6, %v1389_v5  ;;  %vm1384_vm6 = vcmp.ge.f32.partialorder %v1382_v53, 0.5  ;;  %v1402_v49 = vadd.f32 %v1398_v13, %v1394_v37  ;;  %v14130_v37 = vsub.f32 %v13941_v61, %v3043_v8 }
 0x3ce   :  { %v14050_v32 = vsel %vm1384_vm6, 1.0, %v13294_v7  ;;  %v2032_v12 = vand.u32 4294901760, %v14047_v0  ;;  %v14085_v5 = vpack.c.bf16 %v3073_v48, %v3070_v39 }
 0x3cf   :  { %v1403_v34 = vmul.f32 0.9048374, %v1391_v24  ;;  %v1390_v28 = vmul.f32 0.5, %v14050_v32  ;;  %v1959_v35 = vsel %vm822_vm2, %v14050_v32, 0  ;;  %v3079_v24 = vand.u32 4294901760, %v14098_v22 }
 0x3d0   :  { %v14056_v50 = vsub.f32 %v1959_v35, %v1959_v35  ;;  %v2033_v43 = vsub.f32 %v14047_v0, %v2032_v12  ;;  %11850 = vmatprep.subr.bf16.mxu0 %v14085_v5  ;;  %v14125_v35 = vld [vmem:[%s15915_s13 + $0x78] sm:$0xff] }
 0x3d1   :  { %v14061_v57 = vadd.f32 %v1403_v34, %v1401_v27  ;;  %v1392_v25 = vsub.f32 %v1382_v53, %v1390_v28  ;;  %v14093_v53 = vld [vmem:[%s15915_s13 + $0x60] sm:$0xff]  ;;  %11852 = vmatpush3.bf16.msra.mxu0 %v14085_v5  ;;  %v14114_v34 = vsub.f32 %v13936_v51, %v3040_v3  ;;  %v14120_v28 = vld [vmem:[%s15915_s13 + $0x70] sm:$0xff]  ;;  %v3085_v3 = vand.u32 4294901760, %v14125_v35  ;;  %s13298_s13 = smov 112  }
 0x3d2   :  { %v2034_v59 = vand.u32 4294901760, %v2033_v43  ;;  %v2042_v26 = vand.u32 4294901760, %v14056_v50  ;;  %v3076_v45 = vand.u32 4294901760, %v14093_v53  ;;  %v3082_v51 = vand.u32 4294901760, %v14120_v28 }
 0x3d3   :  { %v1404_v38 = vmul.f32 0.9048374, %v1392_v25  ;;  %v3143_v13 = vand.u32 4294901760, %v14114_v34  ;;  %v15929_v43 = vand.u32 4294901760, %v14130_v37  ;;  %v14153_v25 = vsub.f32 %v13946_v2, %v3046_v10 }
 0x3d4   :  { %9971 = vmatprep.mubr.f32.mxu1 %v2034_v59  ;;  %v2043_v44 = vsub.f32 %v14056_v50, %v2042_v26  ;;  %v14109_v27 = vpack.c.bf16 %v3079_v24, %v3076_v45  ;;  %v14145_v61 = vpack.c.bf16 %v3085_v3, %v3082_v51  ;;  %vm1407_vm7 = vcmp.ge.f32.partialorder %v14061_v57, 0.5 }
 0x3d5   :  { %v14067_v6 = vadd.f32 %v1404_v38, %v1402_v49  ;;  %v3144_v8 = vsub.f32 %v14114_v34, %v3143_v13  ;;  %v3151_v59 = vsub.f32 %v14130_v37, %v15929_v43  ;;  %v14163_v38 = vsub.f32 %v13953_v9, %v3049_v21 }
 0x3d6   :  { %v2044_v4 = vand.u32 4294901760, %v2043_v44  ;;  %11854 = vmatprep.subr.bf16.mxu0 %v14109_v27  ;;  %v15928_v2 = vand.u32 4294901760, %v14153_v25  ;;  %v14176_v9 = vsub.f32 %v13959_v16, %v3052_v31  ;;  %v14181_v21 = vsub.f32 %v13964_v20, %v3055_v40 }
 0x3d7   :  { %11856 = vmatpush3.bf16.msra.mxu0 %v14109_v27  ;;  %v3145_v49 = vand.u32 4294901760, %v3144_v8  ;;  %v3152_v10 = vand.u32 4294901760, %v3151_v59  ;;  %v3164_v44 = vand.u32 4294901760, %v14163_v38  ;;  %v14241_v57 = vsub.f32 %v14010_v15, %v3067_v23 }
 0x3d8   :  { %9972 = vmatmul.mubr.f32.vlgmr.msra.gmra.mrb[4].mxu1 %v2044_v4  ;;  %11858 = vmatprep.subr.bf16.mxu0 %v14145_v61  ;;  %v3158_v4 = vsub.f32 %v14153_v25, %v15928_v2  ;;  %v15931_v43 = vand.u32 4294901760, %v14176_v9  ;;  %v15930_v16 = vand.u32 4294901760, %v14181_v21  ;;  %vm1408_vm8 = vcmp.ge.f32.partialorder %v14067_v6, 0.5 }
 0x3d9   :  { %11744 = vmatpush3.bf16.msra.mxu1 %v13929_v60  ;;  %9982 = vmatprep.mubr.msk.f32.mxu1 %vm822_vm2, %v14042_v18  ;;  %v14184_v8 = vpack.c.bf16 %v3152_v10, %v3145_v49  ;;  %v3165_v59 = vsub.f32 %v14163_v38, %v3164_v44  ;;  %v14204_v49 = vsub.f32 %v13984_v36, %v3058_v52 }
 0x3da   :  { %11746 = vmatprep.subr.bf16.mxu1 %v13882_v42  ;;  %v3159_v2 = vand.u32 4294901760, %v3158_v4  ;;  %v3172_v31 = vsub.f32 %v14176_v9, %v15931_v43  ;;  %v3179_v40 = vsub.f32 %v14181_v21, %v15930_v16  ;;  %v14209_v10 = vsub.f32 %v13989_v56, %v3061_v54 }
 0x3db   :  { %11860 = vmatpush3.bf16.msra.mxu0 %v14145_v61  ;;  %v3166_v20 = vand.u32 4294901760, %v3165_v59  ;;  %v3185_v43 = vand.u32 4294901760, %v14204_v49  ;;  %v14222_v56 = vsel %vm1407_vm7, 1.0, %v13294_v7  ;;  %v14259_v23 = vsub.f32 %v14072_v55, %v3070_v39 }
 0x3dc   :  { %11862 = vmatprep.subr.bf16.mxu0 %v14184_v8  ;;  %v3173_v59 = vand.u32 4294901760, %v3172_v31  ;;  %v3180_v16 = vand.u32 4294901760, %v3179_v40  ;;  %v3192_v36 = vand.u32 4294901760, %v14209_v10  ;;  %v2490_v31 = vsel %vm822_vm2, %v14222_v56, 0 }
 0x3dd   :  { %11748 = vmatpush3.bf16.msra.mxu1 %v13882_v42  ;;  %v14214_v4 = vpack.c.bf16 %v3166_v20, %v3159_v2  ;;  %v3186_v54 = vsub.f32 %v14204_v49, %v3185_v43  ;;  %v14264_v6 = vsub.f32 %v14077_v63, %v3073_v48  ;;  %v3213_v55 = vand.u32 4294901760, %v14259_v23 }
 0x3de   :  { %11750 = vmatprep.subr.bf16.mxu1 %v13884_v46  ;;  %v14224_v52 = vpack.c.bf16 %v3180_v16, %v3173_v59  ;;  %v14276_v40 = vsel %vm1408_vm8, 1.0, %v13294_v7  ;;  %v14278_v63 = vsub.f32 %v2490_v31, %v2490_v31  ;;  %v14294_v7 = vsub.f32 %v14098_v22, %v3079_v24 }
 0x3df   :  { %v3187_v2 = vand.u32 4294901760, %v3186_v54  ;;  %v3220_v39 = vand.u32 4294901760, %v14264_v6  ;;  %v3214_v59 = vsub.f32 %v14259_v23, %v3213_v55 }
 0x3e0   :  { %9983 = vmatmul.mubr.msk.f32.vlgmr.msra.gmra.mrb[4].mxu1 %vm822_vm2, %v14050_v32 }
 0x3e1   :  { %11752 = vmatpush3.bf16.msra.mxu1 %v13884_v46  ;;  %9993 = vmatprep.mubr.f32.mxu1 %v14047_v0  ;;  %v3193_v0 = vsub.f32 %v14209_v10, %v3192_v36  ;;  %v3221_v54 = vsub.f32 %v14264_v6, %v3220_v39 }
 0x3e2   :  { %11754 = vmatprep.subr.bf16.mxu1 %v13888_v47 }
 0x3e3   :  { %v3194_v16 = vand.u32 4294901760, %v3193_v0  ;;  %v14289_v0 = vsub.f32 %v14093_v53, %v3076_v45  ;;  %v3222_v31 = vand.u32 4294901760, %v3221_v54  ;;  %v2493_v53 = vsel %vm822_vm2, %v14276_v40, 0 }
 0x3e4   :  { %v2566_v45 = vand.u32 4294901760, %v14278_v63  ;;  %v2575_v54 = vsub.f32 %v2493_v53, %v2493_v53 }
 0x3e5   :  { %11756 = vmatpush3.bf16.msra.mxu1 %v13888_v47 }
 0x3e6   :  { %11758 = vmatprep.subr.bf16.mxu1 %v13915_v29 }
 0x3e8   :  { %9994 = vmatmul.mubr.f32.vlgmr.msra.gmra.mrb[4].mxu1 %v14056_v50 }
 0x3e9   :  { %11760 = vmatpush3.bf16.msra.mxu1 %v13915_v29  ;;  %10004 = vmatprep.mubr.f32.mxu1 %v2032_v12  ;;  %v14235_v12 = vsub.f32 %v14005_v1, %v3064_v11  ;;  %v3206_v1 = vand.u32 4294901760, %v14241_v57  ;;  %v14251_v11 = vpack.c.bf16 %v3194_v16, %v3187_v2  ;;  %v3215_v16 = vand.u32 4294901760, %v3214_v59 }
 0x3ea   :  { %11762 = vmatprep.subr.bf16.mxu1 %v13923_v58  ;;  %v14326_v59 = vsub.f32 %v14125_v35, %v3085_v3  ;;  %v2576_v3 = vand.u32 4294901760, %v2575_v54 }
 0x3eb   :  { %v3199_v20 = vand.u32 4294901760, %v14235_v12  ;;  %v3207_v50 = vsub.f32 %v14241_v57, %v3206_v1  ;;  %v14307_v22 = vpack.c.bf16 %v3222_v31, %v3215_v16 }
 0x3ed   :  { %11764 = vmatpush3.bf16.msra.mxu1 %v13923_v58  ;;  %v3200_v15 = vsub.f32 %v14235_v12, %v3199_v20  ;;  %v3208_v48 = vand.u32 4294901760, %v3207_v50  ;;  %v15932_v50 = vand.u32 4294901760, %v14294_v7 }
 0x3ee   :  { %11766 = vmatprep.subr.bf16.mxu1 %v13895_v14 }
 0x3f0   :  { %10005 = vmatmul.mubr.f32.vlgmr.msra.gmra.mrb[4].mxu1 %v2042_v26  ;;  %v3201_v26 = vand.u32 4294901760, %v3200_v15  ;;  %v15933_v15 = vand.u32 4294901760, %v14289_v0 }
 0x3f1   :  { %11768 = vmatpush3.bf16.msra.mxu1 %v13895_v14  ;;  %10015 = vmatprep.mubr.msk.f32.mxu1 %vm822_vm2, %v14042_v18 }
 0x3f2   :  { %11770 = vmatprep.subr.bf16.mxu1 %v13899_v19  ;;  %v14297_v2 = vpack.c.bf16 %v3208_v48, %v3201_v26  ;;  %v3228_v24 = vsub.f32 %v14289_v0, %v15933_v15  ;;  %v3235_v26 = vsub.f32 %v14294_v7, %v15932_v50  ;;  %v14318_v48 = vsub.f32 %v14120_v28, %v3082_v51 }
 0x3f3   :  { %v2567_v28 = vsub.f32 %v14278_v63, %v2566_v45  ;;  %v15934_v51 = vand.u32 4294901760, %v14326_v59 }
 0x3f4   :  { %v3229_v16 = vand.u32 4294901760, %v3228_v24  ;;  %v3236_v31 = vand.u32 4294901760, %v3235_v26  ;;  %v3241_v50 = vand.u32 4294901760, %v14318_v48 }
 0x3f5   :  { %11772 = vmatpush3.bf16.msra.mxu1 %v13899_v19  ;;  %v3249_v35 = vsub.f32 %v14326_v59, %v15934_v51  ;;  %v2568_v24 = vand.u32 4294901760, %v2567_v28  ;;  %v14350_v51 = vpack.c.bf16 %v14130_v37, %v14114_v34  ;;  %v14364_v28 = vpack.c.bf16 %v14181_v21, %v14176_v9 }
 0x3f6   :  { %11774 = vmatprep.subr.bf16.mxu1 %v13915_v29  ;;  %v14332_v15 = vpack.c.bf16 %v3236_v31, %v3229_v16  ;;  %v2577_v31 = vsub.f32 %v2575_v54, %v2576_v3  ;;  %v15963_v34 = vand.u32 4294901760, %v14176_v9 }
 0x3f7   :  { %v3250_v26 = vand.u32 4294901760, %v3249_v35  ;;  %v14370_v35 = vpack.c.bf16 %v14209_v10, %v14204_v49 }
 0x3f8   :  { %10016 = vmatmul.mubr.msk.f32.vlgmr.msra.gmra.mrb[4].mxu1 %vm822_vm2, %v14050_v32 }
 0x3f9   :  { %11776 = vmatpush3.bf16.msra.mxu1 %v13915_v29  ;;  %10026 = vmatprep.mubr.msk.f32.mxu1 %vm822_vm2, %v14042_v18  ;;  %v3242_v18 = vsub.f32 %v14318_v48, %v3241_v50 }
 0x3fa   :  { %11778 = vmatprep.subr.bf16.mxu1 %v13923_v58 }
 0x3fb   :  { %v3243_v53 = vand.u32 4294901760, %v3242_v18  ;;  %v2578_v18 = vand.u32 4294901760, %v2577_v31 }
 0x3fd   :  { %11780 = vmatpush3.bf16.msra.mxu1 %v13923_v58  ;;  %v14345_v16 = vpack.c.bf16 %v3250_v26, %v3243_v53  ;;  %v15961_v26 = vand.u32 4294901760, %v14130_v37  ;;  %v15964_v37 = vand.u32 4294901760, %v14181_v21 }
 0x3fe   :  { %11782 = vmatprep.subr.bf16.mxu1 %v13915_v29 }
 0x3ff   :  { %v14504_v31 = vpack.c.bf16 %v15961_v26, %v3143_v13  ;;  %v14523_v13 = vpack.c.bf16 %v15964_v37, %v15963_v34 }
 0x400   :  { %10027 = vmatmul.mubr.msk.f32.vlgmr.msra.gmra.mrb[4].mxu1 %vm822_vm2, %v14050_v32  ;;  %v14356_v32 = vpack.c.bf16 %v14163_v38, %v14153_v25  ;;  %v14539_v38 = vpack.c.bf16 %v3206_v1, %v3199_v20  ;;  %v15966_v20 = vand.u32 4294901760, %v14294_v7 }
 0x401   :  { %11784 = vmatpush3.bf16.msra.mxu1 %v13915_v29  ;;  %10037 = vmatprep.mubr.f32.mxu1 %v2568_v24 }
 0x402   :  { %11786 = vmatprep.subr.bf16.mxu1 %v13923_v58 }
 0x405   :  { %11788 = vmatpush3.bf16.msra.mxu1 %v13923_v58 }
 0x406   :  { %11790 = vmatprep.subr.bf16.mxu1 %v13929_v60 }
 0x408   :  { %10038 = vmatmul.mubr.f32.vlgmr.msra.gmra.mrb[6].mxu1 %v2578_v18  ;;  %v15962_v18 = vand.u32 4294901760, %v14153_v25  ;;  %v14531_v25 = vpack.c.bf16 %v3192_v36, %v3185_v43  ;;  %v14554_v43 = vpack.c.bf16 %v3220_v39, %v3213_v55  ;;  %v15967_v39 = vand.u32 4294901760, %v14326_v59 }
 0x409   :  { %11792 = vmatpush3.bf16.msra.mxu1 %v13929_v60  ;;  %10048 = vmatprep.mubr.msk.f32.mxu1 %vm822_vm2, %v14222_v56  ;;  %v14379_v60 = vpack.c.bf16 %v14241_v57, %v14235_v12  ;;  %v15965_v57 = vand.u32 4294901760, %v14289_v0 }
 0x40a   :  { %11794 = vmatprep.subr.bf16.mxu1 %v13882_v42 }
 0x40b   :  { %v14574_v1 = vpack.c.bf16 %v15966_v20, %v15965_v57 }
 0x40d   :  { %11796 = vmatpush3.bf16.msra.mxu1 %v13882_v42  ;;  %v14385_v42 = vpack.c.bf16 %v14264_v6, %v14259_v23 }
 0x40e   :  { %11798 = vmatprep.subr.bf16.mxu1 %v13884_v46 }
 0x410   :  { %10049 = vmatmul.mubr.msk.f32.vlgmr.msra.gmra.mrb[6].mxu1 %vm822_vm2, %v14276_v40 }
 0x411   :  { %11800 = vmatpush3.bf16.msra.mxu1 %v13884_v46  ;;  %10059 = vmatprep.mubr.f32.mxu1 %v14278_v63  ;;  %v14391_v46 = vpack.c.bf16 %v14294_v7, %v14289_v0  ;;  %v14589_v0 = vpack.c.bf16 %v15967_v39, %v3241_v50 }
 0x412   :  { %11802 = vmatprep.subr.bf16.mxu1 %v13888_v47 }
 0x415   :  { %11804 = vmatpush3.bf16.msra.mxu1 %v13888_v47  ;;  %v14397_v47 = vpack.c.bf16 %v14326_v59, %v14318_v48 }
 0x416   :  { %11806 = vmatprep.subr.bf16.mxu1 %v13915_v29 }
 0x418   :  { %10060 = vmatmul.mubr.f32.vlgmr.msra.gmra.mrb[6].mxu1 %v2575_v54 }
 0x419   :  { %11808 = vmatpush3.bf16.msra.mxu1 %v13915_v29  ;;  %10070 = vmatprep.mubr.f32.mxu1 %v2566_v45 }
 0x41a   :  { %11810 = vmatprep.subr.bf16.mxu1 %v13923_v58 }
 0x41d   :  { %11812 = vmatpush3.bf16.msra.mxu1 %v13923_v58 }
 0x41e   :  { %11814 = vmatprep.subr.bf16.mxu1 %v13895_v14 }
 0x420   :  { %10071 = vmatmul.mubr.f32.vlgmr.msra.gmra.mrb[6].mxu1 %v2576_v3 }
 0x421   :  { %11816 = vmatpush3.bf16.msra.mxu1 %v13895_v14  ;;  %10081 = vmatprep.mubr.msk.f32.mxu1 %vm822_vm2, %v14222_v56 }
 0x422   :  { %11818 = vmatprep.subr.bf16.mxu1 %v13899_v19 }
 0x425   :  { %11820 = vmatpush3.bf16.msra.mxu1 %v13899_v19 }
 0x426   :  { %11822 = vmatprep.subr.bf16.mxu1 %v13915_v29 }
 0x428   :  { %10082 = vmatmul.mubr.msk.f32.vlgmr.msra.gmra.mrb[6].mxu1 %vm822_vm2, %v14276_v40 }
 0x429   :  { %11824 = vmatpush3.bf16.msra.mxu1 %v13915_v29  ;;  %10092 = vmatprep.mubr.msk.f32.mxu1 %vm822_vm2, %v14222_v56 }
 0x42a   :  { %11826 = vmatprep.subr.bf16.mxu1 %v13923_v58 }
 0x42d   :  { %11828 = vmatpush3.bf16.msra.mxu1 %v13923_v58 }
 0x42e   :  { %12022 = vmatprep.subr.bf16.mxu1 %v13971_v30 }
 0x430   :  { %10093 = vmatmul.mubr.msk.f32.vlgmr.msra.gmra.mrb[6].mxu1 %vm822_vm2, %v14276_v40 }
 0x431   :  { %12024 = vmatpush3.bf16.msra.mxu1 %v13971_v30 }
 0x432   :  { %12026 = vmatprep.subr.bf16.mxu1 %v13979_v41 }
 0x435   :  { %12028 = vmatpush3.bf16.msra.mxu1 %v13979_v41 }
 0x436   :  { %12030 = vmatprep.subr.bf16.mxu1 %v13998_v62 }
 0x439   :  { %12032 = vmatpush3.bf16.msra.mxu1 %v13998_v62 }
 0x43a   :  { %12034 = vmatprep.subr.bf16.mxu1 %v14018_v17 }
 0x43d   :  { %12036 = vmatpush3.bf16.msra.mxu1 %v14018_v17 }
 0x43e   :  { %12038 = vmatprep.subr.bf16.mxu1 %v14028_v33 }
 0x441   :  { %12040 = vmatpush3.bf16.msra.mxu1 %v14028_v33 }
 0x442   :  { %12042 = vmatprep.subr.bf16.mxu1 %v14085_v5 }
 0x445   :  { %12044 = vmatpush3.bf16.msra.mxu1 %v14085_v5 }
 0x446   :  { %12046 = vmatprep.subr.bf16.mxu1 %v14109_v27 }
 0x449   :  { %12048 = vmatpush3.bf16.msra.mxu1 %v14109_v27 }
 0x44a   :  { %12050 = vmatprep.subr.bf16.mxu1 %v14145_v61 }
 0x44d   :  { %12052 = vmatpush3.bf16.msra.mxu1 %v14145_v61 }
 0x44e   :  { %12054 = vmatprep.subr.bf16.mxu1 %v14184_v8 }
 0x459   :  { %v14431_v14 = vpop.f32.mrb[2].mxu1 }
 0x45a   :  { %v14434_v19 = vand.u32 4294901760, %v14431_v14  ;;  %v14436_v29 = vpop.f32.mrb[3].mxu1 }
 0x45b   :  { %v14439_v58 = vand.u32 4294901760, %v14436_v29 }
 0x45c   :  { %v14443_v56 = vsub.f32 %v14431_v14, %v14434_v19 }
 0x45d   :  { %v3121_v40 = vsub.f32 %v14436_v29, %v14439_v58 }
 0x45e   :  { %v3132_v63 = vand.u32 4294901760, %v14443_v56 }
 0x45f   :  { %v3122_v45 = vand.u32 4294901760, %v3121_v40 }
 0x460   :  { %v3133_v54 = vsub.f32 %v14443_v56, %v3132_v63 }
 0x461   :  { %v3123_v3 = vsub.f32 %v3121_v40, %v3122_v45 }
 0x462   :  { %v3134_v24 = vand.u32 4294901760, %v3133_v54 }
 0x463   :  { %v3124_v53 = vand.u32 4294901760, %v3123_v3 }
 0x465   :  { %10127 = vmatprep.mubr.f32.mxu0 %v3124_v53 }
 0x466   :  { %10128 = vmatmul.mubr.f32.vlgmr.msra.gmra.mrb[2].mxu0 %v3134_v24 }
 0x467   :  { %11864 = vmatpush3.bf16.msra.mxu0 %v14184_v8  ;;  %10162 = vmatprep.mubr.f32.mxu0 %v14439_v58 }
 0x468   :  { %11866 = vmatprep.subr.bf16.mxu0 %v14214_v4 }
 0x46b   :  { %11868 = vmatpush3.bf16.msra.mxu0 %v14214_v4 }
 0x46c   :  { %11870 = vmatprep.subr.bf16.mxu0 %v14224_v52 }
 0x46f   :  { %11872 = vmatpush3.bf16.msra.mxu0 %v14224_v52 }
 0x470   :  { %11874 = vmatprep.subr.bf16.mxu0 %v14251_v11 }
 0x473   :  { %11876 = vmatpush3.bf16.msra.mxu0 %v14251_v11 }
 0x474   :  { %11878 = vmatprep.subr.bf16.mxu0 %v14297_v2 }
 0x477   :  { %11880 = vmatpush3.bf16.msra.mxu0 %v14297_v2 }
 0x478   :  { %11882 = vmatprep.subr.bf16.mxu0 %v14307_v22 }
 0x47b   :  { %11884 = vmatpush3.bf16.msra.mxu0 %v14307_v22 }
 0x47c   :  { %11886 = vmatprep.subr.bf16.mxu0 %v14332_v15 }
 0x47f   :  { %11888 = vmatpush3.bf16.msra.mxu0 %v14332_v15 }
 0x480   :  { %11890 = vmatprep.subr.bf16.mxu0 %v14345_v16 }
 0x483   :  { %11892 = vmatpush3.bf16.msra.mxu0 %v14345_v16 }
 0x484   :  { %11894 = vmatprep.subr.bf16.mxu0 %v14350_v51 }
 0x486   :  { %10163 = vmatmul.mubr.f32.vlgmr.msra.gmra.mrb[2].mxu0 %v14434_v19 }
 0x487   :  { %11896 = vmatpush3.bf16.msra.mxu0 %v14350_v51  ;;  %10197 = vmatprep.mubr.f32.mxu0 %v3121_v40  ;;  %v14512_v40 = vpack.c.bf16 %v3164_v44, %v15962_v18 }
 0x488   :  { %11898 = vmatprep.subr.bf16.mxu0 %v14356_v32 }
 0x48b   :  { %11900 = vmatpush3.bf16.msra.mxu0 %v14356_v32 }
 0x48c   :  { %11902 = vmatprep.subr.bf16.mxu0 %v14364_v28 }
 0x48f   :  { %11904 = vmatpush3.bf16.msra.mxu0 %v14364_v28 }
 0x490   :  { %11906 = vmatprep.subr.bf16.mxu0 %v14370_v35 }
 0x493   :  { %11908 = vmatpush3.bf16.msra.mxu0 %v14370_v35 }
 0x494   :  { %11910 = vmatprep.subr.bf16.mxu0 %v14379_v60 }
 0x497   :  { %11912 = vmatpush3.bf16.msra.mxu0 %v14379_v60 }
 0x498   :  { %11914 = vmatprep.subr.bf16.mxu0 %v14385_v42 }
 0x49b   :  { %11916 = vmatpush3.bf16.msra.mxu0 %v14385_v42 }
 0x49c   :  { %11918 = vmatprep.subr.bf16.mxu0 %v14391_v46 }
 0x49f   :  { %11920 = vmatpush3.bf16.msra.mxu0 %v14391_v46 }
 0x4a0   :  { %11922 = vmatprep.subr.bf16.mxu0 %v14397_v47 }
 0x4a3   :  { %11924 = vmatpush3.bf16.msra.mxu0 %v14397_v47 }
 0x4a4   :  { %11926 = vmatprep.subr.bf16.mxu0 %v13971_v30 }
 0x4a6   :  { %10198 = vmatmul.mubr.f32.vlgmr.msra.gmra.mrb[2].mxu0 %v14443_v56 }
 0x4a7   :  { %11928 = vmatpush3.bf16.msra.mxu0 %v13971_v30  ;;  %10232 = vmatprep.mubr.f32.mxu0 %v3122_v45 }
 0x4a8   :  { %11930 = vmatprep.subr.bf16.mxu0 %v13979_v41 }
 0x4ab   :  { %11932 = vmatpush3.bf16.msra.mxu0 %v13979_v41 }
 0x4ac   :  { %11934 = vmatprep.subr.bf16.mxu0 %v13998_v62 }
 0x4af   :  { %11936 = vmatpush3.bf16.msra.mxu0 %v13998_v62 }
 0x4b0   :  { %11938 = vmatprep.subr.bf16.mxu0 %v14018_v17 }
 0x4b3   :  { %11940 = vmatpush3.bf16.msra.mxu0 %v14018_v17 }
 0x4b4   :  { %11942 = vmatprep.subr.bf16.mxu0 %v14028_v33 }
 0x4b7   :  { %11944 = vmatpush3.bf16.msra.mxu0 %v14028_v33 }
 0x4b8   :  { %11946 = vmatprep.subr.bf16.mxu0 %v14085_v5 }
 0x4bb   :  { %11948 = vmatpush3.bf16.msra.mxu0 %v14085_v5 }
 0x4bc   :  { %11950 = vmatprep.subr.bf16.mxu0 %v14109_v27 }
 0x4bf   :  { %11952 = vmatpush3.bf16.msra.mxu0 %v14109_v27 }
 0x4c0   :  { %11954 = vmatprep.subr.bf16.mxu0 %v14145_v61 }
 0x4c3   :  { %11956 = vmatpush3.bf16.msra.mxu0 %v14145_v61 }
 0x4c4   :  { %11958 = vmatprep.subr.bf16.mxu0 %v14504_v31 }
 0x4c6   :  { %10233 = vmatmul.mubr.f32.vlgmr.msra.gmra.mrb[2].mxu0 %v3132_v63 }
 0x4c7   :  { %11960 = vmatpush3.bf16.msra.mxu0 %v14504_v31  ;;  %10267 = vmatprep.mubr.f32.mxu0 %v14439_v58 }
 0x4c8   :  { %11962 = vmatprep.subr.bf16.mxu0 %v14512_v40 }
 0x4cb   :  { %11964 = vmatpush3.bf16.msra.mxu0 %v14512_v40 }
 0x4cc   :  { %11966 = vmatprep.subr.bf16.mxu0 %v14523_v13 }
 0x4cf   :  { %11968 = vmatpush3.bf16.msra.mxu0 %v14523_v13 }
 0x4d0   :  { %11970 = vmatprep.subr.bf16.mxu0 %v14531_v25 }
 0x4d3   :  { %11972 = vmatpush3.bf16.msra.mxu0 %v14531_v25  ;;  %v14542_v44 = vpop.f32.mrb[4].mxu1 }
 0x4d4   :  { %v14545_v9 = vand.u32 4294901760, %v14542_v44  ;;  %v14547_v21 = vpop.f32.mrb[5].mxu1  ;;  %11974 = vmatprep.subr.bf16.mxu0 %v14539_v38 }
 0x4d5   :  { %v14557_v49 = vand.u32 4294901760, %v14547_v21 }
 0x4d6   :  { %v14561_v10 = vsub.f32 %v14542_v44, %v14545_v9 }
 0x4d7   :  { %v14565_v36 = vsub.f32 %v14547_v21, %v14557_v49  ;;  %11976 = vmatpush3.bf16.msra.mxu0 %v14539_v38 }
 0x4d8   :  { %v3832_v12 = vand.u32 4294901760, %v14561_v10  ;;  %11978 = vmatprep.subr.bf16.mxu0 %v14554_v43 }
 0x4d9   :  { %v3822_v23 = vand.u32 4294901760, %v14565_v36 }
 0x4da   :  { %v3833_v6 = vsub.f32 %v14561_v10, %v3832_v12 }
 0x4db   :  { %11980 = vmatpush3.bf16.msra.mxu0 %v14554_v43  ;;  %v3823_v55 = vsub.f32 %v14565_v36, %v3822_v23 }
 0x4dc   :  { %11982 = vmatprep.subr.bf16.mxu0 %v14574_v1  ;;  %v3834_v56 = vand.u32 4294901760, %v3833_v6 }
 0x4dd   :  { %v3824_v7 = vand.u32 4294901760, %v3823_v55 }
 0x4df   :  { %11984 = vmatpush3.bf16.msra.mxu0 %v14574_v1  ;;  %10337 = vmatprep.mubr.f32.mxu1 %v3824_v7 }
 0x4e0   :  { %10338 = vmatmul.mubr.f32.vlgmr.msra.gmra.mrb[8].mxu1 %v3834_v56  ;;  %11986 = vmatprep.subr.bf16.mxu0 %v14589_v0 }
 0x4e1   :  { %12056 = vmatpush3.bf16.msra.mxu1 %v14184_v8  ;;  %10372 = vmatprep.mubr.f32.mxu1 %v14557_v49 }
 0x4e2   :  { %12058 = vmatprep.subr.bf16.mxu1 %v14214_v4 }
 0x4e3   :  { %11988 = vmatpush3.bf16.msra.mxu0 %v14589_v0 }
 0x4e4   :  { %11990 = vmatprep.subr.bf16.mxu0 %v13971_v30 }
 0x4e5   :  { %12060 = vmatpush3.bf16.msra.mxu1 %v14214_v4 }
 0x4e6   :  { %10268 = vmatmul.mubr.f32.vlgmr.msra.gmra.mrb[2].mxu0 %v14434_v19  ;;  %12062 = vmatprep.subr.bf16.mxu1 %v14224_v52 }
 0x4e7   :  { %11992 = vmatpush3.bf16.msra.mxu0 %v13971_v30  ;;  %10302 = vmatprep.mubr.f32.mxu0 %v14439_v58 }
 0x4e8   :  { %11994 = vmatprep.subr.bf16.mxu0 %v13979_v41 }
 0x4e9   :  { %12064 = vmatpush3.bf16.msra.mxu1 %v14224_v52 }
 0x4ea   :  { %12066 = vmatprep.subr.bf16.mxu1 %v14251_v11 }
 0x4eb   :  { %11996 = vmatpush3.bf16.msra.mxu0 %v13979_v41 }
 0x4ec   :  { %11998 = vmatprep.subr.bf16.mxu0 %v13998_v62 }
 0x4ed   :  { %12068 = vmatpush3.bf16.msra.mxu1 %v14251_v11 }
 0x4ee   :  { %12070 = vmatprep.subr.bf16.mxu1 %v14297_v2 }
 0x4ef   :  { %12000 = vmatpush3.bf16.msra.mxu0 %v13998_v62 }
 0x4f0   :  { %12002 = vmatprep.subr.bf16.mxu0 %v14018_v17 }
 0x4f1   :  { %12072 = vmatpush3.bf16.msra.mxu1 %v14297_v2 }
 0x4f2   :  { %12074 = vmatprep.subr.bf16.mxu1 %v14307_v22 }
 0x4f3   :  { %12004 = vmatpush3.bf16.msra.mxu0 %v14018_v17 }
 0x4f4   :  { %12006 = vmatprep.subr.bf16.mxu0 %v14028_v33 }
 0x4f5   :  { %12076 = vmatpush3.bf16.msra.mxu1 %v14307_v22 }
 0x4f6   :  { %12078 = vmatprep.subr.bf16.mxu1 %v14332_v15 }
 0x4f7   :  { %12008 = vmatpush3.bf16.msra.mxu0 %v14028_v33 }
 0x4f8   :  { %12010 = vmatprep.subr.bf16.mxu0 %v14085_v5 }
 0x4f9   :  { %12080 = vmatpush3.bf16.msra.mxu1 %v14332_v15 }
 0x4fa   :  { %12082 = vmatprep.subr.bf16.mxu1 %v14345_v16 }
 0x4fb   :  { %12012 = vmatpush3.bf16.msra.mxu0 %v14085_v5 }
 0x4fc   :  { %12014 = vmatprep.subr.bf16.mxu0 %v14109_v27 }
 0x4fd   :  { %12084 = vmatpush3.bf16.msra.mxu1 %v14345_v16 }
 0x4fe   :  { %12086 = vmatprep.subr.bf16.mxu1 %v14350_v51 }
 0x4ff   :  { %12016 = vmatpush3.bf16.msra.mxu0 %v14109_v27 }
 0x500   :  { %10373 = vmatmul.mubr.f32.vlgmr.msra.gmra.mrb[8].mxu1 %v14545_v9  ;;  %12018 = vmatprep.subr.bf16.mxu0 %v14145_v61 }
 0x501   :  { %12088 = vmatpush3.bf16.msra.mxu1 %v14350_v51  ;;  %10407 = vmatprep.mubr.f32.mxu1 %v14565_v36 }
 0x502   :  { %12090 = vmatprep.subr.bf16.mxu1 %v14356_v32 }
 0x503   :  { %v14632_v50 = vpop.f32.mrb[6].mxu1  ;;  %12020 = vmatpush3.bf16.msra.mxu0 %v14145_v61 }
 0x504   :  { %v14635_v48 = vpop.f32.mrb[7].mxu1  ;;  %12214 = vmatprep.subr.bf16.mxu0 %v13971_v30 }
 0x505   :  { %12092 = vmatpush3.bf16.msra.mxu1 %v14356_v32 }
 0x506   :  { %10303 = vmatmul.mubr.f32.vlgmr.msra.gmra.mrb[2].mxu0 %v14434_v19  ;;  %12094 = vmatprep.subr.bf16.mxu1 %v14364_v28 }
 0x507   :  { %12216 = vmatpush3.bf16.msra.mxu0 %v13971_v30 }
 0x508   :  { %12218 = vmatprep.subr.bf16.mxu0 %v13979_v41 }
 0x509   :  { %12096 = vmatpush3.bf16.msra.mxu1 %v14364_v28 }
 0x50a   :  { %12098 = vmatprep.subr.bf16.mxu1 %v14370_v35 }
 0x50b   :  { %12220 = vmatpush3.bf16.msra.mxu0 %v13979_v41 }
 0x50c   :  { %12222 = vmatprep.subr.bf16.mxu0 %v13998_v62 }
 0x50d   :  { %12100 = vmatpush3.bf16.msra.mxu1 %v14370_v35 }
 0x50e   :  { %12102 = vmatprep.subr.bf16.mxu1 %v14379_v60 }
 0x50f   :  { %12224 = vmatpush3.bf16.msra.mxu0 %v13998_v62 }
 0x510   :  { %12226 = vmatprep.subr.bf16.mxu0 %v14018_v17 }
 0x511   :  { %12104 = vmatpush3.bf16.msra.mxu1 %v14379_v60 }
 0x512   :  { %12106 = vmatprep.subr.bf16.mxu1 %v14385_v42 }
 0x513   :  { %12228 = vmatpush3.bf16.msra.mxu0 %v14018_v17 }
 0x514   :  { %12230 = vmatprep.subr.bf16.mxu0 %v14028_v33 }
 0x515   :  { %12108 = vmatpush3.bf16.msra.mxu1 %v14385_v42 }
 0x516   :  { %12110 = vmatprep.subr.bf16.mxu1 %v14391_v46 }
 0x517   :  { %12232 = vmatpush3.bf16.msra.mxu0 %v14028_v33 }
 0x518   :  { %12234 = vmatprep.subr.bf16.mxu0 %v14085_v5 }
 0x519   :  { %12112 = vmatpush3.bf16.msra.mxu1 %v14391_v46 }
 0x51a   :  { %12114 = vmatprep.subr.bf16.mxu1 %v14397_v47 }
 0x51b   :  { %12236 = vmatpush3.bf16.msra.mxu0 %v14085_v5 }
 0x51c   :  { %12238 = vmatprep.subr.bf16.mxu0 %v14109_v27 }
 0x51d   :  { %12116 = vmatpush3.bf16.msra.mxu1 %v14397_v47 }
 0x51e   :  { %12118 = vmatprep.subr.bf16.mxu1 %v13971_v30 }
 0x51f   :  { %12240 = vmatpush3.bf16.msra.mxu0 %v14109_v27 }
 0x520   :  { %10408 = vmatmul.mubr.f32.vlgmr.msra.gmra.mrb[8].mxu1 %v14561_v10  ;;  %12242 = vmatprep.subr.bf16.mxu0 %v14145_v61 }
 0x521   :  { %12120 = vmatpush3.bf16.msra.mxu1 %v13971_v30  ;;  %10442 = vmatprep.mubr.f32.mxu1 %v3822_v23 }
 0x522   :  { %12122 = vmatprep.subr.bf16.mxu1 %v13979_v41 }
 0x523   :  { %12244 = vmatpush3.bf16.msra.mxu0 %v14145_v61 }
 0x524   :  { %12246 = vmatprep.subr.bf16.mxu0 %v14184_v8 }
 0x525   :  { %12124 = vmatpush3.bf16.msra.mxu1 %v13979_v41 }
 0x526   :  { %12126 = vmatprep.subr.bf16.mxu1 %v13998_v62 }
 0x529   :  { %12128 = vmatpush3.bf16.msra.mxu1 %v13998_v62 }
 0x52a   :  { %12130 = vmatprep.subr.bf16.mxu1 %v14018_v17 }
 0x52d   :  { %12132 = vmatpush3.bf16.msra.mxu1 %v14018_v17 }
 0x52e   :  { %12134 = vmatprep.subr.bf16.mxu1 %v14028_v33 }
 0x531   :  { %12136 = vmatpush3.bf16.msra.mxu1 %v14028_v33 }
 0x532   :  { %12138 = vmatprep.subr.bf16.mxu1 %v14085_v5 }
 0x535   :  { %12140 = vmatpush3.bf16.msra.mxu1 %v14085_v5 }
 0x536   :  { %12142 = vmatprep.subr.bf16.mxu1 %v14109_v27 }
 0x539   :  { %12144 = vmatpush3.bf16.msra.mxu1 %v14109_v27 }
 0x53a   :  { %12146 = vmatprep.subr.bf16.mxu1 %v14145_v61 }
 0x53d   :  { %12148 = vmatpush3.bf16.msra.mxu1 %v14145_v61 }
 0x53e   :  { %12150 = vmatprep.subr.bf16.mxu1 %v14504_v31 }
 0x540   :  { %10443 = vmatmul.mubr.f32.vlgmr.msra.gmra.mrb[8].mxu1 %v3832_v12 }
 0x541   :  { %12152 = vmatpush3.bf16.msra.mxu1 %v14504_v31  ;;  %10477 = vmatprep.mubr.f32.mxu1 %v14557_v49 }
 0x542   :  { %12154 = vmatprep.subr.bf16.mxu1 %v14512_v40 }
 0x545   :  { %12156 = vmatpush3.bf16.msra.mxu1 %v14512_v40 }
 0x546   :  { %12158 = vmatprep.subr.bf16.mxu1 %v14523_v13 }
 0x549   :  { %12160 = vmatpush3.bf16.msra.mxu1 %v14523_v13 }
 0x54a   :  { %12162 = vmatprep.subr.bf16.mxu1 %v14531_v25 }
 0x54d   :  { %12164 = vmatpush3.bf16.msra.mxu1 %v14531_v25 }
 0x54e   :  { %12166 = vmatprep.subr.bf16.mxu1 %v14539_v38 }
 0x551   :  { %12168 = vmatpush3.bf16.msra.mxu1 %v14539_v38 }
 0x552   :  { %12170 = vmatprep.subr.bf16.mxu1 %v14554_v43 }
 0x555   :  { %12172 = vmatpush3.bf16.msra.mxu1 %v14554_v43 }
 0x556   :  { %12174 = vmatprep.subr.bf16.mxu1 %v14574_v1 }
 0x559   :  { %12176 = vmatpush3.bf16.msra.mxu1 %v14574_v1 }
 0x55a   :  { %12178 = vmatprep.subr.bf16.mxu1 %v14589_v0 }
 0x55d   :  { %12180 = vmatpush3.bf16.msra.mxu1 %v14589_v0 }
 0x55e   :  { %12182 = vmatprep.subr.bf16.mxu1 %v13971_v30 }
 0x560   :  { %10478 = vmatmul.mubr.f32.vlgmr.msra.gmra.mrb[8].mxu1 %v14545_v9 }
 0x561   :  { %12184 = vmatpush3.bf16.msra.mxu1 %v13971_v30  ;;  %10512 = vmatprep.mubr.f32.mxu1 %v14557_v49 }
 0x562   :  { %12186 = vmatprep.subr.bf16.mxu1 %v13979_v41 }
 0x565   :  { %12188 = vmatpush3.bf16.msra.mxu1 %v13979_v41 }
 0x566   :  { %12190 = vmatprep.subr.bf16.mxu1 %v13998_v62 }
 0x569   :  { %12192 = vmatpush3.bf16.msra.mxu1 %v13998_v62 }
 0x56a   :  { %12194 = vmatprep.subr.bf16.mxu1 %v14018_v17 }
 0x56d   :  { %12196 = vmatpush3.bf16.msra.mxu1 %v14018_v17 }
 0x56e   :  { %12198 = vmatprep.subr.bf16.mxu1 %v14028_v33 }
 0x571   :  { %12200 = vmatpush3.bf16.msra.mxu1 %v14028_v33 }
 0x572   :  { %12202 = vmatprep.subr.bf16.mxu1 %v14085_v5 }
 0x575   :  { %12204 = vmatpush3.bf16.msra.mxu1 %v14085_v5 }
 0x576   :  { %12206 = vmatprep.subr.bf16.mxu1 %v14109_v27 }
 0x579   :  { %12208 = vmatpush3.bf16.msra.mxu1 %v14109_v27 }
 0x57a   :  { %12210 = vmatprep.subr.bf16.mxu1 %v14145_v61 }
 0x57d   :  { %12212 = vmatpush3.bf16.msra.mxu1 %v14145_v61 }
 0x580   :  { %10513 = vmatmul.mubr.f32.vlgmr.msra.gmra.mrb[8].mxu1 %v14545_v9 }
 0x5d9   :  { %v10304_v59 = vpop.f32.mrb[2].mxu0 }
 0x5da   :  { %13166 = vrsqrt.f32 %v10304_v59  ;;  %v3713_v19 = vpop.f32.mrb[3].mxu0  ;;  %vm3732_vm9 = vcmp.eq.f32.partialorder %v10304_v59, inf  ;;  %v3735_v54 = vand.u32 2147483648, %v10304_v59  ;;  %vm3734_vm10 = vcmp.eq.f32.partialorder %v10304_v59, 0.0 }
 0x5db   :  { %13168 = vrsqrt.f32 %v3713_v19  ;;  %vm3725_vm11 = vcmp.eq.f32.partialorder %v3713_v19, inf  ;;  %v3728_v24 = vand.u32 2147483648, %v3713_v19  ;;  %vm3727_vm12 = vcmp.eq.f32.partialorder %v3713_v19, 0.0 }
 0x5e4   :  { %v13167_v58 = vpop.eup %13166 }
 0x5e5   :  { %v13169_v63 = vpop.eup %13168  ;;  %v3731_v45 = vmul.f32 %v13167_v58, %v10304_v59 }
 0x5e6   :  { %v3724_v3 = vmul.f32 %v13169_v63, %v3713_v19 }
 0x5e7   :  { %v3733_v53 = vsel %vm3732_vm9, %v10304_v59, %v3731_v45 }
 0x5e8   :  { %v3736_v26 = vsel %vm3734_vm10, %v3735_v54, %v3733_v53  ;;  %v3726_v18 = vsel %vm3725_vm11, %v3713_v19, %v3724_v3 }
 0x5e9   :  { %v3738_v34 = vmax.f32 %v3736_v26, 1e-12  ;;  %v3729_v37 = vsel %vm3727_vm12, %v3728_v24, %v3726_v18 }
 0x5ea   :  { %v3737_v9 = vmax.f32 %v3729_v37, 1e-12 }
 0x5eb   :  { %13170 = vrcp.f32 %v3738_v34 }
 0x5ec   :  { %13172 = vrcp.f32 %v3737_v9 }
 0x5f5   :  { %v13171_v49 = vpop.eup %13170 }
 0x5f6   :  { %v13173_v10 = vpop.eup %13172  ;;  %v4442_v36 = vmul.f32 %v13171_v49, %v14431_v14 }
 0x5f7   :  { %v4440_v12 = vmul.f32 %v13173_v10, %v14436_v29 }
 0x653   :  { %v10514_v57 = vpop.f32.mrb[8].mxu1 }
 0x654   :  { %13174 = vrsqrt.f32 %v10514_v57  ;;  %v4413_v20 = vpop.f32.mrb[9].mxu1  ;;  %vm4432_vm13 = vcmp.eq.f32.partialorder %v10514_v57, inf  ;;  %v4435_v39 = vand.u32 2147483648, %v10514_v57  ;;  %vm4434_vm14 = vcmp.eq.f32.partialorder %v10514_v57, 0.0 }
 0x655   :  { %13176 = vrsqrt.f32 %v4413_v20  ;;  %vm4425_vm15 = vcmp.eq.f32.partialorder %v4413_v20, inf  ;;  %v4428_v59 = vand.u32 2147483648, %v4413_v20  ;;  %vm4427_vm0 = vcmp.eq.f32.partialorder %v4413_v20, 0.0 }
 0x65e   :  { %v13175_v23 = vpop.eup %13174 }
 0x65f   :  { %v13177_v6 = vpop.eup %13176  ;;  %v4431_v55 = vmul.f32 %v13175_v23, %v10514_v57  ;;  %v14920_v23 = vld [vmem:[%s15916_s14 + $0x70] sm:$0xff] }
 0x660   :  { %v4424_v7 = vmul.f32 %v13177_v6, %v4413_v20  ;;  %v14925_v6 = vld [vmem:[%s15916_s14 + $0x78] sm:$0xff] }
 0x661   :  { %v4433_v56 = vsel %vm4432_vm13, %v10514_v57, %v4431_v55 }
 0x662   :  { %v4436_v19 = vsel %vm4434_vm14, %v4435_v39, %v4433_v56  ;;  %v4426_v58 = vsel %vm4425_vm15, %v4413_v20, %v4424_v7  ;;  %v5198_v39 = vand.u32 4294901760, %v14920_v23  ;;  %v5201_v7 = vand.u32 4294901760, %v14925_v6 }
 0x663   :  { %v4438_v14 = vmax.f32 %v4436_v19, 1e-12  ;;  %v4429_v63 = vsel %vm4427_vm0, %v4428_v59, %v4426_v58 }
 0x664   :  { %v4437_v29 = vmax.f32 %v4429_v63, 1e-12  ;;  %v14936_v56 = vpack.c.bf16 %v5201_v7, %v5198_v39 }
 0x665   :  { %13178 = vrcp.f32 %v4438_v14 }
 0x666   :  { %13180 = vrcp.f32 %v4437_v29 }
 0x66f   :  { %v13179_v45 = vpop.eup %13178 }
 0x670   :  { %v13181_v54 = vpop.eup %13180  ;;  %v4446_v3 = vmul.f32 %v13179_v45, %v14542_v44 }
 0x671   :  { %v4444_v53 = vmul.f32 %v13181_v54, %v14547_v21 }
 0x672   :  { %v4448_v24 = vmul.f32 %v4446_v3, %v4442_v36 }
 0x673   :  { %v4447_v26 = vmul.f32 %v4444_v53, %v4440_v12 }
 0x674   :  { %v14729_v18 = vand.u32 4294901760, %v4448_v24 }
 0x675   :  { %v14731_v34 = vand.u32 4294901760, %v4447_v26 }
 0x676   :  { %v14734_v37 = vsub.f32 %v4448_v24, %v14729_v18 }
 0x677   :  { %v4531_v9 = vsub.f32 %v4447_v26, %v14731_v34 }
 0x678   :  { %v4542_v49 = vand.u32 4294901760, %v14734_v37 }
 0x679   :  { %v4532_v10 = vand.u32 4294901760, %v4531_v9 }
 0x67a   :  { %v4543_v44 = vsub.f32 %v14734_v37, %v4542_v49 }
 0x67b   :  { %v4533_v57 = vsub.f32 %v4531_v9, %v4532_v10 }
 0x67c   :  { %v4544_v36 = vand.u32 4294901760, %v4543_v44 }
 0x67d   :  { %v4534_v21 = vand.u32 4294901760, %v4533_v57 }
 0x67f   :  { %10547 = vmatprep.mubr.f32.mxu0 %v4534_v21 }
 0x680   :  { %10548 = vmatmul.mubr.f32.vlgmr.msra.gmra.mrb[4].mxu0 %v4544_v36 }
 0x681   :  { %12248 = vmatpush3.bf16.msra.mxu0 %v14184_v8  ;;  %10582 = vmatprep.mubr.f32.mxu0 %v14731_v34  ;;  %v14762_v8 = vld [vmem:[%s15916_s14] sm:$0xff] }
 0x682   :  { %12250 = vmatprep.subr.bf16.mxu0 %v14214_v4 }
 0x685   :  { %12252 = vmatpush3.bf16.msra.mxu0 %v14214_v4  ;;  %v14767_v4 = vld [vmem:[%s15916_s14 + $0x8] sm:$0xff] }
 0x686   :  { %12254 = vmatprep.subr.bf16.mxu0 %v14224_v52 }
 0x689   :  { %12256 = vmatpush3.bf16.msra.mxu0 %v14224_v52  ;;  %v14772_v52 = vld [vmem:[%s15916_s14 + $0x10] sm:$0xff] }
 0x68a   :  { %12258 = vmatprep.subr.bf16.mxu0 %v14251_v11 }
 0x68d   :  { %12260 = vmatpush3.bf16.msra.mxu0 %v14251_v11  ;;  %v5156_v11 = vand.u32 4294901760, %v14762_v8 }
 0x68e   :  { %12262 = vmatprep.subr.bf16.mxu0 %v14297_v2 }
 0x68f   :  { %v14941_v59 = vsub.f32 %v14762_v8, %v5156_v11 }
 0x691   :  { %12264 = vmatpush3.bf16.msra.mxu0 %v14297_v2  ;;  %v5159_v2 = vand.u32 4294901760, %v14767_v4  ;;  %v5259_v58 = vand.u32 4294901760, %v14941_v59 }
 0x692   :  { %12266 = vmatprep.subr.bf16.mxu0 %v14307_v22 }
 0x693   :  { %v14946_v19 = vsub.f32 %v14767_v4, %v5159_v2  ;;  %v5260_v63 = vsub.f32 %v14941_v59, %v5259_v58 }
 0x695   :  { %12268 = vmatpush3.bf16.msra.mxu0 %v14307_v22  ;;  %v5162_v22 = vand.u32 4294901760, %v14772_v52  ;;  %v5266_v14 = vand.u32 4294901760, %v14946_v19  ;;  %v5261_v45 = vand.u32 4294901760, %v5260_v63 }
 0x696   :  { %12270 = vmatprep.subr.bf16.mxu0 %v14332_v15 }
 0x697   :  { %v5267_v29 = vsub.f32 %v14946_v19, %v5266_v14 }
 0x699   :  { %12272 = vmatpush3.bf16.msra.mxu0 %v14332_v15  ;;  %v14780_v15 = vld [vmem:[%s15916_s14 + $0x18] sm:$0xff]  ;;  %v5268_v54 = vand.u32 4294901760, %v5267_v29 }
 0x69a   :  { %12274 = vmatprep.subr.bf16.mxu0 %v14345_v16 }
 0x69b   :  { %v14959_v3 = vpack.c.bf16 %v5268_v54, %v5261_v45 }
 0x69d   :  { %12276 = vmatpush3.bf16.msra.mxu0 %v14345_v16  ;;  %v5165_v16 = vand.u32 4294901760, %v14780_v15 }
 0x69e   :  { %12278 = vmatprep.subr.bf16.mxu0 %v14350_v51 }
 0x69f   :  { %v14795_v12 = vpack.c.bf16 %v5165_v16, %v5162_v22 }
 0x6a0   :  { %10583 = vmatmul.mubr.f32.vlgmr.msra.gmra.mrb[4].mxu0 %v14729_v18 }
 0x6a1   :  { %12280 = vmatpush3.bf16.msra.mxu0 %v14350_v51  ;;  %10617 = vmatprep.mubr.f32.mxu0 %v4531_v9  ;;  %v14789_v51 = vpack.c.bf16 %v5159_v2, %v5156_v11 }
 0x6a2   :  { %12282 = vmatprep.subr.bf16.mxu0 %v14356_v32 }
 0x6a3   :  { %12406 = vmatprep.subr.bf16.mxu1 %v14789_v51 }
 0x6a4   :  { %12408 = vmatpush3.bf16.msra.mxu1 %v14789_v51 }
 0x6a5   :  { %12284 = vmatpush3.bf16.msra.mxu0 %v14356_v32  ;;  %12410 = vmatprep.subr.bf16.mxu1 %v14795_v12 }
 0x6a6   :  { %12286 = vmatprep.subr.bf16.mxu0 %v14364_v28 }
 0x6a8   :  { %12412 = vmatpush3.bf16.msra.mxu1 %v14795_v12 }
 0x6a9   :  { %12288 = vmatpush3.bf16.msra.mxu0 %v14364_v28 }
 0x6aa   :  { %12290 = vmatprep.subr.bf16.mxu0 %v14370_v35 }
 0x6ad   :  { %12292 = vmatpush3.bf16.msra.mxu0 %v14370_v35  ;;  %v5147_v35 = vld [vmem:[%s15916_s14 + $0x40] sm:$0xff] }
 0x6ae   :  { %12294 = vmatprep.subr.bf16.mxu0 %v14379_v60 }
 0x6b1   :  { %12296 = vmatpush3.bf16.msra.mxu0 %v14379_v60  ;;  %v5148_v60 = vld [vmem:[%s15916_s14 + $0x48] sm:$0xff] }
 0x6b2   :  { %12298 = vmatprep.subr.bf16.mxu0 %v14385_v42 }
 0x6b5   :  { %12300 = vmatpush3.bf16.msra.mxu0 %v14385_v42  ;;  %v5149_v42 = vld [vmem:[%s15916_s14 + $0x50] sm:$0xff] }
 0x6b6   :  { %12302 = vmatprep.subr.bf16.mxu0 %v14391_v46 }
 0x6b9   :  { %12304 = vmatpush3.bf16.msra.mxu0 %v14391_v46  ;;  %v5180_v46 = vand.u32 4294901760, %v5147_v35 }
 0x6ba   :  { %12306 = vmatprep.subr.bf16.mxu0 %v14397_v47 }
 0x6bb   :  { %v14985_v4 = vsub.f32 %v5147_v35, %v5180_v46 }
 0x6bd   :  { %12308 = vmatpush3.bf16.msra.mxu0 %v14397_v47  ;;  %v5183_v47 = vand.u32 4294901760, %v5148_v60 }
 0x6be   :  { %12310 = vmatprep.subr.bf16.mxu0 %v13971_v30 }
 0x6bf   :  { %v14987_v11 = vsub.f32 %v5148_v60, %v5183_v47 }
 0x6c0   :  { %10618 = vmatmul.mubr.f32.vlgmr.msra.gmra.mrb[4].mxu0 %v14734_v37 }
 0x6c1   :  { %12312 = vmatpush3.bf16.msra.mxu0 %v13971_v30  ;;  %10652 = vmatprep.mubr.f32.mxu0 %v4532_v10 }
 0x6c2   :  { %12314 = vmatprep.subr.bf16.mxu0 %v13979_v41 }
 0x6c5   :  { %12316 = vmatpush3.bf16.msra.mxu0 %v13979_v41 }
 0x6c6   :  { %12318 = vmatprep.subr.bf16.mxu0 %v13998_v62 }
 0x6c9   :  { %12320 = vmatpush3.bf16.msra.mxu0 %v13998_v62 }
 0x6ca   :  { %12322 = vmatprep.subr.bf16.mxu0 %v14018_v17 }
 0x6cd   :  { %12324 = vmatpush3.bf16.msra.mxu0 %v14018_v17 }
 0x6ce   :  { %12326 = vmatprep.subr.bf16.mxu0 %v14028_v33 }
 0x6d1   :  { %12328 = vmatpush3.bf16.msra.mxu0 %v14028_v33 }
 0x6d2   :  { %12330 = vmatprep.subr.bf16.mxu0 %v14085_v5 }
 0x6d5   :  { %12332 = vmatpush3.bf16.msra.mxu0 %v14085_v5 }
 0x6d6   :  { %12334 = vmatprep.subr.bf16.mxu0 %v14109_v27 }
 0x6d9   :  { %12336 = vmatpush3.bf16.msra.mxu0 %v14109_v27 }
 0x6da   :  { %12338 = vmatprep.subr.bf16.mxu0 %v14145_v61 }
 0x6dd   :  { %12340 = vmatpush3.bf16.msra.mxu0 %v14145_v61 }
 0x6de   :  { %12342 = vmatprep.subr.bf16.mxu0 %v14504_v31 }
 0x6e0   :  { %10653 = vmatmul.mubr.f32.vlgmr.msra.gmra.mrb[4].mxu0 %v4542_v49 }
 0x6e1   :  { %12344 = vmatpush3.bf16.msra.mxu0 %v14504_v31  ;;  %10687 = vmatprep.mubr.f32.mxu0 %v14731_v34  ;;  %v5150_v31 = vld [vmem:[%s15916_s14 + $0x58] sm:$0xff] }
 0x6e2   :  { %12346 = vmatprep.subr.bf16.mxu0 %v14512_v40 }
 0x6e5   :  { %12348 = vmatpush3.bf16.msra.mxu0 %v14512_v40  ;;  %v5186_v40 = vand.u32 4294901760, %v5149_v42 }
 0x6e6   :  { %12350 = vmatprep.subr.bf16.mxu0 %v14523_v13 }
 0x6e9   :  { %12352 = vmatpush3.bf16.msra.mxu0 %v14523_v13  ;;  %v14903_v13 = vld [vmem:[%s15916_s14 + $0x60] sm:$0xff] }
 0x6ea   :  { %12354 = vmatprep.subr.bf16.mxu0 %v14531_v25 }
 0x6ed   :  { %12356 = vmatpush3.bf16.msra.mxu0 %v14531_v25  ;;  %v14908_v25 = vld [vmem:[%s15916_s14 + $0x68] sm:$0xff] }
 0x6ee   :  { %12358 = vmatprep.subr.bf16.mxu0 %v14539_v38 }
 0x6f1   :  { %12360 = vmatpush3.bf16.msra.mxu0 %v14539_v38  ;;  %v5189_v38 = vand.u32 4294901760, %v5150_v31 }
 0x6f2   :  { %12362 = vmatprep.subr.bf16.mxu0 %v14554_v43 }
 0x6f3   :  { %v14915_v20 = vpack.c.bf16 %v5189_v38, %v5186_v40 }
 0x6f5   :  { %12364 = vmatpush3.bf16.msra.mxu0 %v14554_v43  ;;  %v14911_v43 = vpack.c.bf16 %v5183_v47, %v5180_v46 }
 0x6f6   :  { %12366 = vmatprep.subr.bf16.mxu0 %v14574_v1 }
 0x6f9   :  { %12368 = vmatpush3.bf16.msra.mxu0 %v14574_v1  ;;  %v5192_v1 = vand.u32 4294901760, %v14903_v13 }
 0x6fa   :  { %12370 = vmatprep.subr.bf16.mxu0 %v14589_v0 }
 0x6fd   :  { %12372 = vmatpush3.bf16.msra.mxu0 %v14589_v0  ;;  %v5195_v0 = vand.u32 4294901760, %v14908_v25 }
 0x6fe   :  { %12374 = vmatprep.subr.bf16.mxu0 %v13971_v30 }
 0x6ff   :  { %v14930_v55 = vpack.c.bf16 %v5195_v0, %v5192_v1 }
 0x700   :  { %10688 = vmatmul.mubr.f32.vlgmr.msra.gmra.mrb[4].mxu0 %v14729_v18 }
 0x701   :  { %12376 = vmatpush3.bf16.msra.mxu0 %v13971_v30  ;;  %10722 = vmatprep.mubr.f32.mxu0 %v14731_v34  ;;  %v5143_v30 = vld [vmem:[%s15916_s14 + $0x20] sm:$0xff] }
 0x702   :  { %12378 = vmatprep.subr.bf16.mxu0 %v13979_v41 }
 0x705   :  { %12380 = vmatpush3.bf16.msra.mxu0 %v13979_v41  ;;  %v5144_v41 = vld [vmem:[%s15916_s14 + $0x28] sm:$0xff] }
 0x706   :  { %12382 = vmatprep.subr.bf16.mxu0 %v13998_v62 }
 0x709   :  { %12384 = vmatpush3.bf16.msra.mxu0 %v13998_v62  ;;  %v5168_v62 = vand.u32 4294901760, %v5143_v30 }
 0x70a   :  { %12386 = vmatprep.subr.bf16.mxu0 %v14018_v17 }
 0x70b   :  { %v14961_v53 = vsub.f32 %v5143_v30, %v5168_v62 }
 0x70d   :  { %12388 = vmatpush3.bf16.msra.mxu0 %v14018_v17  ;;  %v5171_v17 = vand.u32 4294901760, %v5144_v41  ;;  %v5287_v26 = vand.u32 4294901760, %v14961_v53 }
 0x70e   :  { %12390 = vmatprep.subr.bf16.mxu0 %v14028_v33 }
 0x70f   :  { %v14963_v24 = vsub.f32 %v5144_v41, %v5171_v17  ;;  %v5288_v34 = vsub.f32 %v14961_v53, %v5287_v26  ;;  %v15942_v41 = vand.u32 4294901760, %v14985_v4 }
 0x711   :  { %12392 = vmatpush3.bf16.msra.mxu0 %v14028_v33  ;;  %v14875_v33 = vpack.c.bf16 %v5171_v17, %v5168_v62  ;;  %v5289_v10 = vand.u32 4294901760, %v5288_v34  ;;  %v15941_v62 = vand.u32 4294901760, %v14987_v11 }
 0x712   :  { %12394 = vmatprep.subr.bf16.mxu0 %v14085_v5 }
 0x713   :  { %12414 = vmatprep.subr.bf16.mxu1 %v14875_v33 }
 0x714   :  { %12416 = vmatpush3.bf16.msra.mxu1 %v14875_v33 }
 0x715   :  { %12396 = vmatpush3.bf16.msra.mxu0 %v14085_v5  ;;  %v5145_v5 = vld [vmem:[%s15916_s14 + $0x30] sm:$0xff] }
 0x716   :  { %12398 = vmatprep.subr.bf16.mxu0 %v14109_v27 }
 0x719   :  { %12400 = vmatpush3.bf16.msra.mxu0 %v14109_v27  ;;  %v5146_v27 = vld [vmem:[%s15916_s14 + $0x38] sm:$0xff] }
 0x71a   :  { %12402 = vmatprep.subr.bf16.mxu0 %v14145_v61  ;;  %v5177_v32 = vand.u32 4294901760, %v5146_v27 }
 0x71c   :  { %v14976_v49 = vsub.f32 %v5146_v27, %v5177_v32  ;;  %v5323_v27 = vsub.f32 %v14987_v11, %v15941_v62 }
 0x71d   :  { %12404 = vmatpush3.bf16.msra.mxu0 %v14145_v61  ;;  %v5174_v61 = vand.u32 4294901760, %v5145_v5 }
 0x71e   :  { %v15943_v21 = vand.u32 4294901760, %v14976_v49  ;;  %v5324_v46 = vand.u32 4294901760, %v5323_v27  ;;  %v12469_v27 = vpack.c.bf16 %v14946_v19, %v14941_v59  ;;  %v15968_v19 = vand.u32 4294901760, %v14976_v49 }
 0x71f   :  { %v14885_v28 = vpack.c.bf16 %v5177_v32, %v5174_v61  ;;  %v14974_v9 = vsub.f32 %v5145_v5, %v5174_v61  ;;  %v5316_v5 = vsub.f32 %v14985_v4, %v15942_v41  ;;  %v15000_v61 = vsub.f32 %v5149_v42, %v5186_v40 }
 0x720   :  { %10723 = vmatmul.mubr.f32.vlgmr.msra.gmra.mrb[4].mxu0 %v14729_v18  ;;  %v5294_v18 = vand.u32 4294901760, %v14963_v24  ;;  %v5309_v2 = vsub.f32 %v14976_v49, %v15943_v21  ;;  %v15002_v32 = vsub.f32 %v5150_v31, %v5189_v38  ;;  %v15017_v31 = vsub.f32 %v14903_v13, %v5192_v1 }
 0x721   :  { %12418 = vmatprep.subr.bf16.mxu1 %v14885_v28  ;;  %v5301_v57 = vand.u32 4294901760, %v14974_v9  ;;  %v5317_v60 = vand.u32 4294901760, %v5316_v5  ;;  %v15940_v47 = vand.u32 4294901760, %v15000_v61  ;;  %v15020_v40 = vsub.f32 %v14908_v25, %v5195_v0 }
 0x722   :  { %12420 = vmatpush3.bf16.msra.mxu1 %v14885_v28  ;;  %v5295_v37 = vsub.f32 %v14963_v24, %v5294_v18  ;;  %v5310_v17 = vand.u32 4294901760, %v5309_v2  ;;  %v15939_v63 = vand.u32 4294901760, %v15002_v32  ;;  %v15938_v34 = vand.u32 4294901760, %v15017_v31 }
 0x723   :  { %12422 = vmatprep.subr.bf16.mxu1 %v14911_v43  ;;  %v5302_v8 = vsub.f32 %v14974_v9, %v5301_v57  ;;  %v15008_v29 = vpack.c.bf16 %v5324_v46, %v5317_v60  ;;  %v5330_v45 = vsub.f32 %v15000_v61, %v15940_v47  ;;  %v15033_v13 = vsub.f32 %v14925_v6, %v5201_v7 }
 0x724   :  { %v5296_v44 = vand.u32 4294901760, %v5295_v37  ;;  %v5337_v42 = vsub.f32 %v15002_v32, %v15939_v63  ;;  %v15937_v37 = vand.u32 4294901760, %v15020_v40  ;;  %v15050_v60 = vpack.c.bf16 %v14963_v24, %v14961_v53 }
 0x725   :  { %v5303_v30 = vand.u32 4294901760, %v5302_v8  ;;  %v5331_v38 = vand.u32 4294901760, %v5330_v45  ;;  %v15030_v8 = vsub.f32 %v14920_v23, %v5198_v39  ;;  %v15935_v2 = vand.u32 4294901760, %v15033_v13 }
 0x726   :  { %12424 = vmatpush3.bf16.msra.mxu1 %v14911_v43  ;;  %v14980_v36 = vpack.c.bf16 %v5296_v44, %v5289_v10  ;;  %v5338_v54 = vand.u32 4294901760, %v5337_v42  ;;  %v5344_v44 = vsub.f32 %v15017_v31, %v15938_v34  ;;  %v5351_v25 = vsub.f32 %v15020_v40, %v15937_v37 }
 0x727   :  { %12426 = vmatprep.subr.bf16.mxu1 %v14915_v20  ;;  %v15004_v35 = vpack.c.bf16 %v5310_v17, %v5303_v30  ;;  %v15936_v0 = vand.u32 4294901760, %v15030_v8  ;;  %v5365_v23 = vsub.f32 %v15033_v13, %v15935_v2  ;;  %v15054_v46 = vpack.c.bf16 %v14976_v49, %v14974_v9 }
 0x728   :  { %v15024_v10 = vpack.c.bf16 %v5338_v54, %v5331_v38  ;;  %v5345_v1 = vand.u32 4294901760, %v5344_v44  ;;  %v5352_v30 = vand.u32 4294901760, %v5351_v25  ;;  %v15058_v45 = vpack.c.bf16 %v14987_v11, %v14985_v4 }
 0x729   :  { %v5358_v17 = vsub.f32 %v15030_v8, %v15936_v0  ;;  %v5366_v7 = vand.u32 4294901760, %v5365_v23  ;;  %v15062_v42 = vpack.c.bf16 %v15002_v32, %v15000_v61  ;;  %v15066_v38 = vpack.c.bf16 %v15020_v40, %v15017_v31 }
 0x72a   :  { %12428 = vmatpush3.bf16.msra.mxu1 %v14915_v20  ;;  %v12461_v6 = vpack.c.bf16 %v5352_v30, %v5345_v1  ;;  %v15070_v54 = vpack.c.bf16 %v15033_v13, %v15030_v8  ;;  %v12541_v59 = vpack.c.bf16 %v5294_v18, %v5287_v26  ;;  %v15971_v53 = vand.u32 4294901760, %v15000_v61 }
 0x72b   :  { %12430 = vmatprep.subr.bf16.mxu1 %v14930_v55  ;;  %v5359_v39 = vand.u32 4294901760, %v5358_v17  ;;  %v15972_v24 = vand.u32 4294901760, %v15002_v32  ;;  %v15973_v18 = vand.u32 4294901760, %v15017_v31  ;;  %v15974_v9 = vand.u32 4294901760, %v15020_v40  ;;  %v5853_v31 = vld [vmem:[%s15917_s15 + $0x40] sm:$0xff]  ;;  %v5854_v40 = vld [vmem:[%s15917_s15 + $0x48] sm:$0xff] }
 0x72d   :  { %v12465_v5 = vpack.c.bf16 %v5366_v7, %v5359_v39  ;;  %v15075_v39 = vsub.f32 %v14772_v52, %v5162_v22  ;;  %v15080_v7 = vsub.f32 %v14780_v15, %v5165_v16  ;;  %v12553_v26 = vpack.c.bf16 %v15972_v24, %v15971_v53 }
 0x72e   :  { %12432 = vmatpush3.bf16.msra.mxu1 %v14930_v55  ;;  %v12557_v49 = vpack.c.bf16 %v15974_v9, %v15973_v18 }
 0x72f   :  { %12434 = vmatprep.subr.bf16.mxu1 %v14936_v56  ;;  %v5273_v2 = vand.u32 4294901760, %v15075_v39 }
 0x731   :  { %v5274_v15 = vsub.f32 %v15075_v39, %v5273_v2 }
 0x732   :  { %12436 = vmatpush3.bf16.msra.mxu1 %v14936_v56 }
 0x733   :  { %12438 = vmatprep.subr.bf16.mxu1 %v14959_v3  ;;  %v5275_v34 = vand.u32 4294901760, %v5274_v15 }
 0x7f3   :  { %v10724_v44 = vpop.f32.mrb[4].mxu0 }
 0x7f4   :  { %v5134_v25 = vmul.f32 0.35355338, %v10724_v44  ;;  %v5123_v1 = vpop.f32.mrb[5].mxu0  ;;  %v5280_v44 = vand.u32 4294901760, %v15080_v7 }
 0x7f5   :  { %v5133_v30 = vmul.f32 0.35355338, %v5123_v1 }
 0x7f6   :  { %v5137_v17 = vmul.f32 1.442695, %v5134_v25  ;;  %v5281_v22 = vsub.f32 %v15080_v7, %v5280_v44 }
 0x7f7   :  { %v5135_v23 = vmul.f32 1.442695, %v5133_v30 }
 0x7f8   :  { %13182 = vpow2.f32 %v5137_v17  ;;  %v5282_v63 = vand.u32 4294901760, %v5281_v22 }
 0x7f9   :  { %13184 = vpow2.f32 %v5135_v23 }
 0x7fa   :  { %v12441_v21 = vpack.c.bf16 %v5282_v63, %v5275_v34 }
 0x802   :  { %v15084_v0 = vpop.eup %13182 }
 0x803   :  { %v15086_v25 = vpop.eup %13184  ;;  %v15089_v1 = vand.u32 4294901760, %v15084_v0 }
 0x804   :  { %v15092_v30 = vand.u32 4294901760, %v15086_v25 }
 0x805   :  { %v15096_v52 = vsub.f32 %v15084_v0, %v15089_v1 }
 0x806   :  { %v15106_v16 = vsub.f32 %v15086_v25, %v15092_v30 }
 0x807   :  { %v5248_v17 = vand.u32 4294901760, %v15096_v52 }
 0x808   :  { %v5238_v23 = vand.u32 4294901760, %v15106_v16 }
 0x809   :  { %v5249_v37 = vsub.f32 %v15096_v52, %v5248_v17 }
 0x80a   :  { %v5239_v47 = vsub.f32 %v15106_v16, %v5238_v23 }
 0x80b   :  { %v5250_v41 = vand.u32 4294901760, %v5249_v37 }
 0x80c   :  { %v5240_v62 = vand.u32 4294901760, %v5239_v47  ;;  %v15148_v47 = vld [vmem:[%s15917_s15 + $0x18] sm:$0xff] }
 0x80e   :  { %10757 = vmatprep.mubr.f32.mxu1 %v5240_v62 }
 0x80f   :  { %10758 = vmatmul.mubr.f32.vlgmr.msra.gmra.mrb[10].mxu1 %v5250_v41  ;;  %v15140_v41 = vld [vmem:[%s15917_s15 + $0x10] sm:$0xff] }
 0x810   :  { %12440 = vmatpush3.bf16.msra.mxu1 %v14959_v3  ;;  %10792 = vmatprep.mubr.f32.mxu1 %v15092_v30  ;;  %v12473_v3 = vpack.c.bf16 %v15080_v7, %v15075_v39  ;;  %v5868_v63 = vand.u32 4294901760, %v15140_v41  ;;  %v5858_v39 = vld [vmem:[%s15917_s15 + $0x68] sm:$0xff] }
 0x811   :  { %12442 = vmatprep.subr.bf16.mxu1 %v12441_v21 }
 0x814   :  { %12444 = vmatpush3.bf16.msra.mxu1 %v12441_v21  ;;  %v15130_v21 = vld [vmem:[%s15917_s15] sm:$0xff] }
 0x815   :  { %12446 = vmatprep.subr.bf16.mxu1 %v14980_v36  ;;  %v5862_v62 = vand.u32 4294901760, %v15130_v21 }
 0x818   :  { %12448 = vmatpush3.bf16.msra.mxu1 %v14980_v36  ;;  %v15135_v36 = vld [vmem:[%s15917_s15 + $0x8] sm:$0xff] }
 0x819   :  { %12450 = vmatprep.subr.bf16.mxu1 %v15004_v35 }
 0x81c   :  { %12452 = vmatpush3.bf16.msra.mxu1 %v15004_v35  ;;  %v5865_v35 = vand.u32 4294901760, %v15135_v36 }
 0x81d   :  { %12454 = vmatprep.subr.bf16.mxu1 %v15008_v29 }
 0x81e   :  { %v15156_v34 = vpack.c.bf16 %v5865_v35, %v5862_v62 }
 0x820   :  { %12456 = vmatpush3.bf16.msra.mxu1 %v15008_v29  ;;  %v5871_v29 = vand.u32 4294901760, %v15148_v47  ;;  %12598 = vmatprep.subr.bf16.mxu0 %v15156_v34 }
 0x821   :  { %12458 = vmatprep.subr.bf16.mxu1 %v15024_v10  ;;  %12600 = vmatpush3.bf16.msra.mxu0 %v15156_v34 }
 0x822   :  { %v15162_v37 = vpack.c.bf16 %v5871_v29, %v5868_v63 }
 0x824   :  { %12460 = vmatpush3.bf16.msra.mxu1 %v15024_v10  ;;  %12602 = vmatprep.subr.bf16.mxu0 %v15162_v37  ;;  %v12533_v10 = vpack.c.bf16 %v5266_v14, %v5259_v58  ;;  %v12545_v58 = vpack.c.bf16 %v15968_v19, %v5301_v57  ;;  %v15969_v14 = vand.u32 4294901760, %v14985_v4  ;;  %v15975_v57 = vand.u32 4294901760, %v15030_v8 }
 0x825   :  { %12462 = vmatprep.subr.bf16.mxu1 %v12461_v6  ;;  %12604 = vmatpush3.bf16.msra.mxu0 %v15162_v37  ;;  %v15976_v4 = vand.u32 4294901760, %v15033_v13  ;;  %v5886_v8 = vand.u32 4294901760, %v5853_v31  ;;  %v5889_v13 = vand.u32 4294901760, %v5854_v40 }
 0x828   :  { %12464 = vmatpush3.bf16.msra.mxu1 %v12461_v6  ;;  %v12537_v6 = vpack.c.bf16 %v5280_v44, %v5273_v2  ;;  %v15970_v2 = vand.u32 4294901760, %v14987_v11  ;;  %v12561_v11 = vpack.c.bf16 %v15976_v4, %v15975_v57  ;;  %v5901_v44 = vand.u32 4294901760, %v5858_v39 }
 0x829   :  { %12466 = vmatprep.subr.bf16.mxu1 %v12465_v5 }
 0x82c   :  { %12468 = vmatpush3.bf16.msra.mxu1 %v12465_v5  ;;  %v12549_v5 = vpack.c.bf16 %v15970_v2, %v15969_v14 }
 0x82d   :  { %12470 = vmatprep.subr.bf16.mxu1 %v12469_v27 }
 0x82f   :  { %10793 = vmatmul.mubr.f32.vlgmr.msra.gmra.mrb[10].mxu1 %v15089_v1 }
 0x830   :  { %12472 = vmatpush3.bf16.msra.mxu1 %v12469_v27  ;;  %10827 = vmatprep.mubr.f32.mxu1 %v15106_v16  ;;  %v15277_v27 = vpack.c.bf16 %v5889_v13, %v5886_v8  ;;  %v15308_v16 = vsub.f32 %v15130_v21, %v5862_v62 }
 0x831   :  { %12474 = vmatprep.subr.bf16.mxu1 %v12473_v3 }
 0x834   :  { %12476 = vmatpush3.bf16.msra.mxu1 %v12473_v3  ;;  %v5965_v3 = vand.u32 4294901760, %v15308_v16 }
 0x835   :  { %12478 = vmatprep.subr.bf16.mxu1 %v15050_v60 }
 0x836   :  { %v5966_v21 = vsub.f32 %v15308_v16, %v5965_v3 }
 0x838   :  { %12480 = vmatpush3.bf16.msra.mxu1 %v15050_v60  ;;  %v5855_v60 = vld [vmem:[%s15917_s15 + $0x50] sm:$0xff]  ;;  %v5967_v62 = vand.u32 4294901760, %v5966_v21 }
 0x839   :  { %12482 = vmatprep.subr.bf16.mxu1 %v15054_v46 }
 0x83c   :  { %12484 = vmatpush3.bf16.msra.mxu1 %v15054_v46  ;;  %v5856_v46 = vld [vmem:[%s15917_s15 + $0x58] sm:$0xff] }
 0x83d   :  { %12486 = vmatprep.subr.bf16.mxu1 %v15058_v45 }
 0x840   :  { %12488 = vmatpush3.bf16.msra.mxu1 %v15058_v45  ;;  %v5892_v45 = vand.u32 4294901760, %v5855_v60 }
 0x841   :  { %12490 = vmatprep.subr.bf16.mxu1 %v15062_v42 }
 0x844   :  { %12492 = vmatpush3.bf16.msra.mxu1 %v15062_v42  ;;  %v5895_v42 = vand.u32 4294901760, %v5856_v46 }
 0x845   :  { %12494 = vmatprep.subr.bf16.mxu1 %v15066_v38 }
 0x848   :  { %12496 = vmatpush3.bf16.msra.mxu1 %v15066_v38  ;;  %v15287_v38 = vpack.c.bf16 %v5895_v42, %v5892_v45 }
 0x849   :  { %12498 = vmatprep.subr.bf16.mxu1 %v15070_v54 }
 0x84c   :  { %12500 = vmatpush3.bf16.msra.mxu1 %v15070_v54  ;;  %v5857_v54 = vld [vmem:[%s15917_s15 + $0x60] sm:$0xff] }
 0x84d   :  { %12502 = vmatprep.subr.bf16.mxu1 %v14789_v51  ;;  %v5898_v7 = vand.u32 4294901760, %v5857_v54 }
 0x84f   :  { %10828 = vmatmul.mubr.f32.vlgmr.msra.gmra.mrb[10].mxu1 %v15096_v52  ;;  %v15303_v52 = vpack.c.bf16 %v5901_v44, %v5898_v7 }
 0x850   :  { %12504 = vmatpush3.bf16.msra.mxu1 %v14789_v51  ;;  %10862 = vmatprep.mubr.f32.mxu1 %v5238_v23 }
 0x851   :  { %12506 = vmatprep.subr.bf16.mxu1 %v14795_v12 }
 0x854   :  { %12508 = vmatpush3.bf16.msra.mxu1 %v14795_v12 }
 0x855   :  { %12510 = vmatprep.subr.bf16.mxu1 %v14875_v33 }
 0x858   :  { %12512 = vmatpush3.bf16.msra.mxu1 %v14875_v33 }
 0x859   :  { %12514 = vmatprep.subr.bf16.mxu1 %v14885_v28 }
 0x85c   :  { %12516 = vmatpush3.bf16.msra.mxu1 %v14885_v28 }
 0x85d   :  { %12518 = vmatprep.subr.bf16.mxu1 %v14911_v43 }
 0x860   :  { %12520 = vmatpush3.bf16.msra.mxu1 %v14911_v43 }
 0x861   :  { %12522 = vmatprep.subr.bf16.mxu1 %v14915_v20 }
 0x864   :  { %12524 = vmatpush3.bf16.msra.mxu1 %v14915_v20 }
 0x865   :  { %12526 = vmatprep.subr.bf16.mxu1 %v14930_v55 }
 0x868   :  { %12528 = vmatpush3.bf16.msra.mxu1 %v14930_v55 }
 0x869   :  { %12530 = vmatprep.subr.bf16.mxu1 %v14936_v56 }
 0x86c   :  { %12532 = vmatpush3.bf16.msra.mxu1 %v14936_v56 }
 0x86d   :  { %12534 = vmatprep.subr.bf16.mxu1 %v12533_v10 }
 0x86f   :  { %10863 = vmatmul.mubr.f32.vlgmr.msra.gmra.mrb[10].mxu1 %v5248_v17  ;;  %v15313_v17 = vsub.f32 %v15135_v36, %v5865_v35 }
 0x870   :  { %12536 = vmatpush3.bf16.msra.mxu1 %v12533_v10  ;;  %10897 = vmatprep.mubr.f32.mxu1 %v15092_v30 }
 0x871   :  { %12538 = vmatprep.subr.bf16.mxu1 %v12537_v6  ;;  %v5972_v10 = vand.u32 4294901760, %v15313_v17 }
 0x873   :  { %v5973_v36 = vsub.f32 %v15313_v17, %v5972_v10 }
 0x874   :  { %12540 = vmatpush3.bf16.msra.mxu1 %v12537_v6 }
 0x875   :  { %12542 = vmatprep.subr.bf16.mxu1 %v12541_v59  ;;  %v5974_v35 = vand.u32 4294901760, %v5973_v36 }
 0x877   :  { %v15329_v6 = vpack.c.bf16 %v5974_v35, %v5967_v62 }
 0x878   :  { %12544 = vmatpush3.bf16.msra.mxu1 %v12541_v59 }
 0x879   :  { %12546 = vmatprep.subr.bf16.mxu1 %v12545_v58 }
 0x87c   :  { %12548 = vmatpush3.bf16.msra.mxu1 %v12545_v58 }
 0x87d   :  { %12550 = vmatprep.subr.bf16.mxu1 %v12549_v5 }
 0x880   :  { %12552 = vmatpush3.bf16.msra.mxu1 %v12549_v5 }
 0x881   :  { %12554 = vmatprep.subr.bf16.mxu1 %v12553_v26 }
 0x884   :  { %12556 = vmatpush3.bf16.msra.mxu1 %v12553_v26 }
 0x885   :  { %12558 = vmatprep.subr.bf16.mxu1 %v12557_v49 }
 0x888   :  { %12560 = vmatpush3.bf16.msra.mxu1 %v12557_v49 }
 0x889   :  { %12562 = vmatprep.subr.bf16.mxu1 %v12561_v11 }
 0x88c   :  { %12564 = vmatpush3.bf16.msra.mxu1 %v12561_v11  ;;  %v15356_v11 = vsub.f32 %v5853_v31, %v5886_v8  ;;  %v15374_v8 = vsub.f32 %v5856_v46, %v5895_v42 }
 0x88d   :  { %12566 = vmatprep.subr.bf16.mxu1 %v14789_v51 }
 0x88e   :  { %v15948_v62 = vand.u32 4294901760, %v15374_v8 }
 0x88f   :  { %10898 = vmatmul.mubr.f32.vlgmr.msra.gmra.mrb[10].mxu1 %v15089_v1 }
 0x890   :  { %12568 = vmatpush3.bf16.msra.mxu1 %v14789_v51  ;;  %10932 = vmatprep.mubr.f32.mxu1 %v15092_v30  ;;  %v5849_v51 = vld [vmem:[%s15917_s15 + $0x20] sm:$0xff]  ;;  %v5860_v30 = vld [vmem:[%s15917_s15 + $0x78] sm:$0xff] }
 0x891   :  { %12570 = vmatprep.subr.bf16.mxu1 %v14795_v12  ;;  %v5907_v22 = vand.u32 4294901760, %v5860_v30 }
 0x894   :  { %12572 = vmatpush3.bf16.msra.mxu1 %v14795_v12  ;;  %v5850_v12 = vld [vmem:[%s15917_s15 + $0x28] sm:$0xff] }
 0x895   :  { %12574 = vmatprep.subr.bf16.mxu1 %v14875_v33 }
 0x898   :  { %12576 = vmatpush3.bf16.msra.mxu1 %v14875_v33  ;;  %v5874_v33 = vand.u32 4294901760, %v5849_v51 }
 0x899   :  { %12578 = vmatprep.subr.bf16.mxu1 %v14885_v28 }
 0x89a   :  { %v15331_v59 = vsub.f32 %v5849_v51, %v5874_v33  ;;  %v15358_v51 = vsub.f32 %v5854_v40, %v5889_v13  ;;  %v15372_v40 = vsub.f32 %v5855_v60, %v5892_v45  ;;  %v6043_v60 = vsub.f32 %v15374_v8, %v15948_v62 }
 0x89c   :  { %12580 = vmatpush3.bf16.msra.mxu1 %v14885_v28  ;;  %v5877_v28 = vand.u32 4294901760, %v5850_v12  ;;  %v5993_v58 = vand.u32 4294901760, %v15331_v59  ;;  %v15949_v36 = vand.u32 4294901760, %v15372_v40 }
 0x89d   :  { %12582 = vmatprep.subr.bf16.mxu1 %v14911_v43 }
 0x89e   :  { %v15333_v19 = vsub.f32 %v5850_v12, %v5877_v28  ;;  %v5994_v2 = vsub.f32 %v15331_v59, %v5993_v58 }
 0x8a0   :  { %12584 = vmatpush3.bf16.msra.mxu1 %v14911_v43  ;;  %v15257_v43 = vpack.c.bf16 %v5877_v28, %v5874_v33  ;;  %v6000_v14 = vand.u32 4294901760, %v15333_v19  ;;  %v5995_v26 = vand.u32 4294901760, %v5994_v2  ;;  %v6036_v2 = vsub.f32 %v15372_v40, %v15949_v36 }
 0x8a1   :  { %12586 = vmatprep.subr.bf16.mxu1 %v14915_v20 }
 0x8a2   :  { %12606 = vmatprep.subr.bf16.mxu0 %v15257_v43  ;;  %v6001_v24 = vsub.f32 %v15333_v19, %v6000_v14  ;;  %v6037_v46 = vand.u32 4294901760, %v6036_v2  ;;  %v12669_v2 = vpack.c.bf16 %v15333_v19, %v15331_v59  ;;  %v15978_v59 = vand.u32 4294901760, %v15374_v8 }
 0x8a3   :  { %12608 = vmatpush3.bf16.msra.mxu0 %v15257_v43 }
 0x8a4   :  { %12588 = vmatpush3.bf16.msra.mxu1 %v14915_v20  ;;  %v5851_v20 = vld [vmem:[%s15917_s15 + $0x30] sm:$0xff]  ;;  %v6002_v49 = vand.u32 4294901760, %v6001_v24  ;;  %v15383_v24 = vsub.f32 %v5857_v54, %v5898_v7  ;;  %v15400_v7 = vsub.f32 %v5860_v30, %v5907_v22 }
 0x8a5   :  { %12590 = vmatprep.subr.bf16.mxu1 %v14930_v55 }
 0x8a6   :  { %v15360_v12 = vpack.c.bf16 %v6002_v49, %v5995_v26  ;;  %v15385_v26 = vsub.f32 %v5858_v39, %v5901_v44  ;;  %v15947_v45 = vand.u32 4294901760, %v15383_v24  ;;  %v6044_v49 = vand.u32 4294901760, %v6043_v60 }
 0x8a8   :  { %12592 = vmatpush3.bf16.msra.mxu1 %v14930_v55  ;;  %v5852_v55 = vld [vmem:[%s15917_s15 + $0x38] sm:$0xff]  ;;  %v15946_v42 = vand.u32 4294901760, %v15385_v26  ;;  %v12649_v44 = vpack.c.bf16 %v6044_v49, %v6037_v46  ;;  %v12677_v46 = vpack.c.bf16 %v15358_v51, %v15356_v11  ;;  %v15420_v49 = vpack.c.bf16 %v15374_v8, %v15372_v40 }
 0x8a9   :  { %12594 = vmatprep.subr.bf16.mxu1 %v14936_v56  ;;  %v5883_v61 = vand.u32 4294901760, %v5852_v55 }
 0x8aa   :  { %v6057_v54 = vsub.f32 %v15385_v26, %v15946_v42 }
 0x8ab   :  { %v15343_v53 = vsub.f32 %v5852_v55, %v5883_v61  ;;  %v6028_v55 = vand.u32 4294901760, %v15358_v51 }
 0x8ac   :  { %12596 = vmatpush3.bf16.msra.mxu1 %v14936_v56  ;;  %v5880_v56 = vand.u32 4294901760, %v5851_v20 }
 0x8ad   :  { %v6014_v9 = vand.u32 4294901760, %v15343_v53  ;;  %v6029_v31 = vsub.f32 %v15358_v51, %v6028_v55  ;;  %v6566_v51 = vld [vmem:[%s15918_s16 + $0x8] sm:$0xff] }
 0x8ae   :  { %v15267_v32 = vpack.c.bf16 %v5883_v61, %v5880_v56  ;;  %v15341_v5 = vsub.f32 %v5851_v20, %v5880_v56  ;;  %v6021_v20 = vand.u32 4294901760, %v15356_v11 }
 0x8af   :  { %10933 = vmatmul.mubr.f32.vlgmr.msra.gmra.mrb[10].mxu1 %v15089_v1  ;;  %v5859_v1 = vld [vmem:[%s15917_s15 + $0x70] sm:$0xff]  ;;  %v6015_v4 = vsub.f32 %v15343_v53, %v6014_v9  ;;  %v6030_v21 = vand.u32 4294901760, %v6029_v31 }
 0x8b0   :  { %12610 = vmatprep.subr.bf16.mxu0 %v15267_v32  ;;  %v5904_v15 = vand.u32 4294901760, %v5859_v1  ;;  %v6007_v18 = vand.u32 4294901760, %v15341_v5  ;;  %v6022_v61 = vsub.f32 %v15356_v11, %v6021_v20  ;;  %v12673_v60 = vpack.c.bf16 %v15343_v53, %v15341_v5 }
 0x8b1   :  { %12612 = vmatpush3.bf16.msra.mxu0 %v15267_v32  ;;  %v6016_v28 = vand.u32 4294901760, %v6015_v4 }
 0x8b2   :  { %12614 = vmatprep.subr.bf16.mxu0 %v15277_v27  ;;  %v15316_v23 = vpack.c.bf16 %v5907_v22, %v5904_v15  ;;  %v6008_v57 = vsub.f32 %v15341_v5, %v6007_v18  ;;  %v6023_v13 = vand.u32 4294901760, %v6022_v61  ;;  %v15398_v39 = vsub.f32 %v5859_v1, %v5904_v15 }
 0x8b3   :  { %v15944_v61 = vand.u32 4294901760, %v15400_v7  ;;  %v12661_v22 = vpack.c.bf16 %v15313_v17, %v15308_v16  ;;  %v12733_v16 = vpack.c.bf16 %v6000_v14, %v5993_v58  ;;  %v12737_v17 = vpack.c.bf16 %v6014_v9, %v6007_v18 }
 0x8b4   :  { %v6009_v33 = vand.u32 4294901760, %v6008_v57  ;;  %v15378_v35 = vpack.c.bf16 %v6030_v21, %v6023_v13  ;;  %v6050_v57 = vsub.f32 %v15383_v24, %v15947_v45  ;;  %v15979_v58 = vand.u32 4294901760, %v15383_v24 }
 0x8b5   :  { %12616 = vmatpush3.bf16.msra.mxu0 %v15277_v27  ;;  %v6071_v21 = vsub.f32 %v15400_v7, %v15944_v61  ;;  %v15980_v14 = vand.u32 4294901760, %v15385_v26  ;;  %v15981_v53 = vand.u32 4294901760, %v15398_v39  ;;  %v15982_v18 = vand.u32 4294901760, %v15400_v7 }
 0x8b6   :  { %12618 = vmatprep.subr.bf16.mxu0 %v15287_v38  ;;  %v15364_v56 = vpack.c.bf16 %v6016_v28, %v6009_v33  ;;  %v6051_v4 = vand.u32 4294901760, %v6050_v57  ;;  %v6058_v33 = vand.u32 4294901760, %v6057_v54  ;;  %v15945_v28 = vand.u32 4294901760, %v15398_v39 }
 0x8b7   :  { %v6072_v15 = vand.u32 4294901760, %v6071_v21  ;;  %v15424_v57 = vpack.c.bf16 %v15385_v26, %v15383_v24  ;;  %v15428_v54 = vpack.c.bf16 %v15400_v7, %v15398_v39  ;;  %v15438_v21 = vsub.f32 %v15148_v47, %v5871_v29 }
 0x8b8   :  { %v12653_v31 = vpack.c.bf16 %v6058_v33, %v6051_v4  ;;  %v6064_v13 = vsub.f32 %v15398_v39, %v15945_v28  ;;  %v12749_v5 = vpack.c.bf16 %v15980_v14, %v15979_v58  ;;  %v12753_v9 = vpack.c.bf16 %v15982_v18, %v15981_v53 }
 0x8b9   :  { %12620 = vmatpush3.bf16.msra.mxu0 %v15287_v38  ;;  %v5986_v42 = vand.u32 4294901760, %v15438_v21 }
 0x8ba   :  { %12622 = vmatprep.subr.bf16.mxu0 %v15303_v52  ;;  %v6065_v1 = vand.u32 4294901760, %v6064_v13  ;;  %v15433_v13 = vsub.f32 %v15140_v41, %v5868_v63 }
 0x8bc   :  { %v12657_v30 = vpack.c.bf16 %v6072_v15, %v6065_v1 }
 0x8bd   :  { %12624 = vmatpush3.bf16.msra.mxu0 %v15303_v52 }
 0x8be   :  { %12626 = vmatprep.subr.bf16.mxu0 %v15316_v23 }
 0x8c1   :  { %12628 = vmatpush3.bf16.msra.mxu0 %v15316_v23 }
 0x8c2   :  { %12630 = vmatprep.subr.bf16.mxu0 %v15329_v6 }
 0x982   :  { %v10934_v4 = vpop.f32.mrb[10].mxu1 }
 0x983   :  { %13186 = vrcp.f32 %v10934_v4  ;;  %v5829_v33 = vpop.f32.mrb[11].mxu1 }
 0x984   :  { %13188 = vrcp.f32 %v5829_v33  ;;  %v5979_v33 = vand.u32 4294901760, %v15433_v13 }
 0x98d   :  { %v13187_v1 = vpop.eup %13186 }
 0x98e   :  { %v13189_v15 = vpop.eup %13188  ;;  %v5842_v61 = vmul.f32 %v13187_v1, %v15084_v0  ;;  %v5980_v0 = vsub.f32 %v15433_v13, %v5979_v33 }
 0x98f   :  { %v5840_v28 = vmul.f32 %v13189_v15, %v15086_v25 }
 0x990   :  { %v5844_v4 = vmul.f32 %v14632_v50, %v5842_v61  ;;  %v5987_v50 = vsub.f32 %v15438_v21, %v5986_v42  ;;  %v5981_v61 = vand.u32 4294901760, %v5980_v0  ;;  %v6572_v0 = vld [vmem:[%s15918_s16 + $0x38] sm:$0xff] }
 0x991   :  { %v5843_v41 = vmul.f32 %v5840_v28, %v14635_v48 }
 0x992   :  { %v15446_v63 = vand.u32 4294901760, %v5844_v4  ;;  %v5988_v1 = vand.u32 4294901760, %v5987_v50 }
 0x993   :  { %v15448_v45 = vand.u32 4294901760, %v5843_v41 }
 0x994   :  { %v15451_v47 = vsub.f32 %v5844_v4, %v15446_v63  ;;  %v12633_v36 = vpack.c.bf16 %v5988_v1, %v5981_v61 }
 0x995   :  { %v5943_v25 = vsub.f32 %v5843_v41, %v15448_v45 }
 0x996   :  { %v5954_v29 = vand.u32 4294901760, %v15451_v47 }
 0x997   :  { %v5944_v48 = vand.u32 4294901760, %v5943_v25 }
 0x998   :  { %v5955_v28 = vsub.f32 %v15451_v47, %v5954_v29 }
 0x999   :  { %v5945_v15 = vsub.f32 %v5943_v25, %v5944_v48 }
 0x99a   :  { %v5956_v62 = vand.u32 4294901760, %v5955_v28 }
 0x99b   :  { %v5946_v4 = vand.u32 4294901760, %v5945_v15 }
 0x99d   :  { %10967 = vmatprep.mubr.f32.mxu0 %v5946_v4 }
 0x99e   :  { %10968 = vmatmul.mubr.f32.vlgmr.msra.gmra.mrb[6].mxu0 %v5956_v62 }
 0x99f   :  { %12632 = vmatpush3.bf16.msra.mxu0 %v15329_v6  ;;  %11002 = vmatprep.mubr.f32.mxu0 %v15448_v45  ;;  %v12665_v6 = vpack.c.bf16 %v15438_v21, %v15433_v13 }
 0x9a0   :  { %12634 = vmatprep.subr.bf16.mxu0 %v12633_v36 }
 0x9a3   :  { %12636 = vmatpush3.bf16.msra.mxu0 %v12633_v36 }
 0x9a4   :  { %12638 = vmatprep.subr.bf16.mxu0 %v15360_v12 }
 0x9a7   :  { %12640 = vmatpush3.bf16.msra.mxu0 %v15360_v12  ;;  %v12725_v12 = vpack.c.bf16 %v5972_v10, %v5965_v3  ;;  %v12741_v3 = vpack.c.bf16 %v6028_v55, %v6021_v20  ;;  %v15977_v10 = vand.u32 4294901760, %v15372_v40  ;;  %v6578_v20 = vsel %vm6573_vm1, %v6566_v51, 0  ;;  %v6567_v55 = vld [vmem:[%s15918_s16 + $0x10] sm:$0xff]  ;;  %v6568_v40 = vld [vmem:[%s15918_s16 + $0x18] sm:$0xff] }
 0x9a8   :  { %12642 = vmatprep.subr.bf16.mxu0 %v15364_v56  ;;  %v15580_v8 = vand.u32 4294901760, %v6578_v20  ;;  %v6581_v62 = vsel %vm6573_vm1, %v6567_v55, 0  ;;  %v6584_v26 = vsel %vm6573_vm1, %v6568_v40, 0 }
 0x9a9   :  { %v12745_v19 = vpack.c.bf16 %v15978_v59, %v15977_v10  ;;  %v15590_v7 = vand.u32 4294901760, %v6581_v62 }
 0x9aa   :  { %v15588_v39 = vsub.f32 %v6578_v20, %v15580_v8 }
 0x9ab   :  { %12644 = vmatpush3.bf16.msra.mxu0 %v15364_v56  ;;  %v12729_v56 = vpack.c.bf16 %v5986_v42, %v5979_v33  ;;  %v6569_v42 = vld [vmem:[%s15918_s16 + $0x20] sm:$0xff]  ;;  %v6571_v33 = vld [vmem:[%s15918_s16 + $0x30] sm:$0xff] }
 0x9ac   :  { %12646 = vmatprep.subr.bf16.mxu0 %v15378_v35 }
 0x9af   :  { %12648 = vmatpush3.bf16.msra.mxu0 %v15378_v35 }
 0x9b0   :  { %12650 = vmatprep.subr.bf16.mxu0 %v12649_v44 }
 0x9b3   :  { %12652 = vmatpush3.bf16.msra.mxu0 %v12649_v44 }
 0x9b4   :  { %12654 = vmatprep.subr.bf16.mxu0 %v12653_v31 }
 0x9b7   :  { %12656 = vmatpush3.bf16.msra.mxu0 %v12653_v31 }
 0x9b8   :  { %12658 = vmatprep.subr.bf16.mxu0 %v12657_v30 }
 0x9bb   :  { %12660 = vmatpush3.bf16.msra.mxu0 %v12657_v30 }
 0x9bc   :  { %12662 = vmatprep.subr.bf16.mxu0 %v12661_v22 }
 0x9be   :  { %11003 = vmatmul.mubr.f32.vlgmr.msra.gmra.mrb[6].mxu0 %v15446_v63 }
 0x9bf   :  { %12664 = vmatpush3.bf16.msra.mxu0 %v12661_v22  ;;  %11037 = vmatprep.mubr.f32.mxu0 %v5943_v25  ;;  %v15598_v22 = vand.u32 4294901760, %v6584_v26  ;;  %v15618_v25 = vsub.f32 %v6581_v62, %v15590_v7 }
 0x9c0   :  { %12666 = vmatprep.subr.bf16.mxu0 %v12665_v6 }
 0x9c1   :  { %v6693_v14 = vand.u32 4294901760, %v15618_v25 }
 0x9c3   :  { %12668 = vmatpush3.bf16.msra.mxu0 %v12665_v6  ;;  %v6593_v6 = vsel %vm6573_vm1, %v6571_v33, 0 }
 0x9c4   :  { %12670 = vmatprep.subr.bf16.mxu0 %v12669_v2  ;;  %v15652_v53 = vand.u32 4294901760, %v6593_v6 }
 0x9c7   :  { %12672 = vmatpush3.bf16.msra.mxu0 %v12669_v2  ;;  %v6570_v2 = vld [vmem:[%s15918_s16 + $0x28] sm:$0xff] }
 0x9c8   :  { %12674 = vmatprep.subr.bf16.mxu0 %v12673_v60 }
 0x9cb   :  { %12676 = vmatpush3.bf16.msra.mxu0 %v12673_v60 }
 0x9cc   :  { %12678 = vmatprep.subr.bf16.mxu0 %v12677_v46 }
 0x9cf   :  { %12680 = vmatpush3.bf16.msra.mxu0 %v12677_v46 }
 0x9d0   :  { %12682 = vmatprep.subr.bf16.mxu0 %v15420_v49 }
 0x9d3   :  { %12684 = vmatpush3.bf16.msra.mxu0 %v15420_v49 }
 0x9d4   :  { %12686 = vmatprep.subr.bf16.mxu0 %v15424_v57 }
 0x9d7   :  { %12688 = vmatpush3.bf16.msra.mxu0 %v15424_v57  ;;  %v6587_v57 = vsel %vm6573_vm1, %v6569_v42, 0 }
 0x9d8   :  { %12690 = vmatprep.subr.bf16.mxu0 %v15428_v54 }
 0x9db   :  { %12692 = vmatpush3.bf16.msra.mxu0 %v15428_v54 }
 0x9dc   :  { %12694 = vmatprep.subr.bf16.mxu0 %v15156_v34 }
 0x9de   :  { %11038 = vmatmul.mubr.f32.vlgmr.msra.gmra.mrb[6].mxu0 %v15451_v47  ;;  %v6590_v47 = vsel %vm6573_vm1, %v6570_v2, 0 }
 0x9df   :  { %12696 = vmatpush3.bf16.msra.mxu0 %v15156_v34  ;;  %11072 = vmatprep.mubr.f32.mxu0 %v5944_v48  ;;  %v15623_v48 = vand.u32 4294901760, %v6587_v57 }
 0x9e0   :  { %12698 = vmatprep.subr.bf16.mxu0 %v15162_v37 }
 0x9e3   :  { %12700 = vmatpush3.bf16.msra.mxu0 %v15162_v37 }
 0x9e4   :  { %12702 = vmatprep.subr.bf16.mxu0 %v15257_v43 }
 0x9e7   :  { %12704 = vmatpush3.bf16.msra.mxu0 %v15257_v43 }
 0x9e8   :  { %12706 = vmatprep.subr.bf16.mxu0 %v15267_v32 }
 0x9eb   :  { %12708 = vmatpush3.bf16.msra.mxu0 %v15267_v32 }
 0x9ec   :  { %12710 = vmatprep.subr.bf16.mxu0 %v15277_v27 }
 0x9ef   :  { %12712 = vmatpush3.bf16.msra.mxu0 %v15277_v27 }
 0x9f0   :  { %12714 = vmatprep.subr.bf16.mxu0 %v15287_v38 }
 0x9f3   :  { %12716 = vmatpush3.bf16.msra.mxu0 %v15287_v38 }
 0x9f4   :  { %12718 = vmatprep.subr.bf16.mxu0 %v15303_v52 }
 0x9f7   :  { %12720 = vmatpush3.bf16.msra.mxu0 %v15303_v52 }
 0x9f8   :  { %12722 = vmatprep.subr.bf16.mxu0 %v15316_v23 }
 0x9fb   :  { %12724 = vmatpush3.bf16.msra.mxu0 %v15316_v23 }
 0x9fc   :  { %12726 = vmatprep.subr.bf16.mxu0 %v12725_v12 }
 0x9fe   :  { %11073 = vmatmul.mubr.f32.vlgmr.msra.gmra.mrb[6].mxu0 %v5954_v29  ;;  %v15621_v29 = vsub.f32 %v6584_v26, %v15598_v22 }
 0x9ff   :  { %12728 = vmatpush3.bf16.msra.mxu0 %v12725_v12  ;;  %11107 = vmatprep.mubr.f32.mxu0 %v15448_v45 }
 0xa00   :  { %12730 = vmatprep.subr.bf16.mxu0 %v12729_v56 }
 0xa03   :  { %12732 = vmatpush3.bf16.msra.mxu0 %v12729_v56 }
 0xa04   :  { %12734 = vmatprep.subr.bf16.mxu0 %v12733_v16 }
 0xa07   :  { %12736 = vmatpush3.bf16.msra.mxu0 %v12733_v16  ;;  %v15637_v16 = vand.u32 4294901760, %v6590_v47 }
 0xa08   :  { %12738 = vmatprep.subr.bf16.mxu0 %v12737_v17 }
 0xa0b   :  { %12740 = vmatpush3.bf16.msra.mxu0 %v12737_v17  ;;  %v6596_v17 = vsel %vm6573_vm1, %v6572_v0, 0 }
 0xa0c   :  { %12742 = vmatprep.subr.bf16.mxu0 %v12741_v3 }
 0xa0f   :  { %12744 = vmatpush3.bf16.msra.mxu0 %v12741_v3 }
 0xa10   :  { %12746 = vmatprep.subr.bf16.mxu0 %v12745_v19 }
 0xa13   :  { %12748 = vmatpush3.bf16.msra.mxu0 %v12745_v19 }
 0xa14   :  { %12750 = vmatprep.subr.bf16.mxu0 %v12749_v5 }
 0xa17   :  { %12752 = vmatpush3.bf16.msra.mxu0 %v12749_v5  ;;  %v15650_v5 = vsub.f32 %v6587_v57, %v15623_v48 }
 0xa18   :  { %12754 = vmatprep.subr.bf16.mxu0 %v12753_v9 }
 0xa19   :  { %v6713_v62 = vand.u32 4294901760, %v15650_v5 }
 0xa1b   :  { %12756 = vmatpush3.bf16.msra.mxu0 %v12753_v9 }
 0xa1c   :  { %12758 = vmatprep.subr.bf16.mxu0 %v15156_v34 }
 0xa1e   :  { %11108 = vmatmul.mubr.f32.vlgmr.msra.gmra.mrb[6].mxu0 %v15446_v63 }
 0xa1f   :  { %12760 = vmatpush3.bf16.msra.mxu0 %v15156_v34  ;;  %11142 = vmatprep.mubr.f32.mxu0 %v15448_v45  ;;  %v6565_v34 = vld [vmem:[%s15918_s16] sm:$0xff] }
 0xa20   :  { %12762 = vmatprep.subr.bf16.mxu0 %v15162_v37 }
 0xa23   :  { %12764 = vmatpush3.bf16.msra.mxu0 %v15162_v37  ;;  %v6575_v37 = vsel %vm6573_vm1, %v6565_v34, 0 }
 0xa24   :  { %12766 = vmatprep.subr.bf16.mxu0 %v15257_v43 }
 0xa27   :  { %12768 = vmatpush3.bf16.msra.mxu0 %v15257_v43  ;;  %v15556_v43 = vand.u32 4294901760, %v6575_v37 }
 0xa28   :  { %12770 = vmatprep.subr.bf16.mxu0 %v15267_v32 }
 0xa2b   :  { %12772 = vmatpush3.bf16.msra.mxu0 %v15267_v32 }
 0xa2c   :  { %12774 = vmatprep.subr.bf16.mxu0 %v15277_v27 }
 0xa2f   :  { %12776 = vmatpush3.bf16.msra.mxu0 %v15277_v27 }
 0xa30   :  { %12778 = vmatprep.subr.bf16.mxu0 %v15287_v38 }
 0xa33   :  { %12780 = vmatpush3.bf16.msra.mxu0 %v15287_v38  ;;  %v15561_v38 = vsub.f32 %v6575_v37, %v15556_v43  ;;  %v6703_v37 = vand.u32 4294901760, %v15621_v29 }
 0xa34   :  { %12782 = vmatprep.subr.bf16.mxu0 %v15303_v52 }
 0xa37   :  { %12784 = vmatpush3.bf16.msra.mxu0 %v15303_v52  ;;  %v6673_v52 = vand.u32 4294901760, %v15561_v38 }
 0xa38   :  { %12786 = vmatprep.subr.bf16.mxu0 %v15316_v23 }
 0xa3b   :  { %12788 = vmatpush3.bf16.msra.mxu0 %v15316_v23  ;;  %v6674_v23 = vsub.f32 %v15561_v38, %v6673_v52 }
 0xa3d   :  { %v6675_v11 = vand.u32 4294901760, %v6674_v23  ;;  %v15665_v23 = vsub.f32 %v6590_v47, %v15637_v16  ;;  %v6714_v47 = vsub.f32 %v15650_v5, %v6713_v62 }
 0xa3e   :  { %11143 = vmatmul.mubr.f32.vlgmr.msra.gmra.mrb[6].mxu0 %v15446_v63  ;;  %v6683_v63 = vand.u32 4294901760, %v15588_v39 }
 0xa3f   :  { %11161 = vmatprep.mubr.f32.mxu1 %v6675_v11  ;;  %v15667_v11 = vand.u32 4294901760, %v6596_v17 }
 0xa40   :  { %v6684_v34 = vsub.f32 %v15588_v39, %v6683_v63 }
 0xb11   :  { %v15558_v32 = vpop.f32.mrb[6].mxu0 }
 0xb12   :  { %v6535_v27 = vpop.f32.mrb[7].mxu0  ;;  %v6611_v41 = vand.u32 4294901760, %v15558_v32 }
 0xb13   :  { %6549 = vrot.lane.b32.xlu1 %v6535_v27, %s13298_s13  ;;  %6546 = vrot.lane.b32.xlu0 %v6535_v27, %s13299_s22  ;;  %v6599_v36 = vand.u32 4294901760, %v6535_v27 }
 0xb14   :  { %v15645_v58 = vsub.f32 %v15558_v32, %v6611_v41 }
 0xb15   :  { %v15592_v44 = vsub.f32 %v6535_v27, %v6599_v36 }
 0xb16   :  { %v6782_v42 = vand.u32 4294901760, %v15645_v58 }
 0xb17   :  { %6556 = vrot.lane.b32.xlu1 %v15558_v32, %s13299_s22  ;;  %6552 = vrot.lane.b32.xlu0 %v6535_v27, %s13300_s0  ;;  %v6754_v50 = vand.u32 4294901760, %v15592_v44  ;;  %s13301_s22 = smov 16  }
 0xb19   :  { %v6755_v9 = vsub.f32 %v15592_v44, %v6754_v50 }
 0xb1b   :  { %6562 = vrot.lane.b32.xlu1 %v15558_v32, %s13300_s0  ;;  %6559 = vrot.lane.b32.xlu0 %v15558_v32, %s13298_s13  ;;  %v6756_v26 = vand.u32 4294901760, %v6755_v9 }
 0xb85   :  { %v6550_v35 = vpop.permute.xlu1 %6549  ;;  %v6547_v24 = vpop.permute.xlu0 %6546 }
 0xb86   :  { %v6602_v45 = vand.u32 4294901760, %v6547_v24  ;;  %v6605_v60 = vand.u32 4294901760, %v6550_v35 }
 0xb88   :  { %v15594_v31 = vpack.c.bf16 %v6602_v45, %v6599_v36  ;;  %v15596_v30 = vsub.f32 %v6547_v24, %v6602_v45  ;;  %v15625_v28 = vsub.f32 %v6550_v35, %v6605_v60  ;;  %v6694_v36 = vsub.f32 %v15618_v25, %v6693_v14 }
 0xb89   :  { %v6557_v46 = vpop.permute.xlu1 %6556  ;;  %v6553_v49 = vpop.permute.xlu0 %6552  ;;  %v15684_v35 = vsub.f32 %v6593_v6, %v15652_v53  ;;  %v6685_v45 = vand.u32 4294901760, %v6684_v34 }
 0xb8a   :  { %v6761_v54 = vand.u32 4294901760, %v15596_v30  ;;  %v6614_v13 = vand.u32 4294901760, %v6557_v46  ;;  %v6608_v21 = vand.u32 4294901760, %v6553_v49  ;;  %12790 = vmatprep.subr.bf16.mxu1 %v15594_v31  ;;  %v6768_v18 = vand.u32 4294901760, %v15625_v28 }
 0xb8b   :  { %12792 = vmatpush3.bf16.msra.mxu1 %v15594_v31  ;;  %v6733_v0 = vand.u32 4294901760, %v15684_v35 }
 0xb8c   :  { %v15627_v61 = vpack.c.bf16 %v6608_v21, %v6605_v60  ;;  %v15629_v1 = vsub.f32 %v6553_v49, %v6608_v21  ;;  %v6762_v12 = vsub.f32 %v15596_v30, %v6761_v54  ;;  %v15635_v56 = vsub.f32 %v6557_v46, %v6614_v13 }
 0xb8d   :  { %v6563_v15 = vpop.permute.xlu1 %6562  ;;  %v6560_v4 = vpop.permute.xlu0 %6559  ;;  %v15640_v3 = vpack.c.bf16 %v6614_v13, %v6611_v41  ;;  %v6769_v24 = vsub.f32 %v15625_v28, %v6768_v18  ;;  %v6704_v60 = vsub.f32 %v15621_v29, %v6703_v37  ;;  %v6723_v46 = vand.u32 4294901760, %v15665_v23 }
 0xb8e   :  { %v6775_v10 = vand.u32 4294901760, %v15629_v1  ;;  %v6620_v59 = vand.u32 4294901760, %v6563_v15  ;;  %v6617_v19 = vand.u32 4294901760, %v6560_v4  ;;  %12794 = vmatprep.subr.bf16.mxu1 %v15627_v61  ;;  %v6789_v32 = vand.u32 4294901760, %v15635_v56 }
 0xb8f   :  { %12796 = vmatpush3.bf16.msra.mxu1 %v15627_v61  ;;  %v6763_v27 = vand.u32 4294901760, %v6762_v12  ;;  %v15699_v49 = vsub.f32 %v6596_v17, %v15667_v11  ;;  %v6695_v41 = vand.u32 4294901760, %v6694_v36  ;;  %v6705_v6 = vand.u32 4294901760, %v6704_v60 }
 0xb90   :  { %12798 = vmatprep.subr.bf16.mxu1 %v15640_v3  ;;  %v6776_v51 = vsub.f32 %v15629_v1, %v6775_v10  ;;  %v15672_v20 = vsub.f32 %v6563_v15, %v6620_v59  ;;  %v15674_v55 = vpack.c.bf16 %v6620_v59, %v6617_v19  ;;  %v15676_v40 = vsub.f32 %v6560_v4, %v6617_v19 }
 0xb91   :  { %v6790_v2 = vsub.f32 %v15635_v56, %v6789_v32  ;;  %v12805_v21 = vpack.c.bf16 %v6763_v27, %v6756_v26  ;;  %v6770_v15 = vand.u32 4294901760, %v6769_v24  ;;  %v6783_v4 = vsub.f32 %v15645_v58, %v6782_v42 }
 0xb92   :  { %v15950_v57 = vand.u32 4294901760, %v15672_v20  ;;  %v6796_v13 = vand.u32 4294901760, %v15676_v40  ;;  %v6777_v33 = vand.u32 4294901760, %v6776_v51  ;;  %v6724_v12 = vsub.f32 %v15665_v23, %v6723_v46 }
 0xb93   :  { %12800 = vmatpush3.bf16.msra.mxu1 %v15640_v3  ;;  %v6743_v17 = vand.u32 4294901760, %v15699_v49  ;;  %v6791_v34 = vand.u32 4294901760, %v6790_v2  ;;  %v6715_v27 = vand.u32 4294901760, %v6714_v47  ;;  %v6734_v51 = vsub.f32 %v15684_v35, %v6733_v0 }
 0xb94   :  { %12802 = vmatprep.subr.bf16.mxu1 %v15674_v55  ;;  %v6804_v59 = vsub.f32 %v15672_v20, %v15950_v57  ;;  %v6797_v19 = vsub.f32 %v15676_v40, %v6796_v13  ;;  %v12809_v9 = vpack.c.bf16 %v6777_v33, %v6770_v15  ;;  %v6784_v36 = vand.u32 4294901760, %v6783_v4 }
 0xb95   :  { %v6725_v24 = vand.u32 4294901760, %v6724_v12  ;;  %v6735_v2 = vand.u32 4294901760, %v6734_v51  ;;  %v12825_v47 = vpack.c.bf16 %v15629_v1, %v15625_v28  ;;  %v12833_v15 = vpack.c.bf16 %v15672_v20, %v15676_v40 }
 0xb96   :  { %v12813_v26 = vpack.c.bf16 %v6791_v34, %v6784_v36  ;;  %v6798_v60 = vand.u32 4294901760, %v6797_v19  ;;  %v6805_v57 = vand.u32 4294901760, %v6804_v59  ;;  %v12853_v4 = vpack.c.bf16 %v6761_v54, %v6754_v50 }
 0xb97   :  { %12804 = vmatpush3.bf16.msra.mxu1 %v15674_v55 }
 0xb98   :  { %12806 = vmatprep.subr.bf16.mxu1 %v12805_v21 }
 0xb9a   :  { %11162 = vmatmul.mubr.f32.vlgmr.msra.gmra.mrb[12].mxu1 %v6685_v45  ;;  %v6744_v45 = vsub.f32 %v15699_v49, %v6743_v17 }
 0xb9b   :  { %12808 = vmatpush3.bf16.msra.mxu1 %v12805_v21  ;;  %11164 = vmatprep.mubr.f32.mxu1 %v6695_v41  ;;  %v12817_v21 = vpack.c.bf16 %v6805_v57, %v6798_v60  ;;  %v12821_v41 = vpack.c.bf16 %v15596_v30, %v15592_v44  ;;  %v12829_v57 = vpack.c.bf16 %v15635_v56, %v15645_v58  ;;  %v7469_v44 = vld [vmem:[%s15907_s5] sm:$0xff] }
 0xb9c   :  { %12810 = vmatprep.subr.bf16.mxu1 %v12809_v9  ;;  %v6745_v33 = vand.u32 4294901760, %v6744_v45 }
 0xb9e   :  { %11165 = vmatmul.mubr.f32.gmra.mrb[14].mxu1 %v6705_v6  ;;  %v12857_v6 = vpack.c.bf16 %v6775_v10, %v6768_v18 }
 0xb9f   :  { %12812 = vmatpush3.bf16.msra.mxu1 %v12809_v9  ;;  %11167 = vmatprep.mubr.f32.mxu1 %v6715_v27 }
 0xba0   :  { %12814 = vmatprep.subr.bf16.mxu1 %v12813_v26 }
 0xba2   :  { %11168 = vmatmul.mubr.f32.gmra.mrb[16].mxu1 %v6725_v24 }
 0xba3   :  { %12816 = vmatpush3.bf16.msra.mxu1 %v12813_v26  ;;  %11170 = vmatprep.mubr.f32.mxu1 %v6735_v2 }
 0xba4   :  { %12818 = vmatprep.subr.bf16.mxu1 %v12817_v21 }
 0xba6   :  { %11171 = vmatmul.mubr.f32.gmra.mrb[18].mxu1 %v6745_v33 }
 0xba7   :  { %12820 = vmatpush3.bf16.msra.mxu1 %v12817_v21  ;;  %11189 = vmatprep.mubr.f32.mxu1 %v15556_v43 }
 0xba8   :  { %12822 = vmatprep.subr.bf16.mxu1 %v12821_v41 }
 0xbaa   :  { %11190 = vmatmul.mubr.f32.vlgmr.msra.gmra.mrb[12].mxu1 %v15580_v8 }
 0xbab   :  { %12824 = vmatpush3.bf16.msra.mxu1 %v12821_v41  ;;  %11192 = vmatprep.mubr.f32.mxu1 %v15590_v7 }
 0xbac   :  { %12826 = vmatprep.subr.bf16.mxu1 %v12825_v47 }
 0xbae   :  { %11193 = vmatmul.mubr.f32.gmra.mrb[14].mxu1 %v15598_v22 }
 0xbaf   :  { %12828 = vmatpush3.bf16.msra.mxu1 %v12825_v47  ;;  %11195 = vmatprep.mubr.f32.mxu1 %v15623_v48 }
 0xbb0   :  { %12830 = vmatprep.subr.bf16.mxu1 %v12829_v57 }
 0xbb2   :  { %11196 = vmatmul.mubr.f32.gmra.mrb[16].mxu1 %v15637_v16 }
 0xbb3   :  { %12832 = vmatpush3.bf16.msra.mxu1 %v12829_v57  ;;  %11198 = vmatprep.mubr.f32.mxu1 %v15652_v53 }
 0xbb4   :  { %12834 = vmatprep.subr.bf16.mxu1 %v12833_v15 }
 0xbb6   :  { %11199 = vmatmul.mubr.f32.gmra.mrb[18].mxu1 %v15667_v11 }
 0xbb7   :  { %12836 = vmatpush3.bf16.msra.mxu1 %v12833_v15  ;;  %11217 = vmatprep.mubr.f32.mxu1 %v15561_v38  ;;  %v12861_v38 = vpack.c.bf16 %v6789_v32, %v6782_v42 }
 0xbb8   :  { %12838 = vmatprep.subr.bf16.mxu1 %v15594_v31 }
 0xbba   :  { %11218 = vmatmul.mubr.f32.vlgmr.msra.gmra.mrb[12].mxu1 %v15588_v39 }
 0xbbb   :  { %12840 = vmatpush3.bf16.msra.mxu1 %v15594_v31  ;;  %11220 = vmatprep.mubr.f32.mxu1 %v15618_v25 }
 0xbbc   :  { %12842 = vmatprep.subr.bf16.mxu1 %v15627_v61 }
 0xbbe   :  { %11221 = vmatmul.mubr.f32.gmra.mrb[14].mxu1 %v15621_v29  ;;  %v7471_v29 = vld [vmem:[%s15907_s5 + $0x10] sm:$0xff] }
 0xbbf   :  { %12844 = vmatpush3.bf16.msra.mxu1 %v15627_v61  ;;  %11223 = vmatprep.mubr.f32.mxu1 %v15650_v5  ;;  %v7493_v28 = vand.u32 4294901760, %v7471_v29 }
 0xbc0   :  { %12846 = vmatprep.subr.bf16.mxu1 %v15640_v3 }
 0xbc2   :  { %11224 = vmatmul.mubr.f32.gmra.mrb[16].mxu1 %v15665_v23 }
 0xbc3   :  { %12848 = vmatpush3.bf16.msra.mxu1 %v15640_v3  ;;  %11226 = vmatprep.mubr.f32.mxu1 %v15684_v35 }
 0xbc4   :  { %12850 = vmatprep.subr.bf16.mxu1 %v15674_v55 }
 0xbc6   :  { %11227 = vmatmul.mubr.f32.gmra.mrb[18].mxu1 %v15699_v49 }
 0xbc7   :  { %12852 = vmatpush3.bf16.msra.mxu1 %v15674_v55  ;;  %11245 = vmatprep.mubr.f32.mxu1 %v6673_v52  ;;  %v15983_v52 = vand.u32 4294901760, %v15672_v20 }
 0xbc8   :  { %12854 = vmatprep.subr.bf16.mxu1 %v12853_v4 }
 0xbc9   :  { %v12865_v39 = vpack.c.bf16 %v15983_v52, %v6796_v13 }
 0xbca   :  { %11246 = vmatmul.mubr.f32.vlgmr.msra.gmra.mrb[12].mxu1 %v6683_v63 }
 0xbcb   :  { %12856 = vmatpush3.bf16.msra.mxu1 %v12853_v4  ;;  %11248 = vmatprep.mubr.f32.mxu1 %v6693_v14  ;;  %v7591_v14 = vsub.f32 %v7471_v29, %v7493_v28 }
 0xbcc   :  { %12858 = vmatprep.subr.bf16.mxu1 %v12857_v6 }
 0xbcd   :  { %v7592_v32 = vand.u32 4294901760, %v7591_v14 }
 0xbce   :  { %11249 = vmatmul.mubr.f32.gmra.mrb[14].mxu1 %v6703_v37 }
 0xbcf   :  { %12860 = vmatpush3.bf16.msra.mxu1 %v12857_v6  ;;  %11251 = vmatprep.mubr.f32.mxu1 %v6713_v62 }
 0xbd0   :  { %12862 = vmatprep.subr.bf16.mxu1 %v12861_v38 }
 0xbd2   :  { %11252 = vmatmul.mubr.f32.gmra.mrb[16].mxu1 %v6723_v46 }
 0xbd3   :  { %12864 = vmatpush3.bf16.msra.mxu1 %v12861_v38  ;;  %11254 = vmatprep.mubr.f32.mxu1 %v6733_v0 }
 0xbd4   :  { %12866 = vmatprep.subr.bf16.mxu1 %v12865_v39 }
 0xbd6   :  { %11255 = vmatmul.mubr.f32.gmra.mrb[18].mxu1 %v6743_v17 }
 0xbd7   :  { %12868 = vmatpush3.bf16.msra.mxu1 %v12865_v39  ;;  %11273 = vmatprep.mubr.f32.mxu1 %v15556_v43 }
 0xbd8   :  { %12870 = vmatprep.subr.bf16.mxu1 %v15594_v31 }
 0xbda   :  { %11274 = vmatmul.mubr.f32.vlgmr.msra.gmra.mrb[12].mxu1 %v15580_v8 }
 0xbdb   :  { %12872 = vmatpush3.bf16.msra.mxu1 %v15594_v31  ;;  %11276 = vmatprep.mubr.f32.mxu1 %v15590_v7 }
 0xbdc   :  { %12874 = vmatprep.subr.bf16.mxu1 %v15627_v61 }
 0xbde   :  { %11277 = vmatmul.mubr.f32.gmra.mrb[14].mxu1 %v15598_v22 }
 0xbdf   :  { %12876 = vmatpush3.bf16.msra.mxu1 %v15627_v61  ;;  %11279 = vmatprep.mubr.f32.mxu1 %v15623_v48 }
 0xbe0   :  { %12878 = vmatprep.subr.bf16.mxu1 %v15640_v3 }
 0xbe2   :  { %11280 = vmatmul.mubr.f32.gmra.mrb[16].mxu1 %v15637_v16 }
 0xbe3   :  { %12880 = vmatpush3.bf16.msra.mxu1 %v15640_v3  ;;  %11282 = vmatprep.mubr.f32.mxu1 %v15652_v53 }
 0xbe4   :  { %12882 = vmatprep.subr.bf16.mxu1 %v15674_v55 }
 0xbe6   :  { %11283 = vmatmul.mubr.f32.gmra.mrb[18].mxu1 %v15667_v11 }
 0xbe7   :  { %12884 = vmatpush3.bf16.msra.mxu1 %v15674_v55  ;;  %11301 = vmatprep.mubr.f32.mxu1 %v15556_v43  ;;  %v7470_v43 = vld [vmem:[%s15907_s5 + $0x8] sm:$0xff]  ;;  %v7593_v55 = vsub.f32 %v7591_v14, %v7592_v32 }
 0xbe9   :  { %v7594_v35 = vand.u32 4294901760, %v7593_v55 }
 0xbea   :  { %11302 = vmatmul.mubr.f32.vlgmr.msra.gmra.mrb[12].mxu1 %v15580_v8  ;;  %v7487_v8 = vand.u32 4294901760, %v7469_v44 }
 0xbeb   :  { %11304 = vmatprep.mubr.f32.mxu1 %v15590_v7  ;;  %v7490_v7 = vand.u32 4294901760, %v7470_v43 }
 0xbec   :  { %v7577_v63 = vsub.f32 %v7469_v44, %v7487_v8  ;;  %v8657_v44 = vld [vmem:[%s15908_s6] ss:$0 sm:$0xff] }
 0xbed   :  { %v15821_v30 = vpack.c.bf16 %v7490_v7, %v7487_v8  ;;  %v7584_v50 = vsub.f32 %v7470_v43, %v7490_v7 }
 0xbee   :  { %11305 = vmatmul.mubr.f32.gmra.mrb[14].mxu1 %v15598_v22  ;;  %v7578_v1 = vand.u32 4294901760, %v7577_v63 }
 0xbef   :  { %11307 = vmatprep.mubr.f32.mxu1 %v15623_v48  ;;  %12886 = vmatprep.subr.bf16.mxu1 %v15821_v30  ;;  %v7472_v48 = vld [vmem:[%s15907_s5 + $0x18] sm:$0xff]  ;;  %v7585_v56 = vand.u32 4294901760, %v7584_v50  ;;  %s13302_s5 = smov 24   ;;  %v12901_v49 = vpack.c.bf16 %v7584_v50, %v7577_v63 }
 0xbf0   :  { %12888 = vmatpush3.bf16.msra.mxu1 %v15821_v30  ;;  %v7496_v61 = vand.u32 4294901760, %v7472_v48  ;;  %v7579_v10 = vsub.f32 %v7577_v63, %v7578_v1 }
 0xbf1   :  { %v7586_v58 = vsub.f32 %v7584_v50, %v7585_v56  ;;  %v12917_v0 = vpack.c.bf16 %v7585_v56, %v7578_v1 }
 0xbf2   :  { %11308 = vmatmul.mubr.f32.gmra.mrb[16].mxu1 %v15637_v16  ;;  %v15833_v3 = vpack.c.bf16 %v7496_v61, %v7493_v28  ;;  %v7580_v18 = vand.u32 4294901760, %v7579_v10  ;;  %v8061_v10 = vld [vmem:[%s15911_s9 + $0x10] sm:$0xff] }
 0xbf3   :  { %11310 = vmatprep.mubr.f32.mxu1 %v15652_v53  ;;  %v7598_v53 = vsub.f32 %v7472_v48, %v7496_v61  ;;  %v7587_v37 = vand.u32 4294901760, %v7586_v58 }
 0xbf4   :  { %12890 = vmatprep.subr.bf16.mxu1 %v15833_v3 }
 0xbf5   :  { %12892 = vmatpush3.bf16.msra.mxu1 %v15833_v3  ;;  %v7599_v23 = vand.u32 4294901760, %v7598_v53  ;;  %v12893_v20 = vpack.c.bf16 %v7587_v37, %v7580_v18  ;;  %v12905_v13 = vpack.c.bf16 %v7598_v53, %v7591_v14 }
 0xbf6   :  { %11311 = vmatmul.mubr.f32.gmra.mrb[18].mxu1 %v15667_v11 }
 0xbf7   :  { %v7600_v62 = vsub.f32 %v7598_v53, %v7599_v23  ;;  %12894 = vmatprep.subr.bf16.mxu1 %v12893_v20  ;;  %v12921_v12 = vpack.c.bf16 %v7599_v23, %v7592_v32  ;;  %v8083_v53 = vand.u32 4294901760, %v8061_v10 }
 0xbf9   :  { %v7601_v42 = vand.u32 4294901760, %v7600_v62 }
 0xbfb   :  { %v12897_v46 = vpack.c.bf16 %v7601_v42, %v7594_v35  ;;  %v8181_v35 = vsub.f32 %v8061_v10, %v8083_v53 }
 0xcbd   :  { %v11303_v31 = vpop.f32.mrb[12].mxu1 }
 0xcbe   :  { %v7390_v22 = vpop.f32.mrb[13].mxu1 }
 0xcc1   :  { %v11306_v54 = vpop.f32.mrb[14].mxu1 }
 0xcc2   :  { %7440 = vrot.lane.b32.xlu1 %v11306_v54, %s13291_s25  ;;  %v7402_v25 = vpop.f32.mrb[15].mxu1 }
 0xcc3   :  { %7438 = vrot.lane.b32.xlu0 %v7402_v25, %s13291_s25 }
 0xcc5   :  { %v11309_v16 = vpop.f32.mrb[16].mxu1 }
 0xcc6   :  { %7448 = vrot.lane.b32.xlu1 %v11309_v16, %s13301_s22  ;;  %v7414_v5 = vpop.f32.mrb[17].mxu1  ;;  %v8059_v16 = vld [vmem:[%s15911_s9] sm:$0xff] }
 0xcc7   :  { %7446 = vrot.lane.b32.xlu0 %v7414_v5, %s13301_s22  ;;  %v8077_v58 = vand.u32 4294901760, %v8059_v16  ;;  %v8062_v5 = vld [vmem:[%s15911_s9 + $0x18] sm:$0xff] }
 0xcc8   :  { %v8086_v18 = vand.u32 4294901760, %v8062_v5 }
 0xcc9   :  { %v11312_v11 = vpop.f32.mrb[18].mxu1  ;;  %v8167_v23 = vsub.f32 %v8059_v16, %v8077_v58 }
 0xcca   :  { %7456 = vrot.lane.b32.xlu1 %v11312_v11, %s13302_s5  ;;  %v7426_v40 = vpop.f32.mrb[19].mxu1  ;;  %v15868_v32 = vpack.c.bf16 %v8086_v18, %v8083_v53  ;;  %v8188_v42 = vsub.f32 %v8062_v5, %v8086_v18 }
 0xccb   :  { %7454 = vrot.lane.b32.xlu0 %v7426_v40, %s13302_s5 }
 0xd34   :  { %v7441_v17 = vpop.permute.xlu1 %7440 }
 0xd35   :  { %v7439_v59 = vpop.permute.xlu0 %7438  ;;  %v7462_v34 = vsel %vm7460_vm3, %v11303_v31, %v7441_v17 }
 0xd36   :  { %v7461_v27 = vsel %vm7460_vm3, %v7390_v22, %v7439_v59 }
 0xd38   :  { %v7449_v19 = vpop.permute.xlu1 %7448 }
 0xd39   :  { %v7447_v9 = vpop.permute.xlu0 %7446  ;;  %v7465_v51 = vsel %vm7463_vm4, %v7462_v34, %v7449_v19 }
 0xd3a   :  { %v7464_v24 = vsel %vm7463_vm4, %v7461_v27, %v7447_v9 }
 0xd3c   :  { %v7457_v36 = vpop.permute.xlu1 %7456 }
 0xd3d   :  { %v7468_v26 = vsel %vm7466_vm5, %v7465_v51, %v7457_v36  ;;  %v7455_v60 = vpop.permute.xlu0 %7454  ;;  %v12953_v51 = vpack.c.bf16 %v8188_v42, %v8181_v35 }
 0xd3e   :  { %v7484_v45 = vsel %vm822_vm2, %v7468_v26, 0  ;;  %v7467_v2 = vsel %vm7466_vm5, %v7464_v24, %v7455_v60 }
 0xd3f   :  { %v7565_v21 = vand.u32 4294901760, %v7484_v45  ;;  %v7481_v33 = vsel %vm822_vm2, %v7467_v2, 0 }
 0xd40   :  { %v7555_v41 = vand.u32 4294901760, %v7481_v33 }
 0xd41   :  { %v7566_v47 = vsub.f32 %v7484_v45, %v7565_v21 }
 0xd42   :  { %v7556_v57 = vsub.f32 %v7481_v33, %v7555_v41 }
 0xd43   :  { %v7567_v15 = vand.u32 4294901760, %v7566_v47 }
 0xd44   :  { %v7557_v4 = vand.u32 4294901760, %v7556_v57 }
 0xd45   :  { %v7568_v6 = vsub.f32 %v7566_v47, %v7567_v15 }
 0xd46   :  { %v7558_v38 = vsub.f32 %v7556_v57, %v7557_v4 }
 0xd47   :  { %v7569_v39 = vand.u32 4294901760, %v7568_v6 }
 0xd48   :  { %v7559_v52 = vand.u32 4294901760, %v7558_v38 }
 0xd4a   :  { %11321 = vmatprep.mubr.f32.mxu1 %v7559_v52 }
 0xd4b   :  { %11322 = vmatmul.mubr.f32.vlgmr.msra.gmra.mrb[20].mxu1 %v7569_v39 }
 0xd4c   :  { %12896 = vmatpush3.bf16.msra.mxu1 %v12893_v20  ;;  %11332 = vmatprep.mubr.f32.mxu1 %v7555_v41  ;;  %v8168_v20 = vand.u32 4294901760, %v8167_v23 }
 0xd4d   :  { %12898 = vmatprep.subr.bf16.mxu1 %v12897_v46 }
 0xd4e   :  { %v8169_v40 = vsub.f32 %v8167_v23, %v8168_v20 }
 0xd50   :  { %12900 = vmatpush3.bf16.msra.mxu1 %v12897_v46  ;;  %v8170_v46 = vand.u32 4294901760, %v8169_v40 }
 0xd51   :  { %12902 = vmatprep.subr.bf16.mxu1 %v12901_v49 }
 0xd53   :  { %11333 = vmatmul.mubr.f32.vlgmr.msra.gmra.mrb[20].mxu1 %v7565_v21 }
 0xd54   :  { %12904 = vmatpush3.bf16.msra.mxu1 %v12901_v49  ;;  %11343 = vmatprep.mubr.f32.mxu1 %v7556_v57 }
 0xd55   :  { %12906 = vmatprep.subr.bf16.mxu1 %v12905_v13 }
 0xd58   :  { %12908 = vmatpush3.bf16.msra.mxu1 %v12905_v13  ;;  %v8182_v13 = vand.u32 4294901760, %v8181_v35 }
 0xd59   :  { %12910 = vmatprep.subr.bf16.mxu1 %v15821_v30 }
 0xd5a   :  { %v8183_v17 = vsub.f32 %v8181_v35, %v8182_v13 }
 0xd5b   :  { %11344 = vmatmul.mubr.f32.vlgmr.msra.gmra.mrb[20].mxu1 %v7566_v47  ;;  %v8658_v47 = vld [vmem:[%s15909_s7] ss:$0 sm:$0xff]  ;;  %s13303_s7 = smov [#allocation8]  }
 0xd5c   :  { %12912 = vmatpush3.bf16.msra.mxu1 %v15821_v30  ;;  %11354 = vmatprep.mubr.f32.mxu1 %v7557_v4  ;;  %v8184_v19 = vand.u32 4294901760, %v8183_v17  ;;  %s8611_s1 = sshll.u32 %s13303_s7, 4  ;;  %s8612_s1 = int_to_ptr.vmem [resolvable:$true] %s8611_s1 }
 0xd5d   :  { %12914 = vmatprep.subr.bf16.mxu1 %v15833_v3  ;;  %s13260_s20 = scalar_lea.vmem %s8612_s1, 256  ;;  %p13265_p11 = scmp.lt.s32.totalorder %s8612_s1, %s8612_s1 }
 0xd5e   :  { %p13261_p10 = scmp.ne.s32.totalorder %s8612_s1, %s13260_s20  ;;  %p13266_p12 = scmp.lt.s32.totalorder %s13260_s20, %s13260_s20 }
 0xd60   :  { %12916 = vmatpush3.bf16.msra.mxu1 %v15833_v3  ;;  %p13267_p13 = por %p13266_p12, %p13265_p11 }
 0xd61   :  { %12918 = vmatprep.subr.bf16.mxu1 %v12917_v0 }
 0xd62   :  { %p13268_p0 = pnand %p13267_p13, %p13261_p10 }
 0xd63   :  { %11355 = vmatmul.mubr.f32.vlgmr.msra.gmra.mrb[20].mxu1 %v7567_v15  ;;  %v8659_v15 = vld [vmem:[#allocation5] ss:$0 sm:$0xff] }
 0xd64   :  { %12920 = vmatpush3.bf16.msra.mxu1 %v12917_v0  ;;  %11365 = vmatprep.mubr.f32.mxu1 %v7555_v41  ;;  %v8189_v0 = vand.u32 4294901760, %v8188_v42 }
 0xd65   :  { %12922 = vmatprep.subr.bf16.mxu1 %v12921_v12 }
 0xd66   :  { %v8190_v59 = vsub.f32 %v8188_v42, %v8189_v0  ;;  %v12969_v24 = vpack.c.bf16 %v8189_v0, %v8182_v13 }
 0xd68   :  { %12924 = vmatpush3.bf16.msra.mxu1 %v12921_v12  ;;  %v8191_v9 = vand.u32 4294901760, %v8190_v59 }
 0xd69   :  { %12926 = vmatprep.subr.bf16.mxu1 %v15821_v30 }
 0xd6a   :  { %v12945_v34 = vpack.c.bf16 %v8191_v9, %v8184_v19 }
 0xd6b   :  { %11366 = vmatmul.mubr.f32.vlgmr.msra.gmra.mrb[20].mxu1 %v7565_v21 }
 0xd6c   :  { %12928 = vmatpush3.bf16.msra.mxu1 %v15821_v30  ;;  %11376 = vmatprep.mubr.f32.mxu1 %v7555_v41 }
 0xd6d   :  { %12930 = vmatprep.subr.bf16.mxu1 %v15833_v3 }
 0xd70   :  { %12932 = vmatpush3.bf16.msra.mxu1 %v15833_v3  ;;  %v8060_v3 = vld [vmem:[%s15911_s9 + $0x8] sm:$0xff] }
 0xd71   :  { %v8080_v14 = vand.u32 4294901760, %v8060_v3 }
 0xd73   :  { %11377 = vmatmul.mubr.f32.vlgmr.msra.gmra.mrb[20].mxu1 %v7565_v21  ;;  %v15866_v37 = vpack.c.bf16 %v8080_v14, %v8077_v58  ;;  %v8174_v11 = vsub.f32 %v8060_v3, %v8080_v14 }
 0xd75   :  { %12934 = vmatprep.subr.bf16.mxu1 %v15866_v37  ;;  %v8175_v55 = vand.u32 4294901760, %v8174_v11  ;;  %v12949_v27 = vpack.c.bf16 %v8174_v11, %v8167_v23 }
 0xd76   :  { %12936 = vmatpush3.bf16.msra.mxu1 %v15866_v37 }
 0xd77   :  { %12938 = vmatprep.subr.bf16.mxu1 %v15868_v32  ;;  %v8176_v62 = vsub.f32 %v8174_v11, %v8175_v55  ;;  %v12965_v36 = vpack.c.bf16 %v8175_v55, %v8168_v20 }
 0xd79   :  { %v8177_v49 = vand.u32 4294901760, %v8176_v62 }
 0xd7a   :  { %12940 = vmatpush3.bf16.msra.mxu1 %v15868_v32 }
 0xd7b   :  { %v12941_v12 = vpack.c.bf16 %v8177_v49, %v8170_v46 }
 0xd7d   :  { %12942 = vmatprep.subr.bf16.mxu1 %v12941_v12 }
 0xe46   :  { %v11378_v43 = vpop.f32.mrb[20].mxu1 }
 0xe47   :  { %v12985_v8 = vadd.f32 %v11378_v43, %v8657_v44  ;;  %v8004_v7 = vpop.f32.mrb[21].mxu1 }
 0xe48   :  { %v12986_v31 = vadd.f32 %v8657_v44, %v8004_v7 }
 0xe49   :  { %v8017_v22 = vsel %vm822_vm2, %v12985_v8, 0.0 }
 0xe4a   :  { %8018 = vadd.xlane.f32.xlu1 %v8017_v22  ;;  %v8014_v54 = vsel %vm822_vm2, %v12986_v31, 0.0 }
 0xe4b   :  { %8015 = vadd.xlane.f32.xlu0 %v8014_v54 }
 0xed7   :  { %v8019_v30 = vpop.xlane.xlu1 %8018 }
 0xed8   :  { %v8022_v63 = vmul.f32 0.03125, %v8019_v30  ;;  %v8016_v50 = vpop.xlane.xlu0 %8015 }
 0xed9   :  { %v8021_v25 = vmul.f32 0.03125, %v8016_v50 }
 0xeda   :  { %v8024_v29 = vsub.f32 %v12985_v8, %v8022_v63 }
 0xedb   :  { %v8023_v48 = vsub.f32 %v12986_v31, %v8021_v25 }
 0xedc   :  { %v8026_v1 = vmul.f32 %v8024_v29, %v8024_v29 }
 0xedd   :  { %v8025_v28 = vmul.f32 %v8023_v48, %v8023_v48 }
 0xede   :  { %v8030_v56 = vsel %vm822_vm2, %v8026_v1, 0.0 }
 0xedf   :  { %v8027_v61 = vsel %vm822_vm2, %v8025_v28, 0.0 }
 0xee0   :  { %8028 = vadd.xlane.f32.xlu0 %v8027_v61 }
 0xee4   :  { %8031 = vadd.xlane.f32.xlu0 %v8030_v56 }
 0xf6d   :  { %v8029_v26 = vpop.xlane.xlu0 %8028 }
 0xf6e   :  { %v8033_v60 = vmul.f32 0.03125, %v8029_v26 }
 0xf70   :  { %v8035_v45 = vadd.f32 1e-05, %v8033_v60 }
 0xf71   :  { %v8032_v2 = vpop.xlane.xlu0 %8031 }
 0xf72   :  { %13190 = vrsqrt.f32 %v8035_v45  ;;  %v8034_v21 = vmul.f32 0.03125, %v8032_v2 }
 0xf74   :  { %v8036_v33 = vadd.f32 1e-05, %v8034_v21 }
 0xf76   :  { %13192 = vrsqrt.f32 %v8036_v33 }
 0xf7c   :  { %v13191_v41 = vpop.eup %13190 }
 0xf7d   :  { %v8039_v57 = vmul.f32 %v13191_v41, %v8023_v48 }
 0xf7f   :  { %v8048_v4 = vmul.f32 %v8658_v47, %v8039_v57 }
 0xf80   :  { %v13193_v6 = vpop.eup %13192 }
 0xf81   :  { %v8040_v38 = vmul.f32 %v13193_v6, %v8024_v29  ;;  %v8057_v52 = vadd.f32 %v8659_v15, %v8048_v4  ;;  %v8660_v29 = vld [vmem:[#allocation7] ss:$0 sm:$0xff] }
 0xf83   :  { %v8049_v39 = vmul.f32 %v8658_v47, %v8040_v38  ;;  %v8071_v44 = vsel %vm822_vm2, %v8057_v52, 0 }
 0xf84   :  { %v8145_v43 = vand.u32 4294901760, %v8071_v44 }
 0xf85   :  { %v8058_v8 = vadd.f32 %v8659_v15, %v8049_v39 }
 0xf86   :  { %v8146_v7 = vsub.f32 %v8071_v44, %v8145_v43 }
 0xf87   :  { %v8074_v31 = vsel %vm822_vm2, %v8058_v8, 0 }
 0xf88   :  { %v8147_v22 = vand.u32 4294901760, %v8146_v7  ;;  %v8155_v54 = vand.u32 4294901760, %v8074_v31 }
 0xf8a   :  { %v8148_v30 = vsub.f32 %v8146_v7, %v8147_v22  ;;  %v8156_v63 = vsub.f32 %v8074_v31, %v8155_v54 }
 0xf8c   :  { %v8149_v50 = vand.u32 4294901760, %v8148_v30  ;;  %v8157_v25 = vand.u32 4294901760, %v8156_v63 }
 0xf8e   :  { %11387 = vmatprep.mubr.f32.mxu1 %v8149_v50  ;;  %v8158_v48 = vsub.f32 %v8156_v63, %v8157_v25 }
 0xf90   :  { %v8159_v28 = vand.u32 4294901760, %v8158_v48 }
 0xf92   :  { %11388 = vmatmul.mubr.f32.vlgmr.msra.gmra.mrb[22].mxu1 %v8159_v28 }
 0xf93   :  { %12944 = vmatpush3.bf16.msra.mxu1 %v12941_v12  ;;  %11398 = vmatprep.mubr.f32.mxu1 %v8145_v43 }
 0xf94   :  { %12946 = vmatprep.subr.bf16.mxu1 %v12945_v34 }
 0xf97   :  { %12948 = vmatpush3.bf16.msra.mxu1 %v12945_v34 }
 0xf98   :  { %12950 = vmatprep.subr.bf16.mxu1 %v12949_v27 }
 0xf9a   :  { %11399 = vmatmul.mubr.f32.vlgmr.msra.gmra.mrb[22].mxu1 %v8155_v54 }
 0xf9b   :  { %12952 = vmatpush3.bf16.msra.mxu1 %v12949_v27  ;;  %11409 = vmatprep.mubr.f32.mxu1 %v8146_v7 }
 0xf9c   :  { %12954 = vmatprep.subr.bf16.mxu1 %v12953_v51 }
 0xf9f   :  { %12956 = vmatpush3.bf16.msra.mxu1 %v12953_v51 }
 0xfa0   :  { %12958 = vmatprep.subr.bf16.mxu1 %v15866_v37 }
 0xfa2   :  { %11410 = vmatmul.mubr.f32.vlgmr.msra.gmra.mrb[22].mxu1 %v8156_v63 }
 0xfa3   :  { %12960 = vmatpush3.bf16.msra.mxu1 %v15866_v37  ;;  %11420 = vmatprep.mubr.f32.mxu1 %v8147_v22 }
 0xfa4   :  { %12962 = vmatprep.subr.bf16.mxu1 %v15868_v32 }
 0xfa7   :  { %12964 = vmatpush3.bf16.msra.mxu1 %v15868_v32 }
 0xfa8   :  { %12966 = vmatprep.subr.bf16.mxu1 %v12965_v36 }
 0xfaa   :  { %11421 = vmatmul.mubr.f32.vlgmr.msra.gmra.mrb[22].mxu1 %v8157_v25 }
 0xfab   :  { %12968 = vmatpush3.bf16.msra.mxu1 %v12965_v36  ;;  %11431 = vmatprep.mubr.f32.mxu1 %v8145_v43 }
 0xfac   :  { %12970 = vmatprep.subr.bf16.mxu1 %v12969_v24 }
 0xfaf   :  { %12972 = vmatpush3.bf16.msra.mxu1 %v12969_v24 }
 0xfb0   :  { %12974 = vmatprep.subr.bf16.mxu1 %v15866_v37 }
 0xfb2   :  { %11432 = vmatmul.mubr.f32.vlgmr.msra.gmra.mrb[22].mxu1 %v8155_v54 }
 0xfb3   :  { %12976 = vmatpush3.bf16.msra.mxu1 %v15866_v37  ;;  %11442 = vmatprep.mubr.f32.mxu1 %v8145_v43 }
 0xfb4   :  { %12978 = vmatprep.subr.bf16.mxu1 %v15868_v32 }
 0xfb7   :  { %12980 = vmatpush3.bf16.msra.mxu1 %v15868_v32 }
 0xfba   :  { %11443 = vmatmul.mubr.f32.vlgmr.msra.gmra.mrb[22].mxu1 %v8155_v54 }
0x108d   :  { %v11444_v61 = vpop.f32.mrb[22].mxu1 }
0x108e   :  { %v12987_v1 = vadd.f32 %v11444_v61, %v8660_v29  ;;  %v8594_v56 = vpop.f32.mrb[23].mxu1 }
0x108f   :  { %v12988_v16 = vadd.f32 %v8660_v29, %v8594_v56 }
0x1090   :  { %8605 = vst [vmem:[#allocation8 + $0x8] sm:$0xff] %v12987_v1 }
0x1091   :  { %8604 = vst [vmem:[#allocation8] sm:$0xff] %v12988_v16 }
0x1092   :  { %13271 = shalt.err (!%p13268_p0)
}
0x1093   :  { %s13272_s24 = scalar_lea.hbm %s15919_s17, 256 }
0x1094   :  { %p13273_p1 = scmp.ne.s32.totalorder %s15919_s17, %s13272_s24  ;;  %p13276_p2 = scmp.lt.u32.totalorder %s13272_s24, %s15919_s17 }
0x1096   :  { %p13278_p3 = pnand %p13276_p2, %p13273_p1 }
0x1098   :  { %13281 = shalt.err (!%p13278_p3)
}
0x1099   :  { %8617 = dma.vmem_to_hbm [thread:$0]  %s8612_s1, 256, %s15919_s17, [#allocation4], %s13290_s8, %s13290_s8, %s13291_s25  }
0x109a   :  { %13286 = dma.done.wait [#allocation4], 256  }
0x109b   :  { %13287 = vsyncadd [#allocation4], 4294967040 }
0x109c   :  { %8621 = vsyncpa [#allocation3], 1 }
0x109d   :  { %8622 = vsyncpa [#allocation6], 1 }
0x109e   :  { %8623 = vsyncpa [#allocation4], 1 }

</bundles_post_ra>
